<compile_context>
chip_gen: v7x
topology: tpu7x:2x2x1
jax: 0.10.0
libtpu: 0.0.40
codegen_flags: <defaults>
</compile_context>

<pallas_src>
import functools

import jax
import jax.numpy as jnp
from jax.experimental import pallas as pl
from jax.experimental.pallas import tpu as pltpu

# ---------------------------------------------------------------------------
# Module configuration.  lastdepth (first conv in_channels) is hard-coded to
# 1024 inside DiscriminatorXZ.__init__; KS / ST / DP are the ctor arguments
# (small kernels, 1x1 tail, final depth 1 -> Sigmoid score map).
# ---------------------------------------------------------------------------
LASTDEPTH = 1024
KS = [2, 1, 1]
ST = [2, 1, 1]
DP = [512, 512, 1]
BATCH = 2
IMG = 8

LANE = 128


def _round_up(x, m):
    return ((x + m - 1) // m) * m


def build_layer_cfg():
    layers, cin = [], LASTDEPTH
    for i, (k, s, cout) in enumerate(zip(KS, ST, DP)):
        act = "sigmoid" if i == len(KS) - 1 else "lrelu"  # LeakyReLU(0.1)
        layers.append(dict(k=k, s=s, cin=cin, cout=cout, act=act))
        cin = cout
    return layers


def group_layers(layers):
    """A group = one conv layer + every following 1x1/stride-1 conv.

    All GEMMs inside a group share the same (N*OH*OW) row set, so the whole
    group runs as a single fused Pallas kernel call.
    """
    groups, i = [], 0
    while i < len(layers):
        j = i + 1
        while j < len(layers) and layers[j]["k"] == 1 and layers[j]["s"] == 1:
            j += 1
        groups.append(list(range(i, j)))
        i = j
    return groups


# ---------------------------------------------------------------------------
# Deterministic parameters
# ---------------------------------------------------------------------------
def build_params(key, layers, groups):
    """Returns (grouped bf16 GEMM weights, raw f32 conv weights, key).

    GEMM weight for a layer: (k*k*Cin_pad, Cout_pad) with Cout zero-padded to
    a multiple of 128 lanes (unmasked stores, full MXU columns) and Cin rows
    padded to the previous layer's padded width (those activation channels are
    exactly 0, so zero rows keep the math exact).
    """
    grouped, raw = [], []
    act_width = layers[0]["cin"]                 # live activation channel width
    for g in groups:
        g_weights = []
        for li in g:
            L = layers[li]
            k, cin, cout = L["k"], L["cin"], L["cout"]
            cout_p = _round_up(cout, LANE)
            key, kw = jax.random.split(key)
            # PyTorch Conv2d weight layout: (Cout, Cin, k, k), bias=False.
            w = jax.random.normal(kw, (cout, cin, k, k), jnp.float32)
            w = w * (1.0 / (cin * k * k) ** 0.5)
            raw.append(w)
            bmat = jnp.transpose(w, (2, 3, 1, 0))            # (k, k, cin, cout)
            bmat = jnp.pad(bmat, ((0, 0), (0, 0),
                                  (0, act_width - cin), (0, cout_p - cout)))
            bmat = bmat.reshape(k * k * act_width, cout_p).astype(jnp.bfloat16)
            g_weights.append(bmat)
            act_width = cout_p
        grouped.append(g_weights)
    return grouped, raw, key


# ---------------------------------------------------------------------------
# JAX glue: im2col (degenerates to a pure reshape for the 1x1 layers)
# ---------------------------------------------------------------------------
def im2col(x, k, s):
    """x: (N, H, W, C) NHWC -> (N*OH*OW, k*k*C); column index = (di*k+dj)*C+c."""
    N, H, W, C = x.shape
    OH = (H - k) // s + 1
    OW = (W - k) // s + 1
    if k == 1 and s == 1:
        return x.reshape(N * H * W, C), (N, H, W)
    patches = []
    for di in range(k):
        for dj in range(k):
            patches.append(x[:, di:di + s * (OH - 1) + 1:s,
                              dj:dj + s * (OW - 1) + 1:s, :])
    cols = jnp.stack(patches, axis=3)                 # (N, OH, OW, k*k, C)
    return cols.reshape(N * OH * OW, k * k * C), (N, OH, OW)


# ---------------------------------------------------------------------------
# Pallas kernel: fused GEMM chain + LeakyReLU(0.1) / Sigmoid epilogues
# ---------------------------------------------------------------------------
def disc_group_kernel(a_ref, *refs, acts):
    """refs = (w_ref_0, ..., w_ref_{G-1}, o_ref).

    h <- A tile (bf16); for each stage: h <- act(h @ W_j) with f32 MXU
    accumulation and f32 epilogue; bf16 re-cast only as the next MXU operand.
    """
    w_refs, o_ref = refs[:-1], refs[-1]
    h = a_ref[...]                                           # (TM, K0) bf16
    for j, (w_ref, act) in enumerate(zip(w_refs, acts)):
        h = jnp.dot(h, w_ref[...], preferred_element_type=jnp.float32)
        if act == "lrelu":
            h = jnp.where(h >= 0.0, h, 0.1 * h)
        elif act == "sigmoid":
            h = 1.0 / (1.0 + jnp.exp(-h))
        if j + 1 < len(w_refs):
            h = h.astype(jnp.bfloat16)                       # next MXU operand
    o_ref[...] = h.astype(o_ref.dtype)


def run_group(cols, weights, acts, out_dtype):
    """cols: (M, K0) bf16; weights: list of (K_j, C_j) bf16 -> (M, C_last)."""
    M, K0 = cols.shape
    cout_f = weights[-1].shape[1]

    # Row tiling: full-M block when small (grid=1, no padding round-trip),
    # 512-row blocks otherwise (amortizes per-step overhead, ~85% of roofline).
    TM = M if M <= 512 else 512
    grid_m = pl.cdiv(M, TM)

    # VMEM budget from actual block bytes (double-buffered), clamped to 32 MiB
    # so bigger tiles stay within v7x's scoped default / 64 MiB physical VMEM.
    out_itemsize = 4 if out_dtype == jnp.float32 else 2
    est = (2 * TM * K0 * 2
           + 2 * sum(w.shape[0] * w.shape[1] * 2 for w in weights)
           + 2 * TM * cout_f * out_itemsize
           + 4 * TM * max(w.shape[1] for w in weights) * 4)   # f32 intermediates
    vmem_limit = max(16 * 1024 * 1024,
                     min(int(est * 1.3), 32 * 1024 * 1024))

    in_specs = [pl.BlockSpec((TM, K0), lambda i: (i, 0))]
    for w in weights:                                         # resident weights
        kk, cc = w.shape
        in_specs.append(pl.BlockSpec((kk, cc), lambda i: (0, 0)))

    return pl.pallas_call(
        functools.partial(disc_group_kernel, acts=tuple(acts)),
        out_shape=jax.ShapeDtypeStruct((M, cout_f), out_dtype),
        grid=(grid_m,),
        in_specs=in_specs,
        out_specs=pl.BlockSpec((TM, cout_f), lambda i: (i, 0)),
        compiler_params=pltpu.CompilerParams(
            dimension_semantics=("parallel",),
            vmem_limit_bytes=vmem_limit,
        ),
    )(cols, *weights)


# ---------------------------------------------------------------------------
# DiscriminatorXZ.forward (eval mode)
# ---------------------------------------------------------------------------
def discriminator_xz_forward(x_nchw, params, layers, groups):
    # TODO(synk): training-mode Dropout (p=0.5 then 0.2) is stochastic and is
    # omitted; this is the eval-mode forward (Dropout == identity).
    x = jnp.transpose(x_nchw, (0, 2, 3, 1)).astype(jnp.bfloat16)   # NCHW->NHWC
    for gi, g in enumerate(groups):
        L0 = layers[g[0]]
        cols, (N, OH, OW) = im2col(x, L0["k"], L0["s"])
        acts = [layers[li]["act"] for li in g]
        last_group = gi == len(groups) - 1
        out_dtype = jnp.float32 if last_group else jnp.bfloat16
        out = run_group(cols, params[gi], acts, out_dtype)
        x = out.reshape(N, OH, OW, out.shape[1])     # keeps lane padding (zeros)
    x = x[..., :layers[-1]["cout"]]                  # drop lane padding (128->1)
    return jnp.transpose(x, (0, 3, 1, 2))            # NHWC -> NCHW


# ---------------------------------------------------------------------------
# Pure-JAX f32 reference (XLA conv) for a loose correctness check
# ---------------------------------------------------------------------------
def reference_forward(x_nchw, raw_weights, layers):
    x = jnp.transpose(x_nchw, (0, 2, 3, 1))
    for L, w in zip(layers, raw_weights):
        w_hwio = jnp.transpose(w, (2, 3, 1, 0))
        x = jax.lax.conv_general_dilated(
            x, w_hwio, window_strides=(L["s"], L["s"]), padding="VALID",
            dimension_numbers=("NHWC", "HWIO", "NHWC"))
        if L["act"] == "lrelu":
            x = jnp.where(x >= 0.0, x, 0.1 * x)
        else:
            x = jax.nn.sigmoid(x)
    return jnp.transpose(x, (0, 3, 1, 2))


if __name__ == "__main__":
    layers = build_layer_cfg()
    groups = group_layers(layers)

    key = jax.random.PRNGKey(0)
    params, raw_ws, key = build_params(key, layers, groups)
    key, kx = jax.random.split(key)
    x = jax.random.normal(kx, (BATCH, LASTDEPTH, IMG, IMG), jnp.float32)

    fwd = jax.jit(lambda xx, pp: discriminator_xz_forward(xx, pp, layers, groups))
    y = jax.block_until_ready(fwd(x, params))

    h = IMG
    for L in layers:
        h = (h - L["k"]) // L["s"] + 1
    assert y.shape == (BATCH, DP[-1], h, h), y.shape
    assert bool(jnp.all(jnp.isfinite(y)))
    assert bool(jnp.all((y >= 0.0) & (y <= 1.0)))            # Sigmoid range

    # bf16 MXU operands vs f32 XLA reference -> loose tolerance post-sigmoid.
    y_ref = jax.jit(lambda xx: reference_forward(xx, raw_ws, layers))(x)
    max_err = float(jnp.max(jnp.abs(y - y_ref)))
    assert max_err < 0.05, max_err

    print("KERNEL_OK")
</pallas_src>

<mosaic_0001>
module attributes {stable_mosaic.version = 11 : i64} {
  func.func @disc_group_kernel(%arg0: i32, %arg1: memref<32x4096xbf16, #tpu.memory_space<vmem>>, %arg2: memref<4096x512xbf16, #tpu.memory_space<vmem>>, %arg3: memref<512x512xbf16, #tpu.memory_space<vmem>>, %arg4: memref<512x128xbf16, #tpu.memory_space<vmem>>, %arg5: memref<32x128xf32, #tpu.memory_space<vmem>>) attributes {dimension_semantics = [#tpu.dimension_semantics<parallel>], iteration_bounds = array<i64: 1>, scalar_prefetch = 0 : i64, scratch_operands = 0 : i64, tpu.core_type = #tpu.core_type<tc>, window_params = [{transform_indices = @transform_0, window_bounds = array<i64: 32, 4096>}, {pipeline_mode = #tpu.pipeline_mode<synchronous>, transform_indices = @transform_1, window_bounds = array<i64: 4096, 512>}, {pipeline_mode = #tpu.pipeline_mode<synchronous>, transform_indices = @transform_2, window_bounds = array<i64: 512, 512>}, {pipeline_mode = #tpu.pipeline_mode<synchronous>, transform_indices = @transform_3, window_bounds = array<i64: 512, 128>}, {transform_indices = @transform_4, window_bounds = array<i64: 32, 128>}]} {
    %c0 = arith.constant 0 : index
    %c0_0 = arith.constant 0 : index
    %0 = vector.load %arg1[%c0, %c0_0] : memref<32x4096xbf16, #tpu.memory_space<vmem>>, vector<32x4096xbf16>
    %c0_1 = arith.constant 0 : index
    %c0_2 = arith.constant 0 : index
    %1 = vector.load %arg2[%c0_1, %c0_2] : memref<4096x512xbf16, #tpu.memory_space<vmem>>, vector<4096x512xbf16>
    %cst = arith.constant dense<0.000000e+00> : vector<32x512xf32>
    %2 = tpu.matmul %0, %1, %cst {dimension_numbers = #tpu.dot_dimension_numbers<[1], [0], [0], [1], [0, 0, 1, 1], [], []>} : vector<32x4096xbf16>, vector<4096x512xbf16>, vector<32x512xf32> -> vector<32x512xf32>
    %cst_3 = arith.constant 0.000000e+00 : f32
    %3 = vector.broadcast %cst_3 : f32 to vector<32x512xf32>
    %4 = arith.cmpf oge, %2, %3 : vector<32x512xf32>
    %cst_4 = arith.constant 1.000000e-01 : f32
    %5 = vector.broadcast %cst_4 : f32 to vector<32x512xf32>
    %6 = arith.mulf %5, %2 : vector<32x512xf32>
    %7 = arith.select %4, %2, %6 : vector<32x512xi1>, vector<32x512xf32>
    %8 = arith.truncf %7 : vector<32x512xf32> to vector<32x512xbf16>
    %c0_5 = arith.constant 0 : index
    %c0_6 = arith.constant 0 : index
    %9 = vector.load %arg3[%c0_5, %c0_6] : memref<512x512xbf16, #tpu.memory_space<vmem>>, vector<512x512xbf16>
    %cst_7 = arith.constant dense<0.000000e+00> : vector<32x512xf32>
    %10 = tpu.matmul %8, %9, %cst_7 {dimension_numbers = #tpu.dot_dimension_numbers<[1], [0], [0], [1], [0, 0, 1, 1], [], []>} : vector<32x512xbf16>, vector<512x512xbf16>, vector<32x512xf32> -> vector<32x512xf32>
    %cst_8 = arith.constant 0.000000e+00 : f32
    %11 = vector.broadcast %cst_8 : f32 to vector<32x512xf32>
    %12 = arith.cmpf oge, %10, %11 : vector<32x512xf32>
    %cst_9 = arith.constant 1.000000e-01 : f32
    %13 = vector.broadcast %cst_9 : f32 to vector<32x512xf32>
    %14 = arith.mulf %13, %10 : vector<32x512xf32>
    %15 = arith.select %12, %10, %14 : vector<32x512xi1>, vector<32x512xf32>
    %16 = arith.truncf %15 : vector<32x512xf32> to vector<32x512xbf16>
    %c0_10 = arith.constant 0 : index
    %c0_11 = arith.constant 0 : index
    %17 = vector.load %arg4[%c0_10, %c0_11] : memref<512x128xbf16, #tpu.memory_space<vmem>>, vector<512x128xbf16>
    %cst_12 = arith.constant dense<0.000000e+00> : vector<32x128xf32>
    %18 = tpu.matmul %16, %17, %cst_12 {dimension_numbers = #tpu.dot_dimension_numbers<[1], [0], [0], [1], [0, 0, 1, 1], [], []>} : vector<32x512xbf16>, vector<512x128xbf16>, vector<32x128xf32> -> vector<32x128xf32>
    %cst_13 = arith.constant 0.000000e+00 : f32
    %19 = vector.broadcast %cst_13 : f32 to vector<32x128xf32>
    %20 = arith.subf %19, %18 : vector<32x128xf32>
    %21 = math.exp %20 : vector<32x128xf32>
    %cst_14 = arith.constant 1.000000e+00 : f32
    %22 = vector.broadcast %cst_14 : f32 to vector<32x128xf32>
    %23 = arith.addf %22, %21 : vector<32x128xf32>
    %cst_15 = arith.constant 1.000000e+00 : f32
    %24 = vector.broadcast %cst_15 : f32 to vector<32x128xf32>
    %25 = arith.divf %24, %23 : vector<32x128xf32>
    %c0_16 = arith.constant 0 : index
    %c0_17 = arith.constant 0 : index
    %26 = vector.load %arg5[%c0_16, %c0_17] : memref<32x128xf32, #tpu.memory_space<vmem>>, vector<32x128xf32>
    tpu.vector_store %arg5[%c0_16, %c0_17], %25 {strides = array<i32>} : memref<32x128xf32, #tpu.memory_space<vmem>>, vector<32x128xf32>,
    return
  }
  func.func @transform_0(%arg0: i32) -> (i32, i32) {
    %c0_i32 = arith.constant 0 : i32
    %c0_i32_0 = arith.constant 0 : i32
    return %arg0, %c0_i32 : i32, i32
  }
  func.func @transform_1(%arg0: i32) -> (i32, i32) {
    %c0_i32 = arith.constant 0 : i32
    %c0_i32_0 = arith.constant 0 : i32
    %c0_i32_1 = arith.constant 0 : i32
    return %c0_i32, %c0_i32_0 : i32, i32
  }
  func.func @transform_2(%arg0: i32) -> (i32, i32) {
    %c0_i32 = arith.constant 0 : i32
    %c0_i32_0 = arith.constant 0 : i32
    %c0_i32_1 = arith.constant 0 : i32
    return %c0_i32, %c0_i32_0 : i32, i32
  }
  func.func @transform_3(%arg0: i32) -> (i32, i32) {
    %c0_i32 = arith.constant 0 : i32
    %c0_i32_0 = arith.constant 0 : i32
    %c0_i32_1 = arith.constant 0 : i32
    return %c0_i32, %c0_i32_0 : i32, i32
  }
  func.func @transform_4(%arg0: i32) -> (i32, i32) {
    %c0_i32 = arith.constant 0 : i32
    %c0_i32_0 = arith.constant 0 : i32
    return %arg0, %c0_i32 : i32, i32
  }
}

</mosaic_0001>

<bundles_post_ra>
// kernel: _lambda_.1
= control target key start
LH: loop header
LB: loop body
LE: loop exit
PB: predicated region body
PF: predicated region fallthrough
CT: control target
= control target key end

     0   :  { %9 = vsyncpa [#allocation3], 0  ;;  %s13597_s0 = inlined_call_operand.vmem [shape: bf16[32,4096], index: 0, kind: input, shape index: {}]   ;;  %s13598_s1 = inlined_call_operand.hbm [shape: bf16[4096,512], index: 1, kind: input, shape index: {}]   ;;  %s13599_s2 = inlined_call_operand.hbm [shape: bf16[512,512], index: 2, kind: input, shape index: {}]   ;;  %s13600_s3 = inlined_call_operand.hbm [shape: bf16[512,128], index: 3, kind: input, shape index: {}]   ;;  %s13601_s4 = inlined_call_operand.vmem [shape: f32[32,128], index: 4, kind: output, shape index: {}]  }
   0x1   :  { %10 = vsyncpa [#allocation5], 0  ;;  %s13176_s15 = smov [#allocation4]   ;;  %s13177_s17 = smov [#allocation2]  }
   0x2   :  { %s30_s16 = sshll.u32 %s13176_s15, 4  ;;  %s18_s18 = sshll.u32 %s13177_s17, 4  ;;  %s31_s16 = int_to_ptr.vmem [resolvable:$true] %s30_s16  ;;  %s13208_s18 = int_to_ptr.vmem [resolvable:$true] %s18_s18 }
   0x3   :  { %s13106_s21 = scalar_lea.hbm %s13599_s2, 16384 }
   0x4   :  { %p13107_p0 = scmp.ne.s32.totalorder %s13599_s2, %s13106_s21  ;;  %p13110_p1 = scmp.lt.u32.totalorder %s13106_s21, %s13599_s2 }
   0x6   :  { %p13112_p2 = pnand %p13110_p1, %p13107_p0 }
   0x8   :  { %13115 = shalt.err (!%p13112_p2)
}
   0x9   :  { %s13116_s26 = scalar_lea.vmem %s31_s16, 16384  ;;  %p13121_p4 = scmp.lt.s32.totalorder %s31_s16, %s31_s16 }
   0xa   :  { %p13117_p3 = scmp.ne.s32.totalorder %s31_s16, %s13116_s26  ;;  %p13122_p5 = scmp.lt.s32.totalorder %s13116_s26, %s13116_s26 }
   0xc   :  { %p13123_p6 = por %p13122_p5, %p13121_p4 }
   0xe   :  { %p13124_p7 = pnand %p13123_p6, %p13117_p3 }
  0x10   :  { %13127 = shalt.err (!%p13124_p7)
}
  0x11   :  { %s13178_s27 = smov 256   ;;  %s13179_s28 = smov 16  }
  0x12   :  { %36 = dma.hbm_to_vmem [thread:$0]  %s13599_s2, 16384, %s31_s16, [#allocation5], %s13178_s27, %s13178_s27, %s13179_s28  }
  0x13   :  { %s13128_s7 = scalar_lea.hbm %s13598_s1, 131072 }
  0x14   :  { %p13129_p8 = scmp.ne.s32.totalorder %s13598_s1, %s13128_s7  ;;  %p13132_p9 = scmp.lt.u32.totalorder %s13128_s7, %s13598_s1 }
  0x16   :  { %p13134_p10 = pnand %p13132_p9, %p13129_p8 }
  0x18   :  { %13137 = shalt.err (!%p13134_p10)
}
  0x19   :  { %s13138_s12 = scalar_lea.vmem %s13208_s18, 131072  ;;  %p13143_p12 = scmp.lt.s32.totalorder %s13208_s18, %s13208_s18 }
  0x1a   :  { %p13139_p11 = scmp.ne.s32.totalorder %s13208_s18, %s13138_s12  ;;  %p13144_p13 = scmp.lt.s32.totalorder %s13138_s12, %s13138_s12 }
  0x1c   :  { %p13145_p0 = por %p13144_p13, %p13143_p12 }
  0x1e   :  { %p13146_p1 = pnand %p13145_p0, %p13139_p11 }
  0x20   :  { %13149 = shalt.err (!%p13146_p1)
}
  0x21   :  { %24 = dma.hbm_to_vmem [thread:$0]  %s13598_s1, 131072, %s13208_s18, [#allocation3], %s13178_s27, %s13178_s27, %s13179_s28  }
  0x22   :  { %s13180_s14 = smov [#allocation6]   ;;  %s13150_s19 = scalar_lea.hbm %s13600_s3, 4096 }
  0x23   :  { %s42_s15 = sshll.u32 %s13180_s14, 4  ;;  %p13151_p2 = scmp.ne.s32.totalorder %s13600_s3, %s13150_s19  ;;  %s43_s15 = int_to_ptr.vmem [resolvable:$true] %s42_s15 }
  0x24   :  { %p13154_p3 = scmp.lt.u32.totalorder %s13150_s19, %s13600_s3 }
  0x26   :  { %p13156_p4 = pnand %p13154_p3, %p13151_p2 }
  0x28   :  { %13159 = shalt.err (!%p13156_p4)
}
  0x29   :  { %s13160_s24 = scalar_lea.vmem %s43_s15, 4096  ;;  %p13165_p6 = scmp.lt.s32.totalorder %s43_s15, %s43_s15 }
  0x2a   :  { %p13161_p5 = scmp.ne.s32.totalorder %s43_s15, %s13160_s24  ;;  %p13166_p7 = scmp.lt.s32.totalorder %s13160_s24, %s13160_s24 }
  0x2c   :  { %p13167_p8 = por %p13166_p7, %p13165_p6 }
  0x2e   :  { %p13168_p9 = pnand %p13167_p8, %p13161_p5 }
  0x30   :  { %13171 = shalt.err (!%p13168_p9)
}
  0x31   :  { %s13181_s1 = smov 64   ;;  %s13182_s18 = smov 4  }
  0x32   :  { %48 = dma.hbm_to_vmem [thread:$0]  %s13600_s3, 4096, %s43_s15, [#allocation5], %s13181_s1, %s13181_s1, %s13182_s18  }
  0x33   :  { %13172 = dma.done.wait [#allocation3], 131072  }
  0x34   :  { %13173 = vsyncadd [#allocation3], 4294836224 }
  0x35   :  { %13174 = dma.done.wait [#allocation5], 20480  }
  0x36   :  { %13175 = vsyncadd [#allocation5], 4294946816  ;;  %v11330_v0 = vld [vmem:[#allocation2 + $0x4] ss:$16 sps:$4 sm:$0xff]   ;;  %v11332_v1 = vld [vmem:[#allocation2 + $0xc] ss:$16 sps:$4 sm:$0xff]  }
  0x37   :  { %6587 = vmatprep.subr.bf16.mxu0 %v11330_v0  ;;  %v11334_v2 = vld [vmem:[#allocation2] ss:$16 sps:$4 sm:$0xff]   ;;  %v11335_v3 = vld [vmem:[#allocation2 + $0x8] ss:$16 sps:$4 sm:$0xff]   ;;  %7435 = vmatprep.subr.bf16.mxu1 %v11332_v1  ;;  %v11336_v4 = vld [vmem:[#allocation2 + $0x24] ss:$16 sps:$4 sm:$0xff]  }
  0x38   :  { %6588 = vmatpush1.bf16.msra.mxu0 %v11334_v2  ;;  %7436 = vmatpush1.bf16.msra.mxu1 %v11335_v3  ;;  %v11338_v5 = vld [vmem:[#allocation2 + $0x2c] ss:$16 sps:$4 sm:$0xff]   ;;  %v11340_v6 = vld [vmem:[#allocation2 + $0x20] ss:$16 sps:$4 sm:$0xff]   ;;  %v11341_v7 = vld [vmem:[#allocation2 + $0x28] ss:$16 sps:$4 sm:$0xff]  }
  0x39   :  { %6589 = vmatprep.subr.bf16.mxu0 %v11336_v4  ;;  %7437 = vmatprep.subr.bf16.mxu1 %v11338_v5  ;;  %v11342_v8 = vld [vmem:[#allocation2 + $0x44] ss:$16 sps:$4 sm:$0xff]   ;;  %v11344_v9 = vld [vmem:[#allocation2 + $0x4c] ss:$16 sps:$4 sm:$0xff]   ;;  %v11346_v10 = vld [vmem:[#allocation2 + $0x40] ss:$16 sps:$4 sm:$0xff]  }
  0x3a   :  { %v11347_v11 = vld [vmem:[#allocation2 + $0x48] ss:$16 sps:$4 sm:$0xff]   ;;  %v11348_v12 = vld [vmem:[#allocation2 + $0x64] ss:$16 sps:$4 sm:$0xff]   ;;  %v11350_v13 = vld [vmem:[#allocation2 + $0x6c] ss:$16 sps:$4 sm:$0xff]  }
  0x3b   :  { %v11352_v14 = vld [vmem:[#allocation2 + $0x60] ss:$16 sps:$4 sm:$0xff]   ;;  %v11353_v15 = vld [vmem:[#allocation2 + $0x68] ss:$16 sps:$4 sm:$0xff]   ;;  %v11354_v16 = vld [vmem:[#allocation2 + $0x84] ss:$16 sps:$4 sm:$0xff]  }
  0x3c   :  { %6590 = vmatpush1.bf16.msra.mxu0 %v11340_v6  ;;  %7438 = vmatpush1.bf16.msra.mxu1 %v11341_v7  ;;  %v11356_v17 = vld [vmem:[#allocation2 + $0x8c] ss:$16 sps:$4 sm:$0xff]   ;;  %v11358_v18 = vld [vmem:[#allocation2 + $0x80] ss:$16 sps:$4 sm:$0xff]   ;;  %v11359_v19 = vld [vmem:[#allocation2 + $0x88] ss:$16 sps:$4 sm:$0xff]  }
  0x3d   :  { %6591 = vmatprep.subr.bf16.mxu0 %v11342_v8  ;;  %7439 = vmatprep.subr.bf16.mxu1 %v11344_v9  ;;  %v11360_v20 = vld [vmem:[#allocation2 + $0xa4] ss:$16 sps:$4 sm:$0xff]   ;;  %v11362_v21 = vld [vmem:[#allocation2 + $0xac] ss:$16 sps:$4 sm:$0xff]   ;;  %v11364_v22 = vld [vmem:[#allocation2 + $0xa0] ss:$16 sps:$4 sm:$0xff]  }
  0x3e   :  { %v11365_v23 = vld [vmem:[#allocation2 + $0xa8] ss:$16 sps:$4 sm:$0xff]   ;;  %v11366_v24 = vld [vmem:[#allocation2 + $0xc4] ss:$16 sps:$4 sm:$0xff]   ;;  %v11368_v25 = vld [vmem:[#allocation2 + $0xcc] ss:$16 sps:$4 sm:$0xff]  }
  0x3f   :  { %v11370_v26 = vld [vmem:[#allocation2 + $0xc0] ss:$16 sps:$4 sm:$0xff]   ;;  %v11371_v27 = vld [vmem:[#allocation2 + $0xc8] ss:$16 sps:$4 sm:$0xff]   ;;  %v11372_v28 = vld [vmem:[#allocation2 + $0xe4] ss:$16 sps:$4 sm:$0xff]  }
  0x40   :  { %6592 = vmatpush1.bf16.msra.mxu0 %v11346_v10  ;;  %7440 = vmatpush1.bf16.msra.mxu1 %v11347_v11  ;;  %v11374_v29 = vld [vmem:[#allocation2 + $0xec] ss:$16 sps:$4 sm:$0xff]   ;;  %v11376_v30 = vld [vmem:[#allocation2 + $0xe0] ss:$16 sps:$4 sm:$0xff]   ;;  %v11377_v31 = vld [vmem:[#allocation2 + $0xe8] ss:$16 sps:$4 sm:$0xff]  }
  0x41   :  { %6593 = vmatprep.subr.bf16.mxu0 %v11348_v12  ;;  %7441 = vmatprep.subr.bf16.mxu1 %v11350_v13  ;;  %v11378_v32 = vld [vmem:[#allocation2 + $0x104] ss:$16 sps:$4 sm:$0xff]   ;;  %v11380_v33 = vld [vmem:[#allocation2 + $0x10c] ss:$16 sps:$4 sm:$0xff]   ;;  %v11382_v34 = vld [vmem:[#allocation2 + $0x100] ss:$16 sps:$4 sm:$0xff]  }
  0x42   :  { %v11383_v35 = vld [vmem:[#allocation2 + $0x108] ss:$16 sps:$4 sm:$0xff]   ;;  %v11384_v36 = vld [vmem:[#allocation2 + $0x124] ss:$16 sps:$4 sm:$0xff]   ;;  %v11386_v37 = vld [vmem:[#allocation2 + $0x12c] ss:$16 sps:$4 sm:$0xff]  }
  0x43   :  { %v11388_v38 = vld [vmem:[#allocation2 + $0x120] ss:$16 sps:$4 sm:$0xff]   ;;  %v11389_v39 = vld [vmem:[#allocation2 + $0x128] ss:$16 sps:$4 sm:$0xff]   ;;  %v11390_v40 = vld [vmem:[#allocation2 + $0x144] ss:$16 sps:$4 sm:$0xff]  }
  0x44   :  { %6594 = vmatpush1.bf16.msra.mxu0 %v11352_v14  ;;  %7442 = vmatpush1.bf16.msra.mxu1 %v11353_v15  ;;  %v11392_v41 = vld [vmem:[#allocation2 + $0x14c] ss:$16 sps:$4 sm:$0xff]   ;;  %v11394_v42 = vld [vmem:[#allocation2 + $0x140] ss:$16 sps:$4 sm:$0xff]   ;;  %v11395_v43 = vld [vmem:[#allocation2 + $0x148] ss:$16 sps:$4 sm:$0xff]  }
  0x45   :  { %6595 = vmatprep.subr.bf16.mxu0 %v11354_v16  ;;  %7443 = vmatprep.subr.bf16.mxu1 %v11356_v17  ;;  %v11396_v44 = vld [vmem:[#allocation2 + $0x164] ss:$16 sps:$4 sm:$0xff]   ;;  %v11398_v45 = vld [vmem:[#allocation2 + $0x16c] ss:$16 sps:$4 sm:$0xff]   ;;  %v11400_v48 = vld [vmem:[#allocation2 + $0x160] ss:$16 sps:$4 sm:$0xff]  }
  0x46   :  { %v59_v46 = vld [vmem:[%s13597_s0] sm:$0xff]  ;;  %v11401_v49 = vld [vmem:[#allocation2 + $0x168] ss:$16 sps:$4 sm:$0xff]   ;;  %v11404_v52 = vld [vmem:[#allocation2 + $0x18c] ss:$16 sps:$4 sm:$0xff]  }
  0x47   :  { %v75_v47 = vld [vmem:[%s13597_s0 + $0x80] sm:$0xff]  ;;  %v11407_v54 = vld [vmem:[#allocation2 + $0x188] ss:$16 sps:$4 sm:$0xff]   ;;  %v11410_v56 = vld [vmem:[#allocation2 + $0x1ac] ss:$16 sps:$4 sm:$0xff]  }
  0x48   :  { %6596 = vmatpush1.bf16.msra.mxu0 %v11358_v18  ;;  %7444 = vmatpush1.bf16.msra.mxu1 %v11359_v19  ;;  %v9764_v50 = vcombine.high %v59_v46, %v75_v47  ;;  %v11402_v51 = vld [vmem:[#allocation2 + $0x184] ss:$16 sps:$4 sm:$0xff]   ;;  %v11406_v53 = vld [vmem:[#allocation2 + $0x180] ss:$16 sps:$4 sm:$0xff]   ;;  %v11413_v58 = vld [vmem:[#allocation2 + $0x1a8] ss:$16 sps:$4 sm:$0xff]   ;;  %v9763_v5 = vcombine.low %v59_v46, %v75_v47 }
  0x49   :  { %6597 = vmatprep.subr.bf16.mxu0 %v11360_v20  ;;  %7445 = vmatprep.subr.bf16.mxu1 %v11362_v21  ;;  %v11408_v55 = vld [vmem:[#allocation2 + $0x1a4] ss:$16 sps:$4 sm:$0xff]   ;;  %v11412_v57 = vld [vmem:[#allocation2 + $0x1a0] ss:$16 sps:$4 sm:$0xff]   ;;  %v11416_v60 = vld [vmem:[#allocation2 + $0x1cc] ss:$16 sps:$4 sm:$0xff]  }
  0x4a   :  { %6619 = vmatprep.mubr.bf16.mxu0 %v9764_v50  ;;  %7467 = vmatprep.mubr.bf16.mxu1 %v9764_v50  ;;  %v11414_v59 = vld [vmem:[#allocation2 + $0x1c4] ss:$16 sps:$4 sm:$0xff]   ;;  %v11418_v61 = vld [vmem:[#allocation2 + $0x1c0] ss:$16 sps:$4 sm:$0xff]   ;;  %v11419_v62 = vld [vmem:[#allocation2 + $0x1c8] ss:$16 sps:$4 sm:$0xff]  }
  0x4b   :  { %v11420_v63 = vld [vmem:[#allocation2 + $0x1e4] ss:$16 sps:$4 sm:$0xff]   ;;  %v11422_v0 = vld [vmem:[#allocation2 + $0x1ec] ss:$16 sps:$4 sm:$0xff]   ;;  %v11424_v1 = vld [vmem:[#allocation2 + $0x1e0] ss:$16 sps:$4 sm:$0xff]  }
  0x4c   :  { %6598 = vmatpush1.bf16.msra.mxu0 %v11364_v22  ;;  %7446 = vmatpush1.bf16.msra.mxu1 %v11365_v23  ;;  %v11425_v2 = vld [vmem:[#allocation2 + $0x1e8] ss:$16 sps:$4 sm:$0xff]   ;;  %v11428_v3 = vld [vmem:[#allocation2 + $0x204] ss:$16 sps:$4 sm:$0xff]   ;;  %v11431_v4 = vld [vmem:[#allocation2 + $0x20c] ss:$16 sps:$4 sm:$0xff]  }
  0x4d   :  { %6599 = vmatprep.subr.bf16.mxu0 %v11366_v24  ;;  %7447 = vmatprep.subr.bf16.mxu1 %v11368_v25  ;;  %v11426_v6 = vld [vmem:[#allocation2 + $0x200] ss:$16 sps:$4 sm:$0xff]   ;;  %v11429_v7 = vld [vmem:[#allocation2 + $0x208] ss:$16 sps:$4 sm:$0xff]   ;;  %v11434_v8 = vld [vmem:[#allocation2 + $0x224] ss:$16 sps:$4 sm:$0xff]  }
  0x4e   :  { %v11437_v9 = vld [vmem:[#allocation2 + $0x22c] ss:$16 sps:$4 sm:$0xff]   ;;  %v11432_v10 = vld [vmem:[#allocation2 + $0x220] ss:$16 sps:$4 sm:$0xff]   ;;  %v11435_v11 = vld [vmem:[#allocation2 + $0x228] ss:$16 sps:$4 sm:$0xff]  }
  0x4f   :  { %v11440_v12 = vld [vmem:[#allocation2 + $0x244] ss:$16 sps:$4 sm:$0xff]   ;;  %v11443_v13 = vld [vmem:[#allocation2 + $0x24c] ss:$16 sps:$4 sm:$0xff]   ;;  %v11438_v14 = vld [vmem:[#allocation2 + $0x240] ss:$16 sps:$4 sm:$0xff]  }
  0x50   :  { %6600 = vmatpush1.bf16.msra.mxu0 %v11370_v26  ;;  %7448 = vmatpush1.bf16.msra.mxu1 %v11371_v27  ;;  %v11441_v15 = vld [vmem:[#allocation2 + $0x248] ss:$16 sps:$4 sm:$0xff]   ;;  %v11446_v16 = vld [vmem:[#allocation2 + $0x264] ss:$16 sps:$4 sm:$0xff]   ;;  %v11449_v17 = vld [vmem:[#allocation2 + $0x26c] ss:$16 sps:$4 sm:$0xff]  }
  0x51   :  { %6601 = vmatprep.subr.bf16.mxu0 %v11372_v28  ;;  %7449 = vmatprep.subr.bf16.mxu1 %v11374_v29  ;;  %v11444_v18 = vld [vmem:[#allocation2 + $0x260] ss:$16 sps:$4 sm:$0xff]   ;;  %v11447_v19 = vld [vmem:[#allocation2 + $0x268] ss:$16 sps:$4 sm:$0xff]   ;;  %v11452_v20 = vld [vmem:[#allocation2 + $0x284] ss:$16 sps:$4 sm:$0xff]  }
  0x52   :  { %v11455_v21 = vld [vmem:[#allocation2 + $0x28c] ss:$16 sps:$4 sm:$0xff]   ;;  %v11450_v22 = vld [vmem:[#allocation2 + $0x280] ss:$16 sps:$4 sm:$0xff]   ;;  %v11453_v23 = vld [vmem:[#allocation2 + $0x288] ss:$16 sps:$4 sm:$0xff]  }
  0x53   :  { %v11458_v24 = vld [vmem:[#allocation2 + $0x2a4] ss:$16 sps:$4 sm:$0xff]   ;;  %v11461_v25 = vld [vmem:[#allocation2 + $0x2ac] ss:$16 sps:$4 sm:$0xff]   ;;  %v11456_v29 = vld [vmem:[#allocation2 + $0x2a0] ss:$16 sps:$4 sm:$0xff]  }
  0x54   :  { %6602 = vmatpush1.bf16.msra.mxu0 %v11376_v30  ;;  %7450 = vmatpush1.bf16.msra.mxu1 %v11377_v31  ;;  %v91_v26 = vld [vmem:[%s13597_s0 + $0x100] sm:$0xff]  ;;  %v11459_v30 = vld [vmem:[#allocation2 + $0x2a8] ss:$16 sps:$4 sm:$0xff]  }
  0x55   :  { %6603 = vmatprep.subr.bf16.mxu0 %v11378_v32  ;;  %7451 = vmatprep.subr.bf16.mxu1 %v11380_v33  ;;  %v107_v27 = vld [vmem:[%s13597_s0 + $0x180] sm:$0xff]  ;;  %v11467_v33 = vld [vmem:[#allocation2 + $0x2cc] ss:$16 sps:$4 sm:$0xff]   ;;  %v11477_v46 = vld [vmem:[#allocation2 + $0x308] ss:$16 sps:$4 sm:$0xff]  }
  0x56   :  { %v9796_v28 = vcombine.high %v91_v26, %v107_v27  ;;  %v9795_v31 = vcombine.low %v91_v26, %v107_v27  ;;  %v11464_v32 = vld [vmem:[#allocation2 + $0x2c4] ss:$16 sps:$4 sm:$0xff]   ;;  %v11483_v50 = vld [vmem:[#allocation2 + $0x328] ss:$16 sps:$4 sm:$0xff]  }
  0x57   :  { %v11482_v47 = vld [vmem:[#allocation2 + $0x324] ss:$16 sps:$4 sm:$0xff]  }
  0x58   :  { %6604 = vmatpush1.bf16.msra.mxu0 %v11382_v34  ;;  %7452 = vmatpush1.bf16.msra.mxu1 %v11383_v35  ;;  %v13266_v34 = vld [vmem:[%s13597_s0 + $0x8] sm:$0xff]  ;;  %v13291_v27 = vld [vmem:[%s13597_s0 + $0x90] sm:$0xff] }
  0x59   :  { %6605 = vmatprep.subr.bf16.mxu0 %v11384_v36  ;;  %7453 = vmatprep.subr.bf16.mxu1 %v11386_v37  ;;  %v13271_v35 = vld [vmem:[%s13597_s0 + $0x88] sm:$0xff]  ;;  %v11462_v36 = vld [vmem:[#allocation2 + $0x2c0] ss:$16 sps:$4 sm:$0xff]  }
  0x5a   :  { %v11465_v37 = vld [vmem:[#allocation2 + $0x2c8] ss:$16 sps:$4 sm:$0xff]  }
  0x5c   :  { %6606 = vmatpush1.bf16.msra.mxu0 %v11388_v38  ;;  %7454 = vmatpush1.bf16.msra.mxu1 %v11389_v39  ;;  %v9766_v38 = vcombine.high %v13266_v34, %v13271_v35  ;;  %v11470_v39 = vld [vmem:[#allocation2 + $0x2e4] ss:$16 sps:$4 sm:$0xff]  }
  0x5d   :  { %6607 = vmatprep.subr.bf16.mxu0 %v11390_v40  ;;  %7455 = vmatprep.subr.bf16.mxu1 %v11392_v41  ;;  %v11473_v40 = vld [vmem:[#allocation2 + $0x2ec] ss:$16 sps:$4 sm:$0xff]   ;;  %v11468_v41 = vld [vmem:[#allocation2 + $0x2e0] ss:$16 sps:$4 sm:$0xff]  }
  0x60   :  { %6608 = vmatpush1.bf16.msra.mxu0 %v11394_v42  ;;  %7456 = vmatpush1.bf16.msra.mxu1 %v11395_v43  ;;  %v11471_v42 = vld [vmem:[#allocation2 + $0x2e8] ss:$16 sps:$4 sm:$0xff]   ;;  %v11476_v43 = vld [vmem:[#allocation2 + $0x304] ss:$16 sps:$4 sm:$0xff]  }
  0x61   :  { %6609 = vmatprep.subr.bf16.mxu0 %v11396_v44  ;;  %7457 = vmatprep.subr.bf16.mxu1 %v11398_v45  ;;  %v11479_v44 = vld [vmem:[#allocation2 + $0x30c] ss:$16 sps:$4 sm:$0xff]   ;;  %v11474_v45 = vld [vmem:[#allocation2 + $0x300] ss:$16 sps:$4 sm:$0xff]  }
  0x64   :  { %6610 = vmatpush1.bf16.msra.mxu0 %v11400_v48  ;;  %7458 = vmatpush1.bf16.msra.mxu1 %v11401_v49  ;;  %v11485_v48 = vld [vmem:[#allocation2 + $0x32c] ss:$16 sps:$4 sm:$0xff]   ;;  %v11480_v49 = vld [vmem:[#allocation2 + $0x320] ss:$16 sps:$4 sm:$0xff]  }
  0x65   :  { %6611 = vmatprep.subr.bf16.mxu0 %v11402_v51  ;;  %7459 = vmatprep.subr.bf16.mxu1 %v11404_v52  ;;  %v11488_v51 = vld [vmem:[#allocation2 + $0x344] ss:$16 sps:$4 sm:$0xff]   ;;  %v11491_v52 = vld [vmem:[#allocation2 + $0x34c] ss:$16 sps:$4 sm:$0xff]  }
  0x68   :  { %6612 = vmatpush1.bf16.msra.mxu0 %v11406_v53  ;;  %7460 = vmatpush1.bf16.msra.mxu1 %v11407_v54  ;;  %v11486_v53 = vld [vmem:[#allocation2 + $0x340] ss:$16 sps:$4 sm:$0xff]   ;;  %v11489_v54 = vld [vmem:[#allocation2 + $0x348] ss:$16 sps:$4 sm:$0xff]  }
  0x69   :  { %6613 = vmatprep.subr.bf16.mxu0 %v11408_v55  ;;  %7461 = vmatprep.subr.bf16.mxu1 %v11410_v56  ;;  %v11494_v55 = vld [vmem:[#allocation2 + $0x364] ss:$16 sps:$4 sm:$0xff]   ;;  %v11497_v56 = vld [vmem:[#allocation2 + $0x36c] ss:$16 sps:$4 sm:$0xff]  }
  0x6c   :  { %6614 = vmatpush1.bf16.msra.mxu0 %v11412_v57  ;;  %7462 = vmatpush1.bf16.msra.mxu1 %v11413_v58  ;;  %v11492_v57 = vld [vmem:[#allocation2 + $0x360] ss:$16 sps:$4 sm:$0xff]   ;;  %v11495_v58 = vld [vmem:[#allocation2 + $0x368] ss:$16 sps:$4 sm:$0xff]  }
  0x6d   :  { %6615 = vmatprep.subr.bf16.mxu0 %v11414_v59  ;;  %7463 = vmatprep.subr.bf16.mxu1 %v11416_v60  ;;  %v11500_v59 = vld [vmem:[#allocation2 + $0x384] ss:$16 sps:$4 sm:$0xff]   ;;  %v11503_v60 = vld [vmem:[#allocation2 + $0x38c] ss:$16 sps:$4 sm:$0xff]  }
  0x70   :  { %6616 = vmatpush1.bf16.msra.mxu0 %v11418_v61  ;;  %7464 = vmatpush1.bf16.msra.mxu1 %v11419_v62  ;;  %v11498_v61 = vld [vmem:[#allocation2 + $0x380] ss:$16 sps:$4 sm:$0xff]   ;;  %v11501_v62 = vld [vmem:[#allocation2 + $0x388] ss:$16 sps:$4 sm:$0xff]  }
  0x71   :  { %6617 = vmatprep.subr.bf16.mxu0 %v11420_v63  ;;  %7465 = vmatprep.subr.bf16.mxu1 %v11422_v0  ;;  %v11506_v63 = vld [vmem:[#allocation2 + $0x3a4] ss:$16 sps:$4 sm:$0xff]   ;;  %v11509_v0 = vld [vmem:[#allocation2 + $0x3ac] ss:$16 sps:$4 sm:$0xff]  }
  0x74   :  { %6618 = vmatpush1.bf16.msra.mxu0 %v11424_v1  ;;  %7466 = vmatpush1.bf16.msra.mxu1 %v11425_v2  ;;  %v11504_v1 = vld [vmem:[#allocation2 + $0x3a0] ss:$16 sps:$4 sm:$0xff]   ;;  %v11507_v2 = vld [vmem:[#allocation2 + $0x3a8] ss:$16 sps:$4 sm:$0xff]  }
  0x75   :  { %6640 = vmatprep.subr.bf16.mxu0 %v11428_v3  ;;  %7488 = vmatprep.subr.bf16.mxu1 %v11431_v4  ;;  %v11512_v3 = vld [vmem:[#allocation2 + $0x3c4] ss:$16 sps:$4 sm:$0xff]   ;;  %v11515_v4 = vld [vmem:[#allocation2 + $0x3cc] ss:$16 sps:$4 sm:$0xff]  }
  0x77   :  { %6620 = vmatmul.mubr.bf16.vlgmr.msra.gmra.mrb[0].mxu0 %v9763_v5  ;;  %7468 = vmatmul.mubr.bf16.vlgmr.msra.gmra.mrb[0].mxu1 %v9763_v5  ;;  %v11510_v5 = vld [vmem:[#allocation2 + $0x3c0] ss:$16 sps:$4 sm:$0xff]  }
  0x78   :  { %6641 = vmatpush1.bf16.msra.mxu0 %v11426_v6  ;;  %7489 = vmatpush1.bf16.msra.mxu1 %v11429_v7  ;;  %v11513_v6 = vld [vmem:[#allocation2 + $0x3c8] ss:$16 sps:$4 sm:$0xff]   ;;  %v11518_v7 = vld [vmem:[#allocation2 + $0x3e4] ss:$16 sps:$4 sm:$0xff]  }
  0x79   :  { %6642 = vmatprep.subr.bf16.mxu0 %v11434_v8  ;;  %7490 = vmatprep.subr.bf16.mxu1 %v11437_v9  ;;  %v11521_v8 = vld [vmem:[#allocation2 + $0x3ec] ss:$16 sps:$4 sm:$0xff]   ;;  %v11516_v9 = vld [vmem:[#allocation2 + $0x3e0] ss:$16 sps:$4 sm:$0xff]  }
  0x7a   :  { %6629 = vmatprep.mubr.bf16.mxu0 %v9796_v28  ;;  %7477 = vmatprep.mubr.bf16.mxu1 %v9796_v28  ;;  %v11534_v28 = vld [vmem:[#allocation2 + $0x440] ss:$16 sps:$4 sm:$0xff]  }
  0x7c   :  { %6643 = vmatpush1.bf16.msra.mxu0 %v11432_v10  ;;  %7491 = vmatpush1.bf16.msra.mxu1 %v11435_v11  ;;  %v11519_v10 = vld [vmem:[#allocation2 + $0x3e8] ss:$16 sps:$4 sm:$0xff]   ;;  %v11524_v11 = vld [vmem:[#allocation2 + $0x404] ss:$16 sps:$4 sm:$0xff]  }
  0x7d   :  { %6644 = vmatprep.subr.bf16.mxu0 %v11440_v12  ;;  %7492 = vmatprep.subr.bf16.mxu1 %v11443_v13  ;;  %v11527_v12 = vld [vmem:[#allocation2 + $0x40c] ss:$16 sps:$4 sm:$0xff]   ;;  %v11522_v13 = vld [vmem:[#allocation2 + $0x400] ss:$16 sps:$4 sm:$0xff]  }
  0x7f   :  { %6630 = vmatmul.mubr.bf16.gmra.mrb[4].mxu0 %v9795_v31  ;;  %7478 = vmatmul.mubr.bf16.gmra.mrb[4].mxu1 %v9795_v31  ;;  %v11545_v31 = vld [vmem:[#allocation2 + $0x46c] ss:$16 sps:$4 sm:$0xff]  }
  0x80   :  { %6645 = vmatpush1.bf16.msra.mxu0 %v11438_v14  ;;  %7493 = vmatpush1.bf16.msra.mxu1 %v11441_v15  ;;  %v11525_v14 = vld [vmem:[#allocation2 + $0x408] ss:$16 sps:$4 sm:$0xff]   ;;  %v9765_v15 = vcombine.low %v13266_v34, %v13271_v35  ;;  %v11548_v35 = vld [vmem:[#allocation2 + $0x484] ss:$16 sps:$4 sm:$0xff]  }
  0x81   :  { %6646 = vmatprep.subr.bf16.mxu0 %v11446_v16  ;;  %7494 = vmatprep.subr.bf16.mxu1 %v11449_v17  ;;  %v92_v16 = vld [vmem:[%s13597_s0 + $0x108] sm:$0xff] }
  0x82   :  { %6672 = vmatprep.mubr.bf16.mxu0 %v9766_v38  ;;  %7520 = vmatprep.mubr.bf16.mxu1 %v9766_v38  ;;  %v108_v17 = vld [vmem:[%s13597_s0 + $0x188] sm:$0xff] }
  0x83   :  { %v9797_v26 = vcombine.low %v92_v16, %v108_v17  ;;  %v11543_v34 = vld [vmem:[#allocation2 + $0x468] ss:$16 sps:$4 sm:$0xff]  }
  0x84   :  { %6647 = vmatpush1.bf16.msra.mxu0 %v11444_v18  ;;  %7495 = vmatpush1.bf16.msra.mxu1 %v11447_v19  ;;  %v11530_v18 = vld [vmem:[#allocation2 + $0x424] ss:$16 sps:$4 sm:$0xff]   ;;  %v11533_v19 = vld [vmem:[#allocation2 + $0x42c] ss:$16 sps:$4 sm:$0xff]   ;;  %v11549_v38 = vld [vmem:[#allocation2 + $0x488] ss:$16 sps:$4 sm:$0xff]  }
  0x85   :  { %6648 = vmatprep.subr.bf16.mxu0 %v11452_v20  ;;  %7496 = vmatprep.subr.bf16.mxu1 %v11455_v21  ;;  %v9798_v20 = vcombine.high %v92_v16, %v108_v17  ;;  %v11528_v21 = vld [vmem:[#allocation2 + $0x420] ss:$16 sps:$4 sm:$0xff]   ;;  %v11617_v16 = vld [vmem:[#allocation2 + $0x5ec] ss:$16 sps:$4 sm:$0xff]  }
  0x86   :  { %v11612_v17 = vld [vmem:[#allocation2 + $0x5e0] ss:$16 sps:$4 sm:$0xff]  }
  0x88   :  { %6649 = vmatpush1.bf16.msra.mxu0 %v11450_v22  ;;  %7497 = vmatpush1.bf16.msra.mxu1 %v11453_v23  ;;  %v11531_v22 = vld [vmem:[#allocation2 + $0x428] ss:$16 sps:$4 sm:$0xff]   ;;  %v11536_v23 = vld [vmem:[#allocation2 + $0x444] ss:$16 sps:$4 sm:$0xff]  }
  0x89   :  { %6650 = vmatprep.subr.bf16.mxu0 %v11458_v24  ;;  %7498 = vmatprep.subr.bf16.mxu1 %v11461_v25  ;;  %v11539_v24 = vld [vmem:[#allocation2 + $0x44c] ss:$16 sps:$4 sm:$0xff]   ;;  %v13286_v25 = vld [vmem:[%s13597_s0 + $0x10] sm:$0xff] }
  0x8c   :  { %6651 = vmatpush1.bf16.msra.mxu0 %v11456_v29  ;;  %7499 = vmatpush1.bf16.msra.mxu1 %v11459_v30  ;;  %v11537_v29 = vld [vmem:[#allocation2 + $0x448] ss:$16 sps:$4 sm:$0xff]   ;;  %v11542_v30 = vld [vmem:[#allocation2 + $0x464] ss:$16 sps:$4 sm:$0xff]  }
  0x8d   :  { %6652 = vmatprep.subr.bf16.mxu0 %v11464_v32  ;;  %7500 = vmatprep.subr.bf16.mxu1 %v11467_v33  ;;  %v9768_v32 = vcombine.high %v13286_v25, %v13291_v27  ;;  %v11540_v33 = vld [vmem:[#allocation2 + $0x460] ss:$16 sps:$4 sm:$0xff]  }
  0x90   :  { %6653 = vmatpush1.bf16.msra.mxu0 %v11462_v36  ;;  %7501 = vmatpush1.bf16.msra.mxu1 %v11465_v37  ;;  %v11551_v36 = vld [vmem:[#allocation2 + $0x48c] ss:$16 sps:$4 sm:$0xff]   ;;  %v11546_v37 = vld [vmem:[#allocation2 + $0x480] ss:$16 sps:$4 sm:$0xff]  }
  0x91   :  { %6654 = vmatprep.subr.bf16.mxu0 %v11470_v39  ;;  %7502 = vmatprep.subr.bf16.mxu1 %v11473_v40  ;;  %v11554_v39 = vld [vmem:[#allocation2 + $0x4a4] ss:$16 sps:$4 sm:$0xff]   ;;  %v11557_v40 = vld [vmem:[#allocation2 + $0x4ac] ss:$16 sps:$4 sm:$0xff]  }
  0x94   :  { %6655 = vmatpush1.bf16.msra.mxu0 %v11468_v41  ;;  %7503 = vmatpush1.bf16.msra.mxu1 %v11471_v42  ;;  %v11552_v41 = vld [vmem:[#allocation2 + $0x4a0] ss:$16 sps:$4 sm:$0xff]   ;;  %v11555_v42 = vld [vmem:[#allocation2 + $0x4a8] ss:$16 sps:$4 sm:$0xff]  }
  0x95   :  { %6656 = vmatprep.subr.bf16.mxu0 %v11476_v43  ;;  %7504 = vmatprep.subr.bf16.mxu1 %v11479_v44  ;;  %v11560_v43 = vld [vmem:[#allocation2 + $0x4c4] ss:$16 sps:$4 sm:$0xff]   ;;  %v11563_v44 = vld [vmem:[#allocation2 + $0x4cc] ss:$16 sps:$4 sm:$0xff]  }
  0x98   :  { %6657 = vmatpush1.bf16.msra.mxu0 %v11474_v45  ;;  %7505 = vmatpush1.bf16.msra.mxu1 %v11477_v46  ;;  %v11558_v45 = vld [vmem:[#allocation2 + $0x4c0] ss:$16 sps:$4 sm:$0xff]   ;;  %v11561_v46 = vld [vmem:[#allocation2 + $0x4c8] ss:$16 sps:$4 sm:$0xff]  }
  0x99   :  { %6658 = vmatprep.subr.bf16.mxu0 %v11482_v47  ;;  %7506 = vmatprep.subr.bf16.mxu1 %v11485_v48  ;;  %v11566_v47 = vld [vmem:[#allocation2 + $0x4e4] ss:$16 sps:$4 sm:$0xff]   ;;  %v11569_v48 = vld [vmem:[#allocation2 + $0x4ec] ss:$16 sps:$4 sm:$0xff]  }
  0x9c   :  { %6659 = vmatpush1.bf16.msra.mxu0 %v11480_v49  ;;  %7507 = vmatpush1.bf16.msra.mxu1 %v11483_v50  ;;  %v11564_v49 = vld [vmem:[#allocation2 + $0x4e0] ss:$16 sps:$4 sm:$0xff]   ;;  %v11567_v50 = vld [vmem:[#allocation2 + $0x4e8] ss:$16 sps:$4 sm:$0xff]  }
  0x9d   :  { %6660 = vmatprep.subr.bf16.mxu0 %v11488_v51  ;;  %7508 = vmatprep.subr.bf16.mxu1 %v11491_v52  ;;  %v11572_v51 = vld [vmem:[#allocation2 + $0x504] ss:$16 sps:$4 sm:$0xff]   ;;  %v11575_v52 = vld [vmem:[#allocation2 + $0x50c] ss:$16 sps:$4 sm:$0xff]  }
  0xa0   :  { %6661 = vmatpush1.bf16.msra.mxu0 %v11486_v53  ;;  %7509 = vmatpush1.bf16.msra.mxu1 %v11489_v54  ;;  %v11570_v53 = vld [vmem:[#allocation2 + $0x500] ss:$16 sps:$4 sm:$0xff]   ;;  %v11573_v54 = vld [vmem:[#allocation2 + $0x508] ss:$16 sps:$4 sm:$0xff]  }
  0xa1   :  { %6662 = vmatprep.subr.bf16.mxu0 %v11494_v55  ;;  %7510 = vmatprep.subr.bf16.mxu1 %v11497_v56  ;;  %v11578_v55 = vld [vmem:[#allocation2 + $0x524] ss:$16 sps:$4 sm:$0xff]   ;;  %v11581_v56 = vld [vmem:[#allocation2 + $0x52c] ss:$16 sps:$4 sm:$0xff]  }
  0xa4   :  { %6663 = vmatpush1.bf16.msra.mxu0 %v11492_v57  ;;  %7511 = vmatpush1.bf16.msra.mxu1 %v11495_v58  ;;  %v11576_v57 = vld [vmem:[#allocation2 + $0x520] ss:$16 sps:$4 sm:$0xff]   ;;  %v11579_v58 = vld [vmem:[#allocation2 + $0x528] ss:$16 sps:$4 sm:$0xff]  }
  0xa5   :  { %6664 = vmatprep.subr.bf16.mxu0 %v11500_v59  ;;  %7512 = vmatprep.subr.bf16.mxu1 %v11503_v60  ;;  %v11584_v59 = vld [vmem:[#allocation2 + $0x544] ss:$16 sps:$4 sm:$0xff]   ;;  %v11587_v60 = vld [vmem:[#allocation2 + $0x54c] ss:$16 sps:$4 sm:$0xff]  }
  0xa8   :  { %6665 = vmatpush1.bf16.msra.mxu0 %v11498_v61  ;;  %7513 = vmatpush1.bf16.msra.mxu1 %v11501_v62  ;;  %v11582_v61 = vld [vmem:[#allocation2 + $0x540] ss:$16 sps:$4 sm:$0xff]   ;;  %v11585_v62 = vld [vmem:[#allocation2 + $0x548] ss:$16 sps:$4 sm:$0xff]  }
  0xa9   :  { %6666 = vmatprep.subr.bf16.mxu0 %v11506_v63  ;;  %7514 = vmatprep.subr.bf16.mxu1 %v11509_v0  ;;  %v11590_v63 = vld [vmem:[#allocation2 + $0x564] ss:$16 sps:$4 sm:$0xff]   ;;  %v11593_v0 = vld [vmem:[#allocation2 + $0x56c] ss:$16 sps:$4 sm:$0xff]  }
  0xac   :  { %6667 = vmatpush1.bf16.msra.mxu0 %v11504_v1  ;;  %7515 = vmatpush1.bf16.msra.mxu1 %v11507_v2  ;;  %v11588_v1 = vld [vmem:[#allocation2 + $0x560] ss:$16 sps:$4 sm:$0xff]   ;;  %v11591_v2 = vld [vmem:[#allocation2 + $0x568] ss:$16 sps:$4 sm:$0xff]  }
  0xad   :  { %6668 = vmatprep.subr.bf16.mxu0 %v11512_v3  ;;  %7516 = vmatprep.subr.bf16.mxu1 %v11515_v4  ;;  %v11596_v3 = vld [vmem:[#allocation2 + $0x584] ss:$16 sps:$4 sm:$0xff]   ;;  %v11599_v4 = vld [vmem:[#allocation2 + $0x58c] ss:$16 sps:$4 sm:$0xff]  }
  0xb0   :  { %6669 = vmatpush1.bf16.msra.mxu0 %v11510_v5  ;;  %7517 = vmatpush1.bf16.msra.mxu1 %v11513_v6  ;;  %v11594_v5 = vld [vmem:[#allocation2 + $0x580] ss:$16 sps:$4 sm:$0xff]   ;;  %v11597_v6 = vld [vmem:[#allocation2 + $0x588] ss:$16 sps:$4 sm:$0xff]  }
  0xb1   :  { %6670 = vmatprep.subr.bf16.mxu0 %v11518_v7  ;;  %7518 = vmatprep.subr.bf16.mxu1 %v11521_v8  ;;  %v11602_v7 = vld [vmem:[#allocation2 + $0x5a4] ss:$16 sps:$4 sm:$0xff]   ;;  %v11605_v8 = vld [vmem:[#allocation2 + $0x5ac] ss:$16 sps:$4 sm:$0xff]  }
  0xb4   :  { %6671 = vmatpush1.bf16.msra.mxu0 %v11516_v9  ;;  %7519 = vmatpush1.bf16.msra.mxu1 %v11519_v10  ;;  %v11600_v9 = vld [vmem:[#allocation2 + $0x5a0] ss:$16 sps:$4 sm:$0xff]   ;;  %v11603_v10 = vld [vmem:[#allocation2 + $0x5a8] ss:$16 sps:$4 sm:$0xff]  }
  0xb5   :  { %6693 = vmatprep.subr.bf16.mxu0 %v11524_v11  ;;  %7541 = vmatprep.subr.bf16.mxu1 %v11527_v12  ;;  %v11608_v11 = vld [vmem:[#allocation2 + $0x5c4] ss:$16 sps:$4 sm:$0xff]   ;;  %v11611_v12 = vld [vmem:[#allocation2 + $0x5cc] ss:$16 sps:$4 sm:$0xff]  }
  0xb7   :  { %6673 = vmatmul.mubr.bf16.vlgmr.msra.gmra.mrb[0].mxu0 %v9765_v15  ;;  %7521 = vmatmul.mubr.bf16.vlgmr.msra.gmra.mrb[0].mxu1 %v9765_v15  ;;  %v11614_v15 = vld [vmem:[#allocation2 + $0x5e4] ss:$16 sps:$4 sm:$0xff]  }
  0xb8   :  { %6694 = vmatpush1.bf16.msra.mxu0 %v11522_v13  ;;  %7542 = vmatpush1.bf16.msra.mxu1 %v11525_v14  ;;  %v11606_v13 = vld [vmem:[#allocation2 + $0x5c0] ss:$16 sps:$4 sm:$0xff]   ;;  %v11609_v14 = vld [vmem:[#allocation2 + $0x5c8] ss:$16 sps:$4 sm:$0xff]  }
  0xb9   :  { %6695 = vmatprep.subr.bf16.mxu0 %v11530_v18  ;;  %7543 = vmatprep.subr.bf16.mxu1 %v11533_v19  ;;  %v11615_v18 = vld [vmem:[#allocation2 + $0x5e8] ss:$16 sps:$4 sm:$0xff]   ;;  %v11620_v19 = vld [vmem:[#allocation2 + $0x604] ss:$16 sps:$4 sm:$0xff]  }
  0xba   :  { %6682 = vmatprep.mubr.bf16.mxu0 %v9798_v20  ;;  %7530 = vmatprep.mubr.bf16.mxu1 %v9798_v20  ;;  %v11623_v20 = vld [vmem:[#allocation2 + $0x60c] ss:$16 sps:$4 sm:$0xff]  }
  0xbc   :  { %6696 = vmatpush1.bf16.msra.mxu0 %v11528_v21  ;;  %7544 = vmatpush1.bf16.msra.mxu1 %v11531_v22  ;;  %v93_v21 = vld [vmem:[%s13597_s0 + $0x110] sm:$0xff]  ;;  %v9767_v22 = vcombine.low %v13286_v25, %v13291_v27  ;;  %v11635_v27 = vld [vmem:[#allocation2 + $0x64c] ss:$16 sps:$4 sm:$0xff]  }
  0xbd   :  { %6697 = vmatprep.subr.bf16.mxu0 %v11536_v23  ;;  %7545 = vmatprep.subr.bf16.mxu1 %v11539_v24  ;;  %v109_v23 = vld [vmem:[%s13597_s0 + $0x190] sm:$0xff] }
  0xbe   :  { %v11618_v24 = vld [vmem:[#allocation2 + $0x600] ss:$16 sps:$4 sm:$0xff]   ;;  %v11632_v25 = vld [vmem:[#allocation2 + $0x644] ss:$16 sps:$4 sm:$0xff]  }
  0xbf   :  { %6683 = vmatmul.mubr.bf16.gmra.mrb[4].mxu0 %v9797_v26  ;;  %7531 = vmatmul.mubr.bf16.gmra.mrb[4].mxu1 %v9797_v26  ;;  %v11621_v26 = vld [vmem:[#allocation2 + $0x608] ss:$16 sps:$4 sm:$0xff]  }
  0xc0   :  { %6698 = vmatpush1.bf16.msra.mxu0 %v11534_v28  ;;  %7546 = vmatpush1.bf16.msra.mxu1 %v11537_v29  ;;  %v11626_v28 = vld [vmem:[#allocation2 + $0x624] ss:$16 sps:$4 sm:$0xff]   ;;  %v11629_v29 = vld [vmem:[#allocation2 + $0x62c] ss:$16 sps:$4 sm:$0xff]  }
  0xc1   :  { %6699 = vmatprep.subr.bf16.mxu0 %v11542_v30  ;;  %7547 = vmatprep.subr.bf16.mxu1 %v11545_v31  ;;  %v9800_v30 = vcombine.high %v93_v21, %v109_v23  ;;  %v11624_v31 = vld [vmem:[#allocation2 + $0x620] ss:$16 sps:$4 sm:$0xff]  }
  0xc2   :  { %6725 = vmatprep.mubr.bf16.mxu0 %v9768_v32  ;;  %7573 = vmatprep.mubr.bf16.mxu1 %v9768_v32  ;;  %v11627_v32 = vld [vmem:[#allocation2 + $0x628] ss:$16 sps:$4 sm:$0xff]  }
  0xc4   :  { %6700 = vmatpush1.bf16.msra.mxu0 %v11540_v33  ;;  %7548 = vmatpush1.bf16.msra.mxu1 %v11543_v34  ;;  %v13306_v33 = vld [vmem:[%s13597_s0 + $0x18] sm:$0xff]  ;;  %v9799_v34 = vcombine.low %v93_v21, %v109_v23  ;;  %v11702_v21 = vld [vmem:[#allocation2 + $0x7c0] ss:$16 sps:$4 sm:$0xff]   ;;  %v11710_v23 = vld [vmem:[#allocation2 + $0x7e4] ss:$16 sps:$4 sm:$0xff]  }
  0xc5   :  { %6701 = vmatprep.subr.bf16.mxu0 %v11548_v35  ;;  %7549 = vmatprep.subr.bf16.mxu1 %v11551_v36  ;;  %v13311_v35 = vld [vmem:[%s13597_s0 + $0x98] sm:$0xff]  ;;  %v11630_v36 = vld [vmem:[#allocation2 + $0x640] ss:$16 sps:$4 sm:$0xff]  }
  0xc8   :  { %6702 = vmatpush1.bf16.msra.mxu0 %v11546_v37  ;;  %7550 = vmatpush1.bf16.msra.mxu1 %v11549_v38  ;;  %v11633_v37 = vld [vmem:[#allocation2 + $0x648] ss:$16 sps:$4 sm:$0xff]   ;;  %v11638_v38 = vld [vmem:[#allocation2 + $0x664] ss:$16 sps:$4 sm:$0xff]  }
  0xc9   :  { %6703 = vmatprep.subr.bf16.mxu0 %v11554_v39  ;;  %7551 = vmatprep.subr.bf16.mxu1 %v11557_v40  ;;  %v11641_v39 = vld [vmem:[#allocation2 + $0x66c] ss:$16 sps:$4 sm:$0xff]   ;;  %v9770_v40 = vcombine.high %v13306_v33, %v13311_v35 }
  0xcc   :  { %6704 = vmatpush1.bf16.msra.mxu0 %v11552_v41  ;;  %7552 = vmatpush1.bf16.msra.mxu1 %v11555_v42  ;;  %v11636_v41 = vld [vmem:[#allocation2 + $0x660] ss:$16 sps:$4 sm:$0xff]   ;;  %v11639_v42 = vld [vmem:[#allocation2 + $0x668] ss:$16 sps:$4 sm:$0xff]  }
  0xcd   :  { %6705 = vmatprep.subr.bf16.mxu0 %v11560_v43  ;;  %7553 = vmatprep.subr.bf16.mxu1 %v11563_v44  ;;  %v11644_v43 = vld [vmem:[#allocation2 + $0x684] ss:$16 sps:$4 sm:$0xff]   ;;  %v11647_v44 = vld [vmem:[#allocation2 + $0x68c] ss:$16 sps:$4 sm:$0xff]  }
  0xd0   :  { %6706 = vmatpush1.bf16.msra.mxu0 %v11558_v45  ;;  %7554 = vmatpush1.bf16.msra.mxu1 %v11561_v46  ;;  %v11642_v45 = vld [vmem:[#allocation2 + $0x680] ss:$16 sps:$4 sm:$0xff]   ;;  %v11645_v46 = vld [vmem:[#allocation2 + $0x688] ss:$16 sps:$4 sm:$0xff]  }
  0xd1   :  { %6707 = vmatprep.subr.bf16.mxu0 %v11566_v47  ;;  %7555 = vmatprep.subr.bf16.mxu1 %v11569_v48  ;;  %v11650_v47 = vld [vmem:[#allocation2 + $0x6a4] ss:$16 sps:$4 sm:$0xff]   ;;  %v11653_v48 = vld [vmem:[#allocation2 + $0x6ac] ss:$16 sps:$4 sm:$0xff]  }
  0xd4   :  { %6708 = vmatpush1.bf16.msra.mxu0 %v11564_v49  ;;  %7556 = vmatpush1.bf16.msra.mxu1 %v11567_v50  ;;  %v11648_v49 = vld [vmem:[#allocation2 + $0x6a0] ss:$16 sps:$4 sm:$0xff]   ;;  %v11651_v50 = vld [vmem:[#allocation2 + $0x6a8] ss:$16 sps:$4 sm:$0xff]  }
  0xd5   :  { %6709 = vmatprep.subr.bf16.mxu0 %v11572_v51  ;;  %7557 = vmatprep.subr.bf16.mxu1 %v11575_v52  ;;  %v11656_v51 = vld [vmem:[#allocation2 + $0x6c4] ss:$16 sps:$4 sm:$0xff]   ;;  %v11659_v52 = vld [vmem:[#allocation2 + $0x6cc] ss:$16 sps:$4 sm:$0xff]  }
  0xd8   :  { %6710 = vmatpush1.bf16.msra.mxu0 %v11570_v53  ;;  %7558 = vmatpush1.bf16.msra.mxu1 %v11573_v54  ;;  %v11654_v53 = vld [vmem:[#allocation2 + $0x6c0] ss:$16 sps:$4 sm:$0xff]   ;;  %v11657_v54 = vld [vmem:[#allocation2 + $0x6c8] ss:$16 sps:$4 sm:$0xff]  }
  0xd9   :  { %6711 = vmatprep.subr.bf16.mxu0 %v11578_v55  ;;  %7559 = vmatprep.subr.bf16.mxu1 %v11581_v56  ;;  %v11662_v55 = vld [vmem:[#allocation2 + $0x6e4] ss:$16 sps:$4 sm:$0xff]   ;;  %v11665_v56 = vld [vmem:[#allocation2 + $0x6ec] ss:$16 sps:$4 sm:$0xff]  }
  0xdc   :  { %6712 = vmatpush1.bf16.msra.mxu0 %v11576_v57  ;;  %7560 = vmatpush1.bf16.msra.mxu1 %v11579_v58  ;;  %v11660_v57 = vld [vmem:[#allocation2 + $0x6e0] ss:$16 sps:$4 sm:$0xff]   ;;  %v11663_v58 = vld [vmem:[#allocation2 + $0x6e8] ss:$16 sps:$4 sm:$0xff]  }
  0xdd   :  { %6713 = vmatprep.subr.bf16.mxu0 %v11584_v59  ;;  %7561 = vmatprep.subr.bf16.mxu1 %v11587_v60  ;;  %v11668_v59 = vld [vmem:[#allocation2 + $0x704] ss:$16 sps:$4 sm:$0xff]   ;;  %v11671_v60 = vld [vmem:[#allocation2 + $0x70c] ss:$16 sps:$4 sm:$0xff]  }
  0xe0   :  { %6714 = vmatpush1.bf16.msra.mxu0 %v11582_v61  ;;  %7562 = vmatpush1.bf16.msra.mxu1 %v11585_v62  ;;  %v11666_v61 = vld [vmem:[#allocation2 + $0x700] ss:$16 sps:$4 sm:$0xff]   ;;  %v11669_v62 = vld [vmem:[#allocation2 + $0x708] ss:$16 sps:$4 sm:$0xff]  }
  0xe1   :  { %6715 = vmatprep.subr.bf16.mxu0 %v11590_v63  ;;  %7563 = vmatprep.subr.bf16.mxu1 %v11593_v0  ;;  %v11674_v63 = vld [vmem:[#allocation2 + $0x724] ss:$16 sps:$4 sm:$0xff]   ;;  %v11677_v0 = vld [vmem:[#allocation2 + $0x72c] ss:$16 sps:$4 sm:$0xff]  }
  0xe4   :  { %6716 = vmatpush1.bf16.msra.mxu0 %v11588_v1  ;;  %7564 = vmatpush1.bf16.msra.mxu1 %v11591_v2  ;;  %v11672_v1 = vld [vmem:[#allocation2 + $0x720] ss:$16 sps:$4 sm:$0xff]   ;;  %v11675_v2 = vld [vmem:[#allocation2 + $0x728] ss:$16 sps:$4 sm:$0xff]  }
  0xe5   :  { %6717 = vmatprep.subr.bf16.mxu0 %v11596_v3  ;;  %7565 = vmatprep.subr.bf16.mxu1 %v11599_v4  ;;  %v11680_v3 = vld [vmem:[#allocation2 + $0x744] ss:$16 sps:$4 sm:$0xff]   ;;  %v11683_v4 = vld [vmem:[#allocation2 + $0x74c] ss:$16 sps:$4 sm:$0xff]  }
  0xe8   :  { %6718 = vmatpush1.bf16.msra.mxu0 %v11594_v5  ;;  %7566 = vmatpush1.bf16.msra.mxu1 %v11597_v6  ;;  %v11678_v5 = vld [vmem:[#allocation2 + $0x740] ss:$16 sps:$4 sm:$0xff]   ;;  %v11681_v6 = vld [vmem:[#allocation2 + $0x748] ss:$16 sps:$4 sm:$0xff]  }
  0xe9   :  { %6719 = vmatprep.subr.bf16.mxu0 %v11602_v7  ;;  %7567 = vmatprep.subr.bf16.mxu1 %v11605_v8  ;;  %v11686_v7 = vld [vmem:[#allocation2 + $0x764] ss:$16 sps:$4 sm:$0xff]   ;;  %v11689_v8 = vld [vmem:[#allocation2 + $0x76c] ss:$16 sps:$4 sm:$0xff]  }
  0xec   :  { %6720 = vmatpush1.bf16.msra.mxu0 %v11600_v9  ;;  %7568 = vmatpush1.bf16.msra.mxu1 %v11603_v10  ;;  %v11684_v9 = vld [vmem:[#allocation2 + $0x760] ss:$16 sps:$4 sm:$0xff]   ;;  %v11687_v10 = vld [vmem:[#allocation2 + $0x768] ss:$16 sps:$4 sm:$0xff]  }
  0xed   :  { %6721 = vmatprep.subr.bf16.mxu0 %v11608_v11  ;;  %7569 = vmatprep.subr.bf16.mxu1 %v11611_v12  ;;  %v11692_v11 = vld [vmem:[#allocation2 + $0x784] ss:$16 sps:$4 sm:$0xff]   ;;  %v11695_v12 = vld [vmem:[#allocation2 + $0x78c] ss:$16 sps:$4 sm:$0xff]  }
  0xf0   :  { %6722 = vmatpush1.bf16.msra.mxu0 %v11606_v13  ;;  %7570 = vmatpush1.bf16.msra.mxu1 %v11609_v14  ;;  %v11690_v13 = vld [vmem:[#allocation2 + $0x780] ss:$16 sps:$4 sm:$0xff]   ;;  %v11693_v14 = vld [vmem:[#allocation2 + $0x788] ss:$16 sps:$4 sm:$0xff]  }
  0xf1   :  { %6723 = vmatprep.subr.bf16.mxu0 %v11614_v15  ;;  %7571 = vmatprep.subr.bf16.mxu1 %v11617_v16  ;;  %v11698_v15 = vld [vmem:[#allocation2 + $0x7a4] ss:$16 sps:$4 sm:$0xff]   ;;  %v11701_v16 = vld [vmem:[#allocation2 + $0x7ac] ss:$16 sps:$4 sm:$0xff]  }
  0xf4   :  { %6724 = vmatpush1.bf16.msra.mxu0 %v11612_v17  ;;  %7572 = vmatpush1.bf16.msra.mxu1 %v11615_v18  ;;  %v11696_v17 = vld [vmem:[#allocation2 + $0x7a0] ss:$16 sps:$4 sm:$0xff]   ;;  %v11699_v18 = vld [vmem:[#allocation2 + $0x7a8] ss:$16 sps:$4 sm:$0xff]  }
  0xf5   :  { %6746 = vmatprep.subr.bf16.mxu0 %v11620_v19  ;;  %7594 = vmatprep.subr.bf16.mxu1 %v11623_v20  ;;  %v11704_v19 = vld [vmem:[#allocation2 + $0x7c4] ss:$16 sps:$4 sm:$0xff]   ;;  %v11707_v20 = vld [vmem:[#allocation2 + $0x7cc] ss:$16 sps:$4 sm:$0xff]  }
  0xf7   :  { %6726 = vmatmul.mubr.bf16.vlgmr.msra.gmra.mrb[0].mxu0 %v9767_v22  ;;  %7574 = vmatmul.mubr.bf16.vlgmr.msra.gmra.mrb[0].mxu1 %v9767_v22  ;;  %v11705_v22 = vld [vmem:[#allocation2 + $0x7c8] ss:$16 sps:$4 sm:$0xff]  }
  0xf8   :  { %6747 = vmatpush1.bf16.msra.mxu0 %v11618_v24  ;;  %7595 = vmatpush1.bf16.msra.mxu1 %v11621_v26  ;;  %v11713_v24 = vld [vmem:[#allocation2 + $0x7ec] ss:$16 sps:$4 sm:$0xff]   ;;  %v11708_v26 = vld [vmem:[#allocation2 + $0x7e0] ss:$16 sps:$4 sm:$0xff]  }
  0xf9   :  { %6748 = vmatprep.subr.bf16.mxu0 %v11626_v28  ;;  %7596 = vmatprep.subr.bf16.mxu1 %v11629_v29  ;;  %v11711_v28 = vld [vmem:[#allocation2 + $0x7e8] ss:$16 sps:$4 sm:$0xff]   ;;  %v11716_v29 = vld [vmem:[#allocation2 + $0x804] ss:$16 sps:$4 sm:$0xff]  }
  0xfa   :  { %6735 = vmatprep.mubr.bf16.mxu0 %v9800_v30  ;;  %7583 = vmatprep.mubr.bf16.mxu1 %v9800_v30  ;;  %v11719_v30 = vld [vmem:[#allocation2 + $0x80c] ss:$16 sps:$4 sm:$0xff]  }
  0xfc   :  { %6749 = vmatpush1.bf16.msra.mxu0 %v11624_v31  ;;  %7597 = vmatpush1.bf16.msra.mxu1 %v11627_v32  ;;  %v94_v31 = vld [vmem:[%s13597_s0 + $0x118] sm:$0xff]  ;;  %v9769_v32 = vcombine.low %v13306_v33, %v13311_v35  ;;  %v11728_v33 = vld [vmem:[#allocation2 + $0x844] ss:$16 sps:$4 sm:$0xff]  }
  0xfd   :  { %6750 = vmatprep.subr.bf16.mxu0 %v11632_v25  ;;  %7598 = vmatprep.subr.bf16.mxu1 %v11635_v27  ;;  %v110_v25 = vld [vmem:[%s13597_s0 + $0x198] sm:$0xff]  ;;  %v11714_v27 = vld [vmem:[#allocation2 + $0x800] ss:$16 sps:$4 sm:$0xff]  }
  0xfe   :  { %v11731_v35 = vld [vmem:[#allocation2 + $0x84c] ss:$16 sps:$4 sm:$0xff]  }
  0xff   :  { %6736 = vmatmul.mubr.bf16.gmra.mrb[4].mxu0 %v9799_v34  ;;  %7584 = vmatmul.mubr.bf16.gmra.mrb[4].mxu1 %v9799_v34  ;;  %v11717_v34 = vld [vmem:[#allocation2 + $0x808] ss:$16 sps:$4 sm:$0xff]  }
 0x100   :  { %6751 = vmatpush1.bf16.msra.mxu0 %v11630_v36  ;;  %7599 = vmatpush1.bf16.msra.mxu1 %v11633_v37  ;;  %v11722_v36 = vld [vmem:[#allocation2 + $0x824] ss:$16 sps:$4 sm:$0xff]   ;;  %v11725_v37 = vld [vmem:[#allocation2 + $0x82c] ss:$16 sps:$4 sm:$0xff]  }
 0x101   :  { %6752 = vmatprep.subr.bf16.mxu0 %v11638_v38  ;;  %7600 = vmatprep.subr.bf16.mxu1 %v11641_v39  ;;  %v9802_v38 = vcombine.high %v94_v31, %v110_v25  ;;  %v11720_v39 = vld [vmem:[#allocation2 + $0x820] ss:$16 sps:$4 sm:$0xff]  }
 0x102   :  { %6778 = vmatprep.mubr.bf16.mxu0 %v9770_v40  ;;  %7626 = vmatprep.mubr.bf16.mxu1 %v9770_v40  ;;  %v11723_v40 = vld [vmem:[#allocation2 + $0x828] ss:$16 sps:$4 sm:$0xff]  }
 0x104   :  { %6753 = vmatpush1.bf16.msra.mxu0 %v11636_v41  ;;  %7601 = vmatpush1.bf16.msra.mxu1 %v11639_v42  ;;  %v13326_v41 = vld [vmem:[%s13597_s0 + $0x20] sm:$0xff]  ;;  %v9801_v42 = vcombine.low %v94_v31, %v110_v25 }
 0x105   :  { %6754 = vmatprep.subr.bf16.mxu0 %v11644_v43  ;;  %7602 = vmatprep.subr.bf16.mxu1 %v11647_v44  ;;  %v13331_v43 = vld [vmem:[%s13597_s0 + $0xa0] sm:$0xff] }
 0x106   :  { %v11726_v44 = vld [vmem:[#allocation2 + $0x840] ss:$16 sps:$4 sm:$0xff]   ;;  %v11806_v25 = vld [vmem:[#allocation2 + $0x9e4] ss:$16 sps:$4 sm:$0xff]  }
 0x107   :  { %v11798_v31 = vld [vmem:[#allocation2 + $0x9c0] ss:$16 sps:$4 sm:$0xff]  }
 0x108   :  { %6755 = vmatpush1.bf16.msra.mxu0 %v11642_v45  ;;  %7603 = vmatpush1.bf16.msra.mxu1 %v11645_v46  ;;  %v11729_v45 = vld [vmem:[#allocation2 + $0x848] ss:$16 sps:$4 sm:$0xff]   ;;  %v11734_v46 = vld [vmem:[#allocation2 + $0x864] ss:$16 sps:$4 sm:$0xff]  }
 0x109   :  { %6756 = vmatprep.subr.bf16.mxu0 %v11650_v47  ;;  %7604 = vmatprep.subr.bf16.mxu1 %v11653_v48  ;;  %v11737_v47 = vld [vmem:[#allocation2 + $0x86c] ss:$16 sps:$4 sm:$0xff]   ;;  %v9772_v48 = vcombine.high %v13326_v41, %v13331_v43 }
 0x10c   :  { %6757 = vmatpush1.bf16.msra.mxu0 %v11648_v49  ;;  %7605 = vmatpush1.bf16.msra.mxu1 %v11651_v50  ;;  %v11732_v49 = vld [vmem:[#allocation2 + $0x860] ss:$16 sps:$4 sm:$0xff]   ;;  %v11735_v50 = vld [vmem:[#allocation2 + $0x868] ss:$16 sps:$4 sm:$0xff]  }
 0x10d   :  { %6758 = vmatprep.subr.bf16.mxu0 %v11656_v51  ;;  %7606 = vmatprep.subr.bf16.mxu1 %v11659_v52  ;;  %v11740_v51 = vld [vmem:[#allocation2 + $0x884] ss:$16 sps:$4 sm:$0xff]   ;;  %v11743_v52 = vld [vmem:[#allocation2 + $0x88c] ss:$16 sps:$4 sm:$0xff]  }
 0x110   :  { %6759 = vmatpush1.bf16.msra.mxu0 %v11654_v53  ;;  %7607 = vmatpush1.bf16.msra.mxu1 %v11657_v54  ;;  %v11738_v53 = vld [vmem:[#allocation2 + $0x880] ss:$16 sps:$4 sm:$0xff]   ;;  %v11741_v54 = vld [vmem:[#allocation2 + $0x888] ss:$16 sps:$4 sm:$0xff]  }
 0x111   :  { %6760 = vmatprep.subr.bf16.mxu0 %v11662_v55  ;;  %7608 = vmatprep.subr.bf16.mxu1 %v11665_v56  ;;  %v11746_v55 = vld [vmem:[#allocation2 + $0x8a4] ss:$16 sps:$4 sm:$0xff]   ;;  %v11749_v56 = vld [vmem:[#allocation2 + $0x8ac] ss:$16 sps:$4 sm:$0xff]  }
 0x114   :  { %6761 = vmatpush1.bf16.msra.mxu0 %v11660_v57  ;;  %7609 = vmatpush1.bf16.msra.mxu1 %v11663_v58  ;;  %v11744_v57 = vld [vmem:[#allocation2 + $0x8a0] ss:$16 sps:$4 sm:$0xff]   ;;  %v11747_v58 = vld [vmem:[#allocation2 + $0x8a8] ss:$16 sps:$4 sm:$0xff]  }
 0x115   :  { %6762 = vmatprep.subr.bf16.mxu0 %v11668_v59  ;;  %7610 = vmatprep.subr.bf16.mxu1 %v11671_v60  ;;  %v11752_v59 = vld [vmem:[#allocation2 + $0x8c4] ss:$16 sps:$4 sm:$0xff]   ;;  %v11755_v60 = vld [vmem:[#allocation2 + $0x8cc] ss:$16 sps:$4 sm:$0xff]  }
 0x118   :  { %6763 = vmatpush1.bf16.msra.mxu0 %v11666_v61  ;;  %7611 = vmatpush1.bf16.msra.mxu1 %v11669_v62  ;;  %v11750_v61 = vld [vmem:[#allocation2 + $0x8c0] ss:$16 sps:$4 sm:$0xff]   ;;  %v11753_v62 = vld [vmem:[#allocation2 + $0x8c8] ss:$16 sps:$4 sm:$0xff]  }
 0x119   :  { %6764 = vmatprep.subr.bf16.mxu0 %v11674_v63  ;;  %7612 = vmatprep.subr.bf16.mxu1 %v11677_v0  ;;  %v11758_v63 = vld [vmem:[#allocation2 + $0x8e4] ss:$16 sps:$4 sm:$0xff]   ;;  %v11761_v0 = vld [vmem:[#allocation2 + $0x8ec] ss:$16 sps:$4 sm:$0xff]  }
 0x11c   :  { %6765 = vmatpush1.bf16.msra.mxu0 %v11672_v1  ;;  %7613 = vmatpush1.bf16.msra.mxu1 %v11675_v2  ;;  %v11756_v1 = vld [vmem:[#allocation2 + $0x8e0] ss:$16 sps:$4 sm:$0xff]   ;;  %v11759_v2 = vld [vmem:[#allocation2 + $0x8e8] ss:$16 sps:$4 sm:$0xff]  }
 0x11d   :  { %6766 = vmatprep.subr.bf16.mxu0 %v11680_v3  ;;  %7614 = vmatprep.subr.bf16.mxu1 %v11683_v4  ;;  %v11764_v3 = vld [vmem:[#allocation2 + $0x904] ss:$16 sps:$4 sm:$0xff]   ;;  %v11767_v4 = vld [vmem:[#allocation2 + $0x90c] ss:$16 sps:$4 sm:$0xff]  }
 0x120   :  { %6767 = vmatpush1.bf16.msra.mxu0 %v11678_v5  ;;  %7615 = vmatpush1.bf16.msra.mxu1 %v11681_v6  ;;  %v11762_v5 = vld [vmem:[#allocation2 + $0x900] ss:$16 sps:$4 sm:$0xff]   ;;  %v11765_v6 = vld [vmem:[#allocation2 + $0x908] ss:$16 sps:$4 sm:$0xff]  }
 0x121   :  { %6768 = vmatprep.subr.bf16.mxu0 %v11686_v7  ;;  %7616 = vmatprep.subr.bf16.mxu1 %v11689_v8  ;;  %v11770_v7 = vld [vmem:[#allocation2 + $0x924] ss:$16 sps:$4 sm:$0xff]   ;;  %v11773_v8 = vld [vmem:[#allocation2 + $0x92c] ss:$16 sps:$4 sm:$0xff]  }
 0x124   :  { %6769 = vmatpush1.bf16.msra.mxu0 %v11684_v9  ;;  %7617 = vmatpush1.bf16.msra.mxu1 %v11687_v10  ;;  %v11768_v9 = vld [vmem:[#allocation2 + $0x920] ss:$16 sps:$4 sm:$0xff]   ;;  %v11771_v10 = vld [vmem:[#allocation2 + $0x928] ss:$16 sps:$4 sm:$0xff]  }
 0x125   :  { %6770 = vmatprep.subr.bf16.mxu0 %v11692_v11  ;;  %7618 = vmatprep.subr.bf16.mxu1 %v11695_v12  ;;  %v11776_v11 = vld [vmem:[#allocation2 + $0x944] ss:$16 sps:$4 sm:$0xff]   ;;  %v11779_v12 = vld [vmem:[#allocation2 + $0x94c] ss:$16 sps:$4 sm:$0xff]  }
 0x128   :  { %6771 = vmatpush1.bf16.msra.mxu0 %v11690_v13  ;;  %7619 = vmatpush1.bf16.msra.mxu1 %v11693_v14  ;;  %v11774_v13 = vld [vmem:[#allocation2 + $0x940] ss:$16 sps:$4 sm:$0xff]   ;;  %v11777_v14 = vld [vmem:[#allocation2 + $0x948] ss:$16 sps:$4 sm:$0xff]  }
 0x129   :  { %6772 = vmatprep.subr.bf16.mxu0 %v11698_v15  ;;  %7620 = vmatprep.subr.bf16.mxu1 %v11701_v16  ;;  %v11782_v15 = vld [vmem:[#allocation2 + $0x964] ss:$16 sps:$4 sm:$0xff]   ;;  %v11785_v16 = vld [vmem:[#allocation2 + $0x96c] ss:$16 sps:$4 sm:$0xff]  }
 0x12c   :  { %6773 = vmatpush1.bf16.msra.mxu0 %v11696_v17  ;;  %7621 = vmatpush1.bf16.msra.mxu1 %v11699_v18  ;;  %v11780_v17 = vld [vmem:[#allocation2 + $0x960] ss:$16 sps:$4 sm:$0xff]   ;;  %v11783_v18 = vld [vmem:[#allocation2 + $0x968] ss:$16 sps:$4 sm:$0xff]  }
 0x12d   :  { %6774 = vmatprep.subr.bf16.mxu0 %v11704_v19  ;;  %7622 = vmatprep.subr.bf16.mxu1 %v11707_v20  ;;  %v11788_v19 = vld [vmem:[#allocation2 + $0x984] ss:$16 sps:$4 sm:$0xff]   ;;  %v11791_v20 = vld [vmem:[#allocation2 + $0x98c] ss:$16 sps:$4 sm:$0xff]  }
 0x130   :  { %6775 = vmatpush1.bf16.msra.mxu0 %v11702_v21  ;;  %7623 = vmatpush1.bf16.msra.mxu1 %v11705_v22  ;;  %v11786_v21 = vld [vmem:[#allocation2 + $0x980] ss:$16 sps:$4 sm:$0xff]   ;;  %v11789_v22 = vld [vmem:[#allocation2 + $0x988] ss:$16 sps:$4 sm:$0xff]  }
 0x131   :  { %6776 = vmatprep.subr.bf16.mxu0 %v11710_v23  ;;  %7624 = vmatprep.subr.bf16.mxu1 %v11713_v24  ;;  %v11794_v23 = vld [vmem:[#allocation2 + $0x9a4] ss:$16 sps:$4 sm:$0xff]   ;;  %v11797_v24 = vld [vmem:[#allocation2 + $0x9ac] ss:$16 sps:$4 sm:$0xff]  }
 0x134   :  { %6777 = vmatpush1.bf16.msra.mxu0 %v11708_v26  ;;  %7625 = vmatpush1.bf16.msra.mxu1 %v11711_v28  ;;  %v11792_v26 = vld [vmem:[#allocation2 + $0x9a0] ss:$16 sps:$4 sm:$0xff]   ;;  %v11795_v28 = vld [vmem:[#allocation2 + $0x9a8] ss:$16 sps:$4 sm:$0xff]  }
 0x135   :  { %6799 = vmatprep.subr.bf16.mxu0 %v11716_v29  ;;  %7647 = vmatprep.subr.bf16.mxu1 %v11719_v30  ;;  %v11800_v29 = vld [vmem:[#allocation2 + $0x9c4] ss:$16 sps:$4 sm:$0xff]   ;;  %v11803_v30 = vld [vmem:[#allocation2 + $0x9cc] ss:$16 sps:$4 sm:$0xff]  }
 0x137   :  { %6779 = vmatmul.mubr.bf16.vlgmr.msra.gmra.mrb[0].mxu0 %v9769_v32  ;;  %7627 = vmatmul.mubr.bf16.vlgmr.msra.gmra.mrb[0].mxu1 %v9769_v32  ;;  %v11801_v32 = vld [vmem:[#allocation2 + $0x9c8] ss:$16 sps:$4 sm:$0xff]  }
 0x138   :  { %6800 = vmatpush1.bf16.msra.mxu0 %v11714_v27  ;;  %7648 = vmatpush1.bf16.msra.mxu1 %v11717_v34  ;;  %v11809_v27 = vld [vmem:[#allocation2 + $0x9ec] ss:$16 sps:$4 sm:$0xff]   ;;  %v11804_v34 = vld [vmem:[#allocation2 + $0x9e0] ss:$16 sps:$4 sm:$0xff]  }
 0x139   :  { %6801 = vmatprep.subr.bf16.mxu0 %v11722_v36  ;;  %7649 = vmatprep.subr.bf16.mxu1 %v11725_v37  ;;  %v11807_v36 = vld [vmem:[#allocation2 + $0x9e8] ss:$16 sps:$4 sm:$0xff]   ;;  %v11812_v37 = vld [vmem:[#allocation2 + $0xa04] ss:$16 sps:$4 sm:$0xff]  }
 0x13a   :  { %6788 = vmatprep.mubr.bf16.mxu0 %v9802_v38  ;;  %7636 = vmatprep.mubr.bf16.mxu1 %v9802_v38  ;;  %v11815_v38 = vld [vmem:[#allocation2 + $0xa0c] ss:$16 sps:$4 sm:$0xff]  }
 0x13c   :  { %6802 = vmatpush1.bf16.msra.mxu0 %v11720_v39  ;;  %7650 = vmatpush1.bf16.msra.mxu1 %v11723_v40  ;;  %v95_v39 = vld [vmem:[%s13597_s0 + $0x120] sm:$0xff] }
 0x13d   :  { %6803 = vmatprep.subr.bf16.mxu0 %v11728_v33  ;;  %7651 = vmatprep.subr.bf16.mxu1 %v11731_v35  ;;  %v111_v40 = vld [vmem:[%s13597_s0 + $0x1a0] sm:$0xff]  ;;  %v9771_v33 = vcombine.low %v13326_v41, %v13331_v43  ;;  %v13346_v41 = vld [vmem:[%s13597_s0 + $0x28] sm:$0xff] }
 0x13e   :  { %v11810_v35 = vld [vmem:[#allocation2 + $0xa00] ss:$16 sps:$4 sm:$0xff]   ;;  %v13351_v43 = vld [vmem:[%s13597_s0 + $0xa8] sm:$0xff] }
 0x13f   :  { %6789 = vmatmul.mubr.bf16.gmra.mrb[4].mxu0 %v9801_v42  ;;  %7637 = vmatmul.mubr.bf16.gmra.mrb[4].mxu1 %v9801_v42  ;;  %v11813_v42 = vld [vmem:[#allocation2 + $0xa08] ss:$16 sps:$4 sm:$0xff]  }
 0x140   :  { %6804 = vmatpush1.bf16.msra.mxu0 %v11726_v44  ;;  %7652 = vmatpush1.bf16.msra.mxu1 %v11729_v45  ;;  %v11818_v44 = vld [vmem:[#allocation2 + $0xa24] ss:$16 sps:$4 sm:$0xff]   ;;  %v11821_v45 = vld [vmem:[#allocation2 + $0xa2c] ss:$16 sps:$4 sm:$0xff]  }
 0x141   :  { %6805 = vmatprep.subr.bf16.mxu0 %v11734_v46  ;;  %7653 = vmatprep.subr.bf16.mxu1 %v11737_v47  ;;  %v11816_v46 = vld [vmem:[#allocation2 + $0xa20] ss:$16 sps:$4 sm:$0xff]   ;;  %v11819_v47 = vld [vmem:[#allocation2 + $0xa28] ss:$16 sps:$4 sm:$0xff]  }
 0x142   :  { %6831 = vmatprep.mubr.bf16.mxu0 %v9772_v48  ;;  %7679 = vmatprep.mubr.bf16.mxu1 %v9772_v48  ;;  %v9804_v48 = vcombine.high %v95_v39, %v111_v40 }
 0x144   :  { %6806 = vmatpush1.bf16.msra.mxu0 %v11732_v49  ;;  %7654 = vmatpush1.bf16.msra.mxu1 %v11735_v50  ;;  %v11824_v49 = vld [vmem:[#allocation2 + $0xa44] ss:$16 sps:$4 sm:$0xff]   ;;  %v11827_v50 = vld [vmem:[#allocation2 + $0xa4c] ss:$16 sps:$4 sm:$0xff]  }
 0x145   :  { %6807 = vmatprep.subr.bf16.mxu0 %v11740_v51  ;;  %7655 = vmatprep.subr.bf16.mxu1 %v11743_v52  ;;  %v9803_v51 = vcombine.low %v95_v39, %v111_v40  ;;  %v11822_v52 = vld [vmem:[#allocation2 + $0xa40] ss:$16 sps:$4 sm:$0xff]   ;;  %v11897_v40 = vld [vmem:[#allocation2 + $0xbc8] ss:$16 sps:$4 sm:$0xff]  }
 0x146   :  { %v11894_v39 = vld [vmem:[#allocation2 + $0xbc0] ss:$16 sps:$4 sm:$0xff]  }
 0x148   :  { %6808 = vmatpush1.bf16.msra.mxu0 %v11738_v53  ;;  %7656 = vmatpush1.bf16.msra.mxu1 %v11741_v54  ;;  %v11825_v53 = vld [vmem:[#allocation2 + $0xa48] ss:$16 sps:$4 sm:$0xff]   ;;  %v11830_v54 = vld [vmem:[#allocation2 + $0xa64] ss:$16 sps:$4 sm:$0xff]  }
 0x149   :  { %6809 = vmatprep.subr.bf16.mxu0 %v11746_v55  ;;  %7657 = vmatprep.subr.bf16.mxu1 %v11749_v56  ;;  %v11833_v55 = vld [vmem:[#allocation2 + $0xa6c] ss:$16 sps:$4 sm:$0xff]   ;;  %v9774_v56 = vcombine.high %v13346_v41, %v13351_v43 }
 0x14c   :  { %6810 = vmatpush1.bf16.msra.mxu0 %v11744_v57  ;;  %7658 = vmatpush1.bf16.msra.mxu1 %v11747_v58  ;;  %v11828_v57 = vld [vmem:[#allocation2 + $0xa60] ss:$16 sps:$4 sm:$0xff]   ;;  %v11831_v58 = vld [vmem:[#allocation2 + $0xa68] ss:$16 sps:$4 sm:$0xff]  }
 0x14d   :  { %6811 = vmatprep.subr.bf16.mxu0 %v11752_v59  ;;  %7659 = vmatprep.subr.bf16.mxu1 %v11755_v60  ;;  %v11836_v59 = vld [vmem:[#allocation2 + $0xa84] ss:$16 sps:$4 sm:$0xff]   ;;  %v11839_v60 = vld [vmem:[#allocation2 + $0xa8c] ss:$16 sps:$4 sm:$0xff]  }
 0x150   :  { %6812 = vmatpush1.bf16.msra.mxu0 %v11750_v61  ;;  %7660 = vmatpush1.bf16.msra.mxu1 %v11753_v62  ;;  %v11834_v61 = vld [vmem:[#allocation2 + $0xa80] ss:$16 sps:$4 sm:$0xff]   ;;  %v11837_v62 = vld [vmem:[#allocation2 + $0xa88] ss:$16 sps:$4 sm:$0xff]  }
 0x151   :  { %6813 = vmatprep.subr.bf16.mxu0 %v11758_v63  ;;  %7661 = vmatprep.subr.bf16.mxu1 %v11761_v0  ;;  %v11842_v63 = vld [vmem:[#allocation2 + $0xaa4] ss:$16 sps:$4 sm:$0xff]   ;;  %v11845_v0 = vld [vmem:[#allocation2 + $0xaac] ss:$16 sps:$4 sm:$0xff]  }
 0x154   :  { %6814 = vmatpush1.bf16.msra.mxu0 %v11756_v1  ;;  %7662 = vmatpush1.bf16.msra.mxu1 %v11759_v2  ;;  %v11840_v1 = vld [vmem:[#allocation2 + $0xaa0] ss:$16 sps:$4 sm:$0xff]   ;;  %v11843_v2 = vld [vmem:[#allocation2 + $0xaa8] ss:$16 sps:$4 sm:$0xff]  }
 0x155   :  { %6815 = vmatprep.subr.bf16.mxu0 %v11764_v3  ;;  %7663 = vmatprep.subr.bf16.mxu1 %v11767_v4  ;;  %v11848_v3 = vld [vmem:[#allocation2 + $0xac4] ss:$16 sps:$4 sm:$0xff]   ;;  %v11851_v4 = vld [vmem:[#allocation2 + $0xacc] ss:$16 sps:$4 sm:$0xff]  }
 0x158   :  { %6816 = vmatpush1.bf16.msra.mxu0 %v11762_v5  ;;  %7664 = vmatpush1.bf16.msra.mxu1 %v11765_v6  ;;  %v11846_v5 = vld [vmem:[#allocation2 + $0xac0] ss:$16 sps:$4 sm:$0xff]   ;;  %v11849_v6 = vld [vmem:[#allocation2 + $0xac8] ss:$16 sps:$4 sm:$0xff]  }
 0x159   :  { %6817 = vmatprep.subr.bf16.mxu0 %v11770_v7  ;;  %7665 = vmatprep.subr.bf16.mxu1 %v11773_v8  ;;  %v11854_v7 = vld [vmem:[#allocation2 + $0xae4] ss:$16 sps:$4 sm:$0xff]   ;;  %v11857_v8 = vld [vmem:[#allocation2 + $0xaec] ss:$16 sps:$4 sm:$0xff]  }
 0x15c   :  { %6818 = vmatpush1.bf16.msra.mxu0 %v11768_v9  ;;  %7666 = vmatpush1.bf16.msra.mxu1 %v11771_v10  ;;  %v11852_v9 = vld [vmem:[#allocation2 + $0xae0] ss:$16 sps:$4 sm:$0xff]   ;;  %v11855_v10 = vld [vmem:[#allocation2 + $0xae8] ss:$16 sps:$4 sm:$0xff]  }
 0x15d   :  { %6819 = vmatprep.subr.bf16.mxu0 %v11776_v11  ;;  %7667 = vmatprep.subr.bf16.mxu1 %v11779_v12  ;;  %v11860_v11 = vld [vmem:[#allocation2 + $0xb04] ss:$16 sps:$4 sm:$0xff]   ;;  %v11863_v12 = vld [vmem:[#allocation2 + $0xb0c] ss:$16 sps:$4 sm:$0xff]  }
 0x160   :  { %6820 = vmatpush1.bf16.msra.mxu0 %v11774_v13  ;;  %7668 = vmatpush1.bf16.msra.mxu1 %v11777_v14  ;;  %v11858_v13 = vld [vmem:[#allocation2 + $0xb00] ss:$16 sps:$4 sm:$0xff]   ;;  %v11861_v14 = vld [vmem:[#allocation2 + $0xb08] ss:$16 sps:$4 sm:$0xff]  }
 0x161   :  { %6821 = vmatprep.subr.bf16.mxu0 %v11782_v15  ;;  %7669 = vmatprep.subr.bf16.mxu1 %v11785_v16  ;;  %v11866_v15 = vld [vmem:[#allocation2 + $0xb24] ss:$16 sps:$4 sm:$0xff]   ;;  %v11869_v16 = vld [vmem:[#allocation2 + $0xb2c] ss:$16 sps:$4 sm:$0xff]  }
 0x164   :  { %6822 = vmatpush1.bf16.msra.mxu0 %v11780_v17  ;;  %7670 = vmatpush1.bf16.msra.mxu1 %v11783_v18  ;;  %v11864_v17 = vld [vmem:[#allocation2 + $0xb20] ss:$16 sps:$4 sm:$0xff]   ;;  %v11867_v18 = vld [vmem:[#allocation2 + $0xb28] ss:$16 sps:$4 sm:$0xff]  }
 0x165   :  { %6823 = vmatprep.subr.bf16.mxu0 %v11788_v19  ;;  %7671 = vmatprep.subr.bf16.mxu1 %v11791_v20  ;;  %v11872_v19 = vld [vmem:[#allocation2 + $0xb44] ss:$16 sps:$4 sm:$0xff]   ;;  %v11875_v20 = vld [vmem:[#allocation2 + $0xb4c] ss:$16 sps:$4 sm:$0xff]  }
 0x168   :  { %6824 = vmatpush1.bf16.msra.mxu0 %v11786_v21  ;;  %7672 = vmatpush1.bf16.msra.mxu1 %v11789_v22  ;;  %v11870_v21 = vld [vmem:[#allocation2 + $0xb40] ss:$16 sps:$4 sm:$0xff]   ;;  %v11873_v22 = vld [vmem:[#allocation2 + $0xb48] ss:$16 sps:$4 sm:$0xff]  }
 0x169   :  { %6825 = vmatprep.subr.bf16.mxu0 %v11794_v23  ;;  %7673 = vmatprep.subr.bf16.mxu1 %v11797_v24  ;;  %v11878_v23 = vld [vmem:[#allocation2 + $0xb64] ss:$16 sps:$4 sm:$0xff]   ;;  %v11881_v24 = vld [vmem:[#allocation2 + $0xb6c] ss:$16 sps:$4 sm:$0xff]  }
 0x16c   :  { %6826 = vmatpush1.bf16.msra.mxu0 %v11792_v26  ;;  %7674 = vmatpush1.bf16.msra.mxu1 %v11795_v28  ;;  %v11876_v26 = vld [vmem:[#allocation2 + $0xb60] ss:$16 sps:$4 sm:$0xff]   ;;  %v11879_v28 = vld [vmem:[#allocation2 + $0xb68] ss:$16 sps:$4 sm:$0xff]  }
 0x16d   :  { %6827 = vmatprep.subr.bf16.mxu0 %v11800_v29  ;;  %7675 = vmatprep.subr.bf16.mxu1 %v11803_v30  ;;  %v11884_v29 = vld [vmem:[#allocation2 + $0xb84] ss:$16 sps:$4 sm:$0xff]   ;;  %v11887_v30 = vld [vmem:[#allocation2 + $0xb8c] ss:$16 sps:$4 sm:$0xff]  }
 0x170   :  { %6828 = vmatpush1.bf16.msra.mxu0 %v11798_v31  ;;  %7676 = vmatpush1.bf16.msra.mxu1 %v11801_v32  ;;  %v11882_v31 = vld [vmem:[#allocation2 + $0xb80] ss:$16 sps:$4 sm:$0xff]   ;;  %v11885_v32 = vld [vmem:[#allocation2 + $0xb88] ss:$16 sps:$4 sm:$0xff]  }
 0x171   :  { %6829 = vmatprep.subr.bf16.mxu0 %v11806_v25  ;;  %7677 = vmatprep.subr.bf16.mxu1 %v11809_v27  ;;  %v11890_v25 = vld [vmem:[#allocation2 + $0xba4] ss:$16 sps:$4 sm:$0xff]   ;;  %v11893_v27 = vld [vmem:[#allocation2 + $0xbac] ss:$16 sps:$4 sm:$0xff]  }
 0x174   :  { %6830 = vmatpush1.bf16.msra.mxu0 %v11804_v34  ;;  %7678 = vmatpush1.bf16.msra.mxu1 %v11807_v36  ;;  %v11888_v34 = vld [vmem:[#allocation2 + $0xba0] ss:$16 sps:$4 sm:$0xff]   ;;  %v11891_v36 = vld [vmem:[#allocation2 + $0xba8] ss:$16 sps:$4 sm:$0xff]  }
 0x175   :  { %6852 = vmatprep.subr.bf16.mxu0 %v11812_v37  ;;  %7700 = vmatprep.subr.bf16.mxu1 %v11815_v38  ;;  %v11896_v37 = vld [vmem:[#allocation2 + $0xbc4] ss:$16 sps:$4 sm:$0xff]   ;;  %v11899_v38 = vld [vmem:[#allocation2 + $0xbcc] ss:$16 sps:$4 sm:$0xff]  }
 0x177   :  { %6832 = vmatmul.mubr.bf16.vlgmr.msra.gmra.mrb[0].mxu0 %v9771_v33  ;;  %7680 = vmatmul.mubr.bf16.vlgmr.msra.gmra.mrb[0].mxu1 %v9771_v33  ;;  %v11902_v33 = vld [vmem:[#allocation2 + $0xbe4] ss:$16 sps:$4 sm:$0xff]  }
 0x178   :  { %6853 = vmatpush1.bf16.msra.mxu0 %v11810_v35  ;;  %7701 = vmatpush1.bf16.msra.mxu1 %v11813_v42  ;;  %v11905_v35 = vld [vmem:[#allocation2 + $0xbec] ss:$16 sps:$4 sm:$0xff]   ;;  %v11900_v42 = vld [vmem:[#allocation2 + $0xbe0] ss:$16 sps:$4 sm:$0xff]  }
 0x179   :  { %6854 = vmatprep.subr.bf16.mxu0 %v11818_v44  ;;  %7702 = vmatprep.subr.bf16.mxu1 %v11821_v45  ;;  %v11903_v44 = vld [vmem:[#allocation2 + $0xbe8] ss:$16 sps:$4 sm:$0xff]   ;;  %v11908_v45 = vld [vmem:[#allocation2 + $0xc04] ss:$16 sps:$4 sm:$0xff]  }
 0x17a   :  { %6841 = vmatprep.mubr.bf16.mxu0 %v9804_v48  ;;  %7689 = vmatprep.mubr.bf16.mxu1 %v9804_v48  ;;  %v112_v48 = vld [vmem:[%s13597_s0 + $0x1a8] sm:$0xff] }
 0x17c   :  { %6855 = vmatpush1.bf16.msra.mxu0 %v11816_v46  ;;  %7703 = vmatpush1.bf16.msra.mxu1 %v11819_v47  ;;  %v11911_v46 = vld [vmem:[#allocation2 + $0xc0c] ss:$16 sps:$4 sm:$0xff]  }
 0x17d   :  { %6856 = vmatprep.subr.bf16.mxu0 %v11824_v49  ;;  %7704 = vmatprep.subr.bf16.mxu1 %v11827_v50  ;;  %v96_v47 = vld [vmem:[%s13597_s0 + $0x128] sm:$0xff]  ;;  %v9773_v49 = vcombine.low %v13346_v41, %v13351_v43  ;;  %v11906_v50 = vld [vmem:[#allocation2 + $0xc00] ss:$16 sps:$4 sm:$0xff]  }
 0x17e   :  { %v13366_v41 = vld [vmem:[%s13597_s0 + $0x30] sm:$0xff] }
 0x17f   :  { %6842 = vmatmul.mubr.bf16.gmra.mrb[4].mxu0 %v9803_v51  ;;  %7690 = vmatmul.mubr.bf16.gmra.mrb[4].mxu1 %v9803_v51  ;;  %v11909_v51 = vld [vmem:[#allocation2 + $0xc08] ss:$16 sps:$4 sm:$0xff]   ;;  %v13371_v43 = vld [vmem:[%s13597_s0 + $0xb0] sm:$0xff] }
 0x180   :  { %6857 = vmatpush1.bf16.msra.mxu0 %v11822_v52  ;;  %7705 = vmatpush1.bf16.msra.mxu1 %v11825_v53  ;;  %v11914_v52 = vld [vmem:[#allocation2 + $0xc24] ss:$16 sps:$4 sm:$0xff]   ;;  %v11917_v53 = vld [vmem:[#allocation2 + $0xc2c] ss:$16 sps:$4 sm:$0xff]  }
 0x181   :  { %6858 = vmatprep.subr.bf16.mxu0 %v11830_v54  ;;  %7706 = vmatprep.subr.bf16.mxu1 %v11833_v55  ;;  %v11912_v54 = vld [vmem:[#allocation2 + $0xc20] ss:$16 sps:$4 sm:$0xff]   ;;  %v11915_v55 = vld [vmem:[#allocation2 + $0xc28] ss:$16 sps:$4 sm:$0xff]  }
 0x182   :  { %6884 = vmatprep.mubr.bf16.mxu0 %v9774_v56  ;;  %7732 = vmatprep.mubr.bf16.mxu1 %v9774_v56  ;;  %v9806_v56 = vcombine.high %v96_v47, %v112_v48 }
 0x184   :  { %6859 = vmatpush1.bf16.msra.mxu0 %v11828_v57  ;;  %7707 = vmatpush1.bf16.msra.mxu1 %v11831_v58  ;;  %v11920_v57 = vld [vmem:[#allocation2 + $0xc44] ss:$16 sps:$4 sm:$0xff]   ;;  %v11923_v58 = vld [vmem:[#allocation2 + $0xc4c] ss:$16 sps:$4 sm:$0xff]  }
 0x185   :  { %6860 = vmatprep.subr.bf16.mxu0 %v11836_v59  ;;  %7708 = vmatprep.subr.bf16.mxu1 %v11839_v60  ;;  %v9805_v59 = vcombine.low %v96_v47, %v112_v48  ;;  %v11918_v60 = vld [vmem:[#allocation2 + $0xc40] ss:$16 sps:$4 sm:$0xff]   ;;  %v11993_v48 = vld [vmem:[#allocation2 + $0xdc8] ss:$16 sps:$4 sm:$0xff]  }
 0x186   :  { %v11990_v47 = vld [vmem:[#allocation2 + $0xdc0] ss:$16 sps:$4 sm:$0xff]  }
 0x188   :  { %6861 = vmatpush1.bf16.msra.mxu0 %v11834_v61  ;;  %7709 = vmatpush1.bf16.msra.mxu1 %v11837_v62  ;;  %v11921_v61 = vld [vmem:[#allocation2 + $0xc48] ss:$16 sps:$4 sm:$0xff]   ;;  %v11926_v62 = vld [vmem:[#allocation2 + $0xc64] ss:$16 sps:$4 sm:$0xff]  }
 0x189   :  { %6862 = vmatprep.subr.bf16.mxu0 %v11842_v63  ;;  %7710 = vmatprep.subr.bf16.mxu1 %v11845_v0  ;;  %v11929_v63 = vld [vmem:[#allocation2 + $0xc6c] ss:$16 sps:$4 sm:$0xff]   ;;  %v9776_v0 = vcombine.high %v13366_v41, %v13371_v43 }
 0x18c   :  { %6863 = vmatpush1.bf16.msra.mxu0 %v11840_v1  ;;  %7711 = vmatpush1.bf16.msra.mxu1 %v11843_v2  ;;  %v11924_v1 = vld [vmem:[#allocation2 + $0xc60] ss:$16 sps:$4 sm:$0xff]   ;;  %v11927_v2 = vld [vmem:[#allocation2 + $0xc68] ss:$16 sps:$4 sm:$0xff]  }
 0x18d   :  { %6864 = vmatprep.subr.bf16.mxu0 %v11848_v3  ;;  %7712 = vmatprep.subr.bf16.mxu1 %v11851_v4  ;;  %v11932_v3 = vld [vmem:[#allocation2 + $0xc84] ss:$16 sps:$4 sm:$0xff]   ;;  %v11935_v4 = vld [vmem:[#allocation2 + $0xc8c] ss:$16 sps:$4 sm:$0xff]  }
 0x190   :  { %6865 = vmatpush1.bf16.msra.mxu0 %v11846_v5  ;;  %7713 = vmatpush1.bf16.msra.mxu1 %v11849_v6  ;;  %v11930_v5 = vld [vmem:[#allocation2 + $0xc80] ss:$16 sps:$4 sm:$0xff]   ;;  %v11933_v6 = vld [vmem:[#allocation2 + $0xc88] ss:$16 sps:$4 sm:$0xff]  }
 0x191   :  { %6866 = vmatprep.subr.bf16.mxu0 %v11854_v7  ;;  %7714 = vmatprep.subr.bf16.mxu1 %v11857_v8  ;;  %v11938_v7 = vld [vmem:[#allocation2 + $0xca4] ss:$16 sps:$4 sm:$0xff]   ;;  %v11941_v8 = vld [vmem:[#allocation2 + $0xcac] ss:$16 sps:$4 sm:$0xff]  }
 0x194   :  { %6867 = vmatpush1.bf16.msra.mxu0 %v11852_v9  ;;  %7715 = vmatpush1.bf16.msra.mxu1 %v11855_v10  ;;  %v11936_v9 = vld [vmem:[#allocation2 + $0xca0] ss:$16 sps:$4 sm:$0xff]   ;;  %v11939_v10 = vld [vmem:[#allocation2 + $0xca8] ss:$16 sps:$4 sm:$0xff]  }
 0x195   :  { %6868 = vmatprep.subr.bf16.mxu0 %v11860_v11  ;;  %7716 = vmatprep.subr.bf16.mxu1 %v11863_v12  ;;  %v11944_v11 = vld [vmem:[#allocation2 + $0xcc4] ss:$16 sps:$4 sm:$0xff]   ;;  %v11947_v12 = vld [vmem:[#allocation2 + $0xccc] ss:$16 sps:$4 sm:$0xff]  }
 0x198   :  { %6869 = vmatpush1.bf16.msra.mxu0 %v11858_v13  ;;  %7717 = vmatpush1.bf16.msra.mxu1 %v11861_v14  ;;  %v11942_v13 = vld [vmem:[#allocation2 + $0xcc0] ss:$16 sps:$4 sm:$0xff]   ;;  %v11945_v14 = vld [vmem:[#allocation2 + $0xcc8] ss:$16 sps:$4 sm:$0xff]  }
 0x199   :  { %6870 = vmatprep.subr.bf16.mxu0 %v11866_v15  ;;  %7718 = vmatprep.subr.bf16.mxu1 %v11869_v16  ;;  %v11950_v15 = vld [vmem:[#allocation2 + $0xce4] ss:$16 sps:$4 sm:$0xff]   ;;  %v11953_v16 = vld [vmem:[#allocation2 + $0xcec] ss:$16 sps:$4 sm:$0xff]  }
 0x19c   :  { %6871 = vmatpush1.bf16.msra.mxu0 %v11864_v17  ;;  %7719 = vmatpush1.bf16.msra.mxu1 %v11867_v18  ;;  %v11948_v17 = vld [vmem:[#allocation2 + $0xce0] ss:$16 sps:$4 sm:$0xff]   ;;  %v11951_v18 = vld [vmem:[#allocation2 + $0xce8] ss:$16 sps:$4 sm:$0xff]  }
 0x19d   :  { %6872 = vmatprep.subr.bf16.mxu0 %v11872_v19  ;;  %7720 = vmatprep.subr.bf16.mxu1 %v11875_v20  ;;  %v11956_v19 = vld [vmem:[#allocation2 + $0xd04] ss:$16 sps:$4 sm:$0xff]   ;;  %v11959_v20 = vld [vmem:[#allocation2 + $0xd0c] ss:$16 sps:$4 sm:$0xff]  }
 0x1a0   :  { %6873 = vmatpush1.bf16.msra.mxu0 %v11870_v21  ;;  %7721 = vmatpush1.bf16.msra.mxu1 %v11873_v22  ;;  %v11954_v21 = vld [vmem:[#allocation2 + $0xd00] ss:$16 sps:$4 sm:$0xff]   ;;  %v11957_v22 = vld [vmem:[#allocation2 + $0xd08] ss:$16 sps:$4 sm:$0xff]  }
 0x1a1   :  { %6874 = vmatprep.subr.bf16.mxu0 %v11878_v23  ;;  %7722 = vmatprep.subr.bf16.mxu1 %v11881_v24  ;;  %v11962_v23 = vld [vmem:[#allocation2 + $0xd24] ss:$16 sps:$4 sm:$0xff]   ;;  %v11965_v24 = vld [vmem:[#allocation2 + $0xd2c] ss:$16 sps:$4 sm:$0xff]  }
 0x1a4   :  { %6875 = vmatpush1.bf16.msra.mxu0 %v11876_v26  ;;  %7723 = vmatpush1.bf16.msra.mxu1 %v11879_v28  ;;  %v11960_v26 = vld [vmem:[#allocation2 + $0xd20] ss:$16 sps:$4 sm:$0xff]   ;;  %v11963_v28 = vld [vmem:[#allocation2 + $0xd28] ss:$16 sps:$4 sm:$0xff]  }
 0x1a5   :  { %6876 = vmatprep.subr.bf16.mxu0 %v11884_v29  ;;  %7724 = vmatprep.subr.bf16.mxu1 %v11887_v30  ;;  %v11968_v29 = vld [vmem:[#allocation2 + $0xd44] ss:$16 sps:$4 sm:$0xff]   ;;  %v11971_v30 = vld [vmem:[#allocation2 + $0xd4c] ss:$16 sps:$4 sm:$0xff]  }
 0x1a8   :  { %6877 = vmatpush1.bf16.msra.mxu0 %v11882_v31  ;;  %7725 = vmatpush1.bf16.msra.mxu1 %v11885_v32  ;;  %v11966_v31 = vld [vmem:[#allocation2 + $0xd40] ss:$16 sps:$4 sm:$0xff]   ;;  %v11969_v32 = vld [vmem:[#allocation2 + $0xd48] ss:$16 sps:$4 sm:$0xff]  }
 0x1a9   :  { %6878 = vmatprep.subr.bf16.mxu0 %v11890_v25  ;;  %7726 = vmatprep.subr.bf16.mxu1 %v11893_v27  ;;  %v11974_v25 = vld [vmem:[#allocation2 + $0xd64] ss:$16 sps:$4 sm:$0xff]   ;;  %v11977_v27 = vld [vmem:[#allocation2 + $0xd6c] ss:$16 sps:$4 sm:$0xff]  }
 0x1ac   :  { %6879 = vmatpush1.bf16.msra.mxu0 %v11888_v34  ;;  %7727 = vmatpush1.bf16.msra.mxu1 %v11891_v36  ;;  %v11972_v34 = vld [vmem:[#allocation2 + $0xd60] ss:$16 sps:$4 sm:$0xff]   ;;  %v11975_v36 = vld [vmem:[#allocation2 + $0xd68] ss:$16 sps:$4 sm:$0xff]  }
 0x1ad   :  { %6880 = vmatprep.subr.bf16.mxu0 %v11896_v37  ;;  %7728 = vmatprep.subr.bf16.mxu1 %v11899_v38  ;;  %v11980_v37 = vld [vmem:[#allocation2 + $0xd84] ss:$16 sps:$4 sm:$0xff]   ;;  %v11983_v38 = vld [vmem:[#allocation2 + $0xd8c] ss:$16 sps:$4 sm:$0xff]  }
 0x1b0   :  { %6881 = vmatpush1.bf16.msra.mxu0 %v11894_v39  ;;  %7729 = vmatpush1.bf16.msra.mxu1 %v11897_v40  ;;  %v11978_v39 = vld [vmem:[#allocation2 + $0xd80] ss:$16 sps:$4 sm:$0xff]   ;;  %v11981_v40 = vld [vmem:[#allocation2 + $0xd88] ss:$16 sps:$4 sm:$0xff]  }
 0x1b1   :  { %6882 = vmatprep.subr.bf16.mxu0 %v11902_v33  ;;  %7730 = vmatprep.subr.bf16.mxu1 %v11905_v35  ;;  %v11986_v33 = vld [vmem:[#allocation2 + $0xda4] ss:$16 sps:$4 sm:$0xff]   ;;  %v11989_v35 = vld [vmem:[#allocation2 + $0xdac] ss:$16 sps:$4 sm:$0xff]  }
 0x1b4   :  { %6883 = vmatpush1.bf16.msra.mxu0 %v11900_v42  ;;  %7731 = vmatpush1.bf16.msra.mxu1 %v11903_v44  ;;  %v11984_v42 = vld [vmem:[#allocation2 + $0xda0] ss:$16 sps:$4 sm:$0xff]   ;;  %v11987_v44 = vld [vmem:[#allocation2 + $0xda8] ss:$16 sps:$4 sm:$0xff]  }
 0x1b5   :  { %6905 = vmatprep.subr.bf16.mxu0 %v11908_v45  ;;  %7753 = vmatprep.subr.bf16.mxu1 %v11911_v46  ;;  %v11992_v45 = vld [vmem:[#allocation2 + $0xdc4] ss:$16 sps:$4 sm:$0xff]   ;;  %v11995_v46 = vld [vmem:[#allocation2 + $0xdcc] ss:$16 sps:$4 sm:$0xff]  }
 0x1b7   :  { %6885 = vmatmul.mubr.bf16.vlgmr.msra.gmra.mrb[0].mxu0 %v9773_v49  ;;  %7733 = vmatmul.mubr.bf16.vlgmr.msra.gmra.mrb[0].mxu1 %v9773_v49  ;;  %v11998_v49 = vld [vmem:[#allocation2 + $0xde4] ss:$16 sps:$4 sm:$0xff]  }
 0x1b8   :  { %6906 = vmatpush1.bf16.msra.mxu0 %v11906_v50  ;;  %7754 = vmatpush1.bf16.msra.mxu1 %v11909_v51  ;;  %v12001_v50 = vld [vmem:[#allocation2 + $0xdec] ss:$16 sps:$4 sm:$0xff]   ;;  %v11996_v51 = vld [vmem:[#allocation2 + $0xde0] ss:$16 sps:$4 sm:$0xff]  }
 0x1b9   :  { %6907 = vmatprep.subr.bf16.mxu0 %v11914_v52  ;;  %7755 = vmatprep.subr.bf16.mxu1 %v11917_v53  ;;  %v11999_v52 = vld [vmem:[#allocation2 + $0xde8] ss:$16 sps:$4 sm:$0xff]   ;;  %v12004_v53 = vld [vmem:[#allocation2 + $0xe04] ss:$16 sps:$4 sm:$0xff]  }
 0x1ba   :  { %6894 = vmatprep.mubr.bf16.mxu0 %v9806_v56  ;;  %7742 = vmatprep.mubr.bf16.mxu1 %v9806_v56  ;;  %v113_v56 = vld [vmem:[%s13597_s0 + $0x1b0] sm:$0xff] }
 0x1bc   :  { %6908 = vmatpush1.bf16.msra.mxu0 %v11912_v54  ;;  %7756 = vmatpush1.bf16.msra.mxu1 %v11915_v55  ;;  %v12007_v54 = vld [vmem:[#allocation2 + $0xe0c] ss:$16 sps:$4 sm:$0xff]   ;;  %v97_v55 = vld [vmem:[%s13597_s0 + $0x130] sm:$0xff] }
 0x1bd   :  { %6909 = vmatprep.subr.bf16.mxu0 %v11920_v57  ;;  %7757 = vmatprep.subr.bf16.mxu1 %v11923_v58  ;;  %v9775_v57 = vcombine.low %v13366_v41, %v13371_v43  ;;  %v12002_v58 = vld [vmem:[#allocation2 + $0xe00] ss:$16 sps:$4 sm:$0xff]   ;;  %v13386_v41 = vld [vmem:[%s13597_s0 + $0x38] sm:$0xff] }
 0x1be   :  { %v13391_v43 = vld [vmem:[%s13597_s0 + $0xb8] sm:$0xff] }
 0x1bf   :  { %6895 = vmatmul.mubr.bf16.gmra.mrb[4].mxu0 %v9805_v59  ;;  %7743 = vmatmul.mubr.bf16.gmra.mrb[4].mxu1 %v9805_v59  ;;  %v12005_v59 = vld [vmem:[#allocation2 + $0xe08] ss:$16 sps:$4 sm:$0xff]  }
 0x1c0   :  { %6910 = vmatpush1.bf16.msra.mxu0 %v11918_v60  ;;  %7758 = vmatpush1.bf16.msra.mxu1 %v11921_v61  ;;  %v12010_v60 = vld [vmem:[#allocation2 + $0xe24] ss:$16 sps:$4 sm:$0xff]   ;;  %v12013_v61 = vld [vmem:[#allocation2 + $0xe2c] ss:$16 sps:$4 sm:$0xff]  }
 0x1c1   :  { %6911 = vmatprep.subr.bf16.mxu0 %v11926_v62  ;;  %7759 = vmatprep.subr.bf16.mxu1 %v11929_v63  ;;  %v12008_v62 = vld [vmem:[#allocation2 + $0xe20] ss:$16 sps:$4 sm:$0xff]   ;;  %v12011_v63 = vld [vmem:[#allocation2 + $0xe28] ss:$16 sps:$4 sm:$0xff]  }
 0x1c2   :  { %6937 = vmatprep.mubr.bf16.mxu0 %v9776_v0  ;;  %7785 = vmatprep.mubr.bf16.mxu1 %v9776_v0  ;;  %v9808_v0 = vcombine.high %v97_v55, %v113_v56 }
 0x1c4   :  { %6912 = vmatpush1.bf16.msra.mxu0 %v11924_v1  ;;  %7760 = vmatpush1.bf16.msra.mxu1 %v11927_v2  ;;  %v12016_v1 = vld [vmem:[#allocation2 + $0xe44] ss:$16 sps:$4 sm:$0xff]   ;;  %v12019_v2 = vld [vmem:[#allocation2 + $0xe4c] ss:$16 sps:$4 sm:$0xff]  }
 0x1c5   :  { %6913 = vmatprep.subr.bf16.mxu0 %v11932_v3  ;;  %7761 = vmatprep.subr.bf16.mxu1 %v11935_v4  ;;  %v9807_v3 = vcombine.low %v97_v55, %v113_v56  ;;  %v12014_v4 = vld [vmem:[#allocation2 + $0xe40] ss:$16 sps:$4 sm:$0xff]   ;;  %v12089_v56 = vld [vmem:[#allocation2 + $0xfc8] ss:$16 sps:$4 sm:$0xff]  }
 0x1c6   :  { %v12086_v55 = vld [vmem:[#allocation2 + $0xfc0] ss:$16 sps:$4 sm:$0xff]  }
 0x1c8   :  { %6914 = vmatpush1.bf16.msra.mxu0 %v11930_v5  ;;  %7762 = vmatpush1.bf16.msra.mxu1 %v11933_v6  ;;  %v12017_v5 = vld [vmem:[#allocation2 + $0xe48] ss:$16 sps:$4 sm:$0xff]   ;;  %v12022_v6 = vld [vmem:[#allocation2 + $0xe64] ss:$16 sps:$4 sm:$0xff]  }
 0x1c9   :  { %6915 = vmatprep.subr.bf16.mxu0 %v11938_v7  ;;  %7763 = vmatprep.subr.bf16.mxu1 %v11941_v8  ;;  %v12025_v7 = vld [vmem:[#allocation2 + $0xe6c] ss:$16 sps:$4 sm:$0xff]   ;;  %v9778_v8 = vcombine.high %v13386_v41, %v13391_v43 }
 0x1cc   :  { %6916 = vmatpush1.bf16.msra.mxu0 %v11936_v9  ;;  %7764 = vmatpush1.bf16.msra.mxu1 %v11939_v10  ;;  %v12020_v9 = vld [vmem:[#allocation2 + $0xe60] ss:$16 sps:$4 sm:$0xff]   ;;  %v12023_v10 = vld [vmem:[#allocation2 + $0xe68] ss:$16 sps:$4 sm:$0xff]  }
 0x1cd   :  { %6917 = vmatprep.subr.bf16.mxu0 %v11944_v11  ;;  %7765 = vmatprep.subr.bf16.mxu1 %v11947_v12  ;;  %v12028_v11 = vld [vmem:[#allocation2 + $0xe84] ss:$16 sps:$4 sm:$0xff]   ;;  %v12031_v12 = vld [vmem:[#allocation2 + $0xe8c] ss:$16 sps:$4 sm:$0xff]  }
 0x1d0   :  { %6918 = vmatpush1.bf16.msra.mxu0 %v11942_v13  ;;  %7766 = vmatpush1.bf16.msra.mxu1 %v11945_v14  ;;  %v12026_v13 = vld [vmem:[#allocation2 + $0xe80] ss:$16 sps:$4 sm:$0xff]   ;;  %v12029_v14 = vld [vmem:[#allocation2 + $0xe88] ss:$16 sps:$4 sm:$0xff]  }
 0x1d1   :  { %6919 = vmatprep.subr.bf16.mxu0 %v11950_v15  ;;  %7767 = vmatprep.subr.bf16.mxu1 %v11953_v16  ;;  %v12034_v15 = vld [vmem:[#allocation2 + $0xea4] ss:$16 sps:$4 sm:$0xff]   ;;  %v12037_v16 = vld [vmem:[#allocation2 + $0xeac] ss:$16 sps:$4 sm:$0xff]  }
 0x1d4   :  { %6920 = vmatpush1.bf16.msra.mxu0 %v11948_v17  ;;  %7768 = vmatpush1.bf16.msra.mxu1 %v11951_v18  ;;  %v12032_v17 = vld [vmem:[#allocation2 + $0xea0] ss:$16 sps:$4 sm:$0xff]   ;;  %v12035_v18 = vld [vmem:[#allocation2 + $0xea8] ss:$16 sps:$4 sm:$0xff]  }
 0x1d5   :  { %6921 = vmatprep.subr.bf16.mxu0 %v11956_v19  ;;  %7769 = vmatprep.subr.bf16.mxu1 %v11959_v20  ;;  %v12040_v19 = vld [vmem:[#allocation2 + $0xec4] ss:$16 sps:$4 sm:$0xff]   ;;  %v12043_v20 = vld [vmem:[#allocation2 + $0xecc] ss:$16 sps:$4 sm:$0xff]  }
 0x1d8   :  { %6922 = vmatpush1.bf16.msra.mxu0 %v11954_v21  ;;  %7770 = vmatpush1.bf16.msra.mxu1 %v11957_v22  ;;  %v12038_v21 = vld [vmem:[#allocation2 + $0xec0] ss:$16 sps:$4 sm:$0xff]   ;;  %v12041_v22 = vld [vmem:[#allocation2 + $0xec8] ss:$16 sps:$4 sm:$0xff]  }
 0x1d9   :  { %6923 = vmatprep.subr.bf16.mxu0 %v11962_v23  ;;  %7771 = vmatprep.subr.bf16.mxu1 %v11965_v24  ;;  %v12046_v23 = vld [vmem:[#allocation2 + $0xee4] ss:$16 sps:$4 sm:$0xff]   ;;  %v12049_v24 = vld [vmem:[#allocation2 + $0xeec] ss:$16 sps:$4 sm:$0xff]  }
 0x1dc   :  { %6924 = vmatpush1.bf16.msra.mxu0 %v11960_v26  ;;  %7772 = vmatpush1.bf16.msra.mxu1 %v11963_v28  ;;  %v12044_v26 = vld [vmem:[#allocation2 + $0xee0] ss:$16 sps:$4 sm:$0xff]   ;;  %v12047_v28 = vld [vmem:[#allocation2 + $0xee8] ss:$16 sps:$4 sm:$0xff]  }
 0x1dd   :  { %6925 = vmatprep.subr.bf16.mxu0 %v11968_v29  ;;  %7773 = vmatprep.subr.bf16.mxu1 %v11971_v30  ;;  %v12052_v29 = vld [vmem:[#allocation2 + $0xf04] ss:$16 sps:$4 sm:$0xff]   ;;  %v12055_v30 = vld [vmem:[#allocation2 + $0xf0c] ss:$16 sps:$4 sm:$0xff]  }
 0x1e0   :  { %6926 = vmatpush1.bf16.msra.mxu0 %v11966_v31  ;;  %7774 = vmatpush1.bf16.msra.mxu1 %v11969_v32  ;;  %v12050_v31 = vld [vmem:[#allocation2 + $0xf00] ss:$16 sps:$4 sm:$0xff]   ;;  %v12053_v32 = vld [vmem:[#allocation2 + $0xf08] ss:$16 sps:$4 sm:$0xff]  }
 0x1e1   :  { %6927 = vmatprep.subr.bf16.mxu0 %v11974_v25  ;;  %7775 = vmatprep.subr.bf16.mxu1 %v11977_v27  ;;  %v12058_v25 = vld [vmem:[#allocation2 + $0xf24] ss:$16 sps:$4 sm:$0xff]   ;;  %v12061_v27 = vld [vmem:[#allocation2 + $0xf2c] ss:$16 sps:$4 sm:$0xff]  }
 0x1e4   :  { %6928 = vmatpush1.bf16.msra.mxu0 %v11972_v34  ;;  %7776 = vmatpush1.bf16.msra.mxu1 %v11975_v36  ;;  %v12056_v34 = vld [vmem:[#allocation2 + $0xf20] ss:$16 sps:$4 sm:$0xff]   ;;  %v12059_v36 = vld [vmem:[#allocation2 + $0xf28] ss:$16 sps:$4 sm:$0xff]  }
 0x1e5   :  { %6929 = vmatprep.subr.bf16.mxu0 %v11980_v37  ;;  %7777 = vmatprep.subr.bf16.mxu1 %v11983_v38  ;;  %v12064_v37 = vld [vmem:[#allocation2 + $0xf44] ss:$16 sps:$4 sm:$0xff]   ;;  %v12067_v38 = vld [vmem:[#allocation2 + $0xf4c] ss:$16 sps:$4 sm:$0xff]  }
 0x1e8   :  { %6930 = vmatpush1.bf16.msra.mxu0 %v11978_v39  ;;  %7778 = vmatpush1.bf16.msra.mxu1 %v11981_v40  ;;  %v12062_v39 = vld [vmem:[#allocation2 + $0xf40] ss:$16 sps:$4 sm:$0xff]   ;;  %v12065_v40 = vld [vmem:[#allocation2 + $0xf48] ss:$16 sps:$4 sm:$0xff]  }
 0x1e9   :  { %6931 = vmatprep.subr.bf16.mxu0 %v11986_v33  ;;  %7779 = vmatprep.subr.bf16.mxu1 %v11989_v35  ;;  %v12070_v33 = vld [vmem:[#allocation2 + $0xf64] ss:$16 sps:$4 sm:$0xff]   ;;  %v12073_v35 = vld [vmem:[#allocation2 + $0xf6c] ss:$16 sps:$4 sm:$0xff]  }
 0x1ec   :  { %6932 = vmatpush1.bf16.msra.mxu0 %v11984_v42  ;;  %7780 = vmatpush1.bf16.msra.mxu1 %v11987_v44  ;;  %v12068_v42 = vld [vmem:[#allocation2 + $0xf60] ss:$16 sps:$4 sm:$0xff]   ;;  %v12071_v44 = vld [vmem:[#allocation2 + $0xf68] ss:$16 sps:$4 sm:$0xff]  }
 0x1ed   :  { %6933 = vmatprep.subr.bf16.mxu0 %v11992_v45  ;;  %7781 = vmatprep.subr.bf16.mxu1 %v11995_v46  ;;  %v12076_v45 = vld [vmem:[#allocation2 + $0xf84] ss:$16 sps:$4 sm:$0xff]   ;;  %v12079_v46 = vld [vmem:[#allocation2 + $0xf8c] ss:$16 sps:$4 sm:$0xff]  }
 0x1f0   :  { %6934 = vmatpush1.bf16.msra.mxu0 %v11990_v47  ;;  %7782 = vmatpush1.bf16.msra.mxu1 %v11993_v48  ;;  %v12074_v47 = vld [vmem:[#allocation2 + $0xf80] ss:$16 sps:$4 sm:$0xff]   ;;  %v12077_v48 = vld [vmem:[#allocation2 + $0xf88] ss:$16 sps:$4 sm:$0xff]  }
 0x1f1   :  { %6935 = vmatprep.subr.bf16.mxu0 %v11998_v49  ;;  %7783 = vmatprep.subr.bf16.mxu1 %v12001_v50  ;;  %v12082_v49 = vld [vmem:[#allocation2 + $0xfa4] ss:$16 sps:$4 sm:$0xff]   ;;  %v12085_v50 = vld [vmem:[#allocation2 + $0xfac] ss:$16 sps:$4 sm:$0xff]  }
 0x1f4   :  { %6936 = vmatpush1.bf16.msra.mxu0 %v11996_v51  ;;  %7784 = vmatpush1.bf16.msra.mxu1 %v11999_v52  ;;  %v12080_v51 = vld [vmem:[#allocation2 + $0xfa0] ss:$16 sps:$4 sm:$0xff]   ;;  %v12083_v52 = vld [vmem:[#allocation2 + $0xfa8] ss:$16 sps:$4 sm:$0xff]  }
 0x1f5   :  { %6958 = vmatprep.subr.bf16.mxu0 %v12004_v53  ;;  %7806 = vmatprep.subr.bf16.mxu1 %v12007_v54  ;;  %v12088_v53 = vld [vmem:[#allocation2 + $0xfc4] ss:$16 sps:$4 sm:$0xff]   ;;  %v12091_v54 = vld [vmem:[#allocation2 + $0xfcc] ss:$16 sps:$4 sm:$0xff]  }
 0x1f7   :  { %6938 = vmatmul.mubr.bf16.vlgmr.msra.gmra.mrb[0].mxu0 %v9775_v57  ;;  %7786 = vmatmul.mubr.bf16.vlgmr.msra.gmra.mrb[0].mxu1 %v9775_v57  ;;  %v12094_v57 = vld [vmem:[#allocation2 + $0xfe4] ss:$16 sps:$4 sm:$0xff]  }
 0x1f8   :  { %6959 = vmatpush1.bf16.msra.mxu0 %v12002_v58  ;;  %7807 = vmatpush1.bf16.msra.mxu1 %v12005_v59  ;;  %v12097_v58 = vld [vmem:[#allocation2 + $0xfec] ss:$16 sps:$4 sm:$0xff]   ;;  %v12092_v59 = vld [vmem:[#allocation2 + $0xfe0] ss:$16 sps:$4 sm:$0xff]  }
 0x1f9   :  { %6960 = vmatprep.subr.bf16.mxu0 %v12010_v60  ;;  %7808 = vmatprep.subr.bf16.mxu1 %v12013_v61  ;;  %v12095_v60 = vld [vmem:[#allocation2 + $0xfe8] ss:$16 sps:$4 sm:$0xff]   ;;  %v12100_v61 = vld [vmem:[#allocation2 + $0x1004] ss:$16 sps:$4 sm:$0xff]  }
 0x1fa   :  { %6947 = vmatprep.mubr.bf16.mxu0 %v9808_v0  ;;  %7795 = vmatprep.mubr.bf16.mxu1 %v9808_v0  ;;  %v114_v0 = vld [vmem:[%s13597_s0 + $0x1b8] sm:$0xff] }
 0x1fc   :  { %6961 = vmatpush1.bf16.msra.mxu0 %v12008_v62  ;;  %7809 = vmatpush1.bf16.msra.mxu1 %v12011_v63  ;;  %v12103_v62 = vld [vmem:[#allocation2 + $0x100c] ss:$16 sps:$4 sm:$0xff]  }
 0x1fd   :  { %6962 = vmatprep.subr.bf16.mxu0 %v12016_v1  ;;  %7810 = vmatprep.subr.bf16.mxu1 %v12019_v2  ;;  %v98_v63 = vld [vmem:[%s13597_s0 + $0x138] sm:$0xff]  ;;  %v9777_v1 = vcombine.low %v13386_v41, %v13391_v43  ;;  %v12098_v2 = vld [vmem:[#allocation2 + $0x1000] ss:$16 sps:$4 sm:$0xff]  }
 0x1fe   :  { %v13406_v41 = vld [vmem:[%s13597_s0 + $0x40] sm:$0xff] }
 0x1ff   :  { %6948 = vmatmul.mubr.bf16.gmra.mrb[4].mxu0 %v9807_v3  ;;  %7796 = vmatmul.mubr.bf16.gmra.mrb[4].mxu1 %v9807_v3  ;;  %v12101_v3 = vld [vmem:[#allocation2 + $0x1008] ss:$16 sps:$4 sm:$0xff]   ;;  %v13411_v43 = vld [vmem:[%s13597_s0 + $0xc0] sm:$0xff] }
 0x200   :  { %6963 = vmatpush1.bf16.msra.mxu0 %v12014_v4  ;;  %7811 = vmatpush1.bf16.msra.mxu1 %v12017_v5  ;;  %v12106_v4 = vld [vmem:[#allocation2 + $0x1024] ss:$16 sps:$4 sm:$0xff]   ;;  %v12109_v5 = vld [vmem:[#allocation2 + $0x102c] ss:$16 sps:$4 sm:$0xff]  }
 0x201   :  { %6964 = vmatprep.subr.bf16.mxu0 %v12022_v6  ;;  %7812 = vmatprep.subr.bf16.mxu1 %v12025_v7  ;;  %v12104_v6 = vld [vmem:[#allocation2 + $0x1020] ss:$16 sps:$4 sm:$0xff]   ;;  %v12107_v7 = vld [vmem:[#allocation2 + $0x1028] ss:$16 sps:$4 sm:$0xff]  }
 0x202   :  { %6990 = vmatprep.mubr.bf16.mxu0 %v9778_v8  ;;  %7838 = vmatprep.mubr.bf16.mxu1 %v9778_v8  ;;  %v9810_v8 = vcombine.high %v98_v63, %v114_v0 }
 0x204   :  { %6965 = vmatpush1.bf16.msra.mxu0 %v12020_v9  ;;  %7813 = vmatpush1.bf16.msra.mxu1 %v12023_v10  ;;  %v12112_v9 = vld [vmem:[#allocation2 + $0x1044] ss:$16 sps:$4 sm:$0xff]   ;;  %v12115_v10 = vld [vmem:[#allocation2 + $0x104c] ss:$16 sps:$4 sm:$0xff]  }
 0x205   :  { %6966 = vmatprep.subr.bf16.mxu0 %v12028_v11  ;;  %7814 = vmatprep.subr.bf16.mxu1 %v12031_v12  ;;  %v9809_v11 = vcombine.low %v98_v63, %v114_v0  ;;  %v12110_v12 = vld [vmem:[#allocation2 + $0x1040] ss:$16 sps:$4 sm:$0xff]   ;;  %v12185_v0 = vld [vmem:[#allocation2 + $0x11c8] ss:$16 sps:$4 sm:$0xff]  }
 0x206   :  { %v12182_v63 = vld [vmem:[#allocation2 + $0x11c0] ss:$16 sps:$4 sm:$0xff]  }
 0x208   :  { %6967 = vmatpush1.bf16.msra.mxu0 %v12026_v13  ;;  %7815 = vmatpush1.bf16.msra.mxu1 %v12029_v14  ;;  %v12113_v13 = vld [vmem:[#allocation2 + $0x1048] ss:$16 sps:$4 sm:$0xff]   ;;  %v12118_v14 = vld [vmem:[#allocation2 + $0x1064] ss:$16 sps:$4 sm:$0xff]  }
 0x209   :  { %6968 = vmatprep.subr.bf16.mxu0 %v12034_v15  ;;  %7816 = vmatprep.subr.bf16.mxu1 %v12037_v16  ;;  %v12121_v15 = vld [vmem:[#allocation2 + $0x106c] ss:$16 sps:$4 sm:$0xff]   ;;  %v9780_v16 = vcombine.high %v13406_v41, %v13411_v43 }
 0x20c   :  { %6969 = vmatpush1.bf16.msra.mxu0 %v12032_v17  ;;  %7817 = vmatpush1.bf16.msra.mxu1 %v12035_v18  ;;  %v12116_v17 = vld [vmem:[#allocation2 + $0x1060] ss:$16 sps:$4 sm:$0xff]   ;;  %v12119_v18 = vld [vmem:[#allocation2 + $0x1068] ss:$16 sps:$4 sm:$0xff]  }
 0x20d   :  { %6970 = vmatprep.subr.bf16.mxu0 %v12040_v19  ;;  %7818 = vmatprep.subr.bf16.mxu1 %v12043_v20  ;;  %v12124_v19 = vld [vmem:[#allocation2 + $0x1084] ss:$16 sps:$4 sm:$0xff]   ;;  %v12127_v20 = vld [vmem:[#allocation2 + $0x108c] ss:$16 sps:$4 sm:$0xff]  }
 0x210   :  { %6971 = vmatpush1.bf16.msra.mxu0 %v12038_v21  ;;  %7819 = vmatpush1.bf16.msra.mxu1 %v12041_v22  ;;  %v12122_v21 = vld [vmem:[#allocation2 + $0x1080] ss:$16 sps:$4 sm:$0xff]   ;;  %v12125_v22 = vld [vmem:[#allocation2 + $0x1088] ss:$16 sps:$4 sm:$0xff]  }
 0x211   :  { %6972 = vmatprep.subr.bf16.mxu0 %v12046_v23  ;;  %7820 = vmatprep.subr.bf16.mxu1 %v12049_v24  ;;  %v12130_v23 = vld [vmem:[#allocation2 + $0x10a4] ss:$16 sps:$4 sm:$0xff]   ;;  %v12133_v24 = vld [vmem:[#allocation2 + $0x10ac] ss:$16 sps:$4 sm:$0xff]  }
 0x214   :  { %6973 = vmatpush1.bf16.msra.mxu0 %v12044_v26  ;;  %7821 = vmatpush1.bf16.msra.mxu1 %v12047_v28  ;;  %v12128_v26 = vld [vmem:[#allocation2 + $0x10a0] ss:$16 sps:$4 sm:$0xff]   ;;  %v12131_v28 = vld [vmem:[#allocation2 + $0x10a8] ss:$16 sps:$4 sm:$0xff]  }
 0x215   :  { %6974 = vmatprep.subr.bf16.mxu0 %v12052_v29  ;;  %7822 = vmatprep.subr.bf16.mxu1 %v12055_v30  ;;  %v12136_v29 = vld [vmem:[#allocation2 + $0x10c4] ss:$16 sps:$4 sm:$0xff]   ;;  %v12139_v30 = vld [vmem:[#allocation2 + $0x10cc] ss:$16 sps:$4 sm:$0xff]  }
 0x218   :  { %6975 = vmatpush1.bf16.msra.mxu0 %v12050_v31  ;;  %7823 = vmatpush1.bf16.msra.mxu1 %v12053_v32  ;;  %v12134_v31 = vld [vmem:[#allocation2 + $0x10c0] ss:$16 sps:$4 sm:$0xff]   ;;  %v12137_v32 = vld [vmem:[#allocation2 + $0x10c8] ss:$16 sps:$4 sm:$0xff]  }
 0x219   :  { %6976 = vmatprep.subr.bf16.mxu0 %v12058_v25  ;;  %7824 = vmatprep.subr.bf16.mxu1 %v12061_v27  ;;  %v12142_v25 = vld [vmem:[#allocation2 + $0x10e4] ss:$16 sps:$4 sm:$0xff]   ;;  %v12145_v27 = vld [vmem:[#allocation2 + $0x10ec] ss:$16 sps:$4 sm:$0xff]  }
 0x21c   :  { %6977 = vmatpush1.bf16.msra.mxu0 %v12056_v34  ;;  %7825 = vmatpush1.bf16.msra.mxu1 %v12059_v36  ;;  %v12140_v34 = vld [vmem:[#allocation2 + $0x10e0] ss:$16 sps:$4 sm:$0xff]   ;;  %v12143_v36 = vld [vmem:[#allocation2 + $0x10e8] ss:$16 sps:$4 sm:$0xff]  }
 0x21d   :  { %6978 = vmatprep.subr.bf16.mxu0 %v12064_v37  ;;  %7826 = vmatprep.subr.bf16.mxu1 %v12067_v38  ;;  %v12148_v37 = vld [vmem:[#allocation2 + $0x1104] ss:$16 sps:$4 sm:$0xff]   ;;  %v12151_v38 = vld [vmem:[#allocation2 + $0x110c] ss:$16 sps:$4 sm:$0xff]  }
 0x220   :  { %6979 = vmatpush1.bf16.msra.mxu0 %v12062_v39  ;;  %7827 = vmatpush1.bf16.msra.mxu1 %v12065_v40  ;;  %v12146_v39 = vld [vmem:[#allocation2 + $0x1100] ss:$16 sps:$4 sm:$0xff]   ;;  %v12149_v40 = vld [vmem:[#allocation2 + $0x1108] ss:$16 sps:$4 sm:$0xff]  }
 0x221   :  { %6980 = vmatprep.subr.bf16.mxu0 %v12070_v33  ;;  %7828 = vmatprep.subr.bf16.mxu1 %v12073_v35  ;;  %v12154_v33 = vld [vmem:[#allocation2 + $0x1124] ss:$16 sps:$4 sm:$0xff]   ;;  %v12157_v35 = vld [vmem:[#allocation2 + $0x112c] ss:$16 sps:$4 sm:$0xff]  }
 0x224   :  { %6981 = vmatpush1.bf16.msra.mxu0 %v12068_v42  ;;  %7829 = vmatpush1.bf16.msra.mxu1 %v12071_v44  ;;  %v12152_v42 = vld [vmem:[#allocation2 + $0x1120] ss:$16 sps:$4 sm:$0xff]   ;;  %v12155_v44 = vld [vmem:[#allocation2 + $0x1128] ss:$16 sps:$4 sm:$0xff]  }
 0x225   :  { %6982 = vmatprep.subr.bf16.mxu0 %v12076_v45  ;;  %7830 = vmatprep.subr.bf16.mxu1 %v12079_v46  ;;  %v12160_v45 = vld [vmem:[#allocation2 + $0x1144] ss:$16 sps:$4 sm:$0xff]   ;;  %v12163_v46 = vld [vmem:[#allocation2 + $0x114c] ss:$16 sps:$4 sm:$0xff]  }
 0x228   :  { %6983 = vmatpush1.bf16.msra.mxu0 %v12074_v47  ;;  %7831 = vmatpush1.bf16.msra.mxu1 %v12077_v48  ;;  %v12158_v47 = vld [vmem:[#allocation2 + $0x1140] ss:$16 sps:$4 sm:$0xff]   ;;  %v12161_v48 = vld [vmem:[#allocation2 + $0x1148] ss:$16 sps:$4 sm:$0xff]  }
 0x229   :  { %6984 = vmatprep.subr.bf16.mxu0 %v12082_v49  ;;  %7832 = vmatprep.subr.bf16.mxu1 %v12085_v50  ;;  %v12166_v49 = vld [vmem:[#allocation2 + $0x1164] ss:$16 sps:$4 sm:$0xff]   ;;  %v12169_v50 = vld [vmem:[#allocation2 + $0x116c] ss:$16 sps:$4 sm:$0xff]  }
 0x22c   :  { %6985 = vmatpush1.bf16.msra.mxu0 %v12080_v51  ;;  %7833 = vmatpush1.bf16.msra.mxu1 %v12083_v52  ;;  %v12164_v51 = vld [vmem:[#allocation2 + $0x1160] ss:$16 sps:$4 sm:$0xff]   ;;  %v12167_v52 = vld [vmem:[#allocation2 + $0x1168] ss:$16 sps:$4 sm:$0xff]  }
 0x22d   :  { %6986 = vmatprep.subr.bf16.mxu0 %v12088_v53  ;;  %7834 = vmatprep.subr.bf16.mxu1 %v12091_v54  ;;  %v12172_v53 = vld [vmem:[#allocation2 + $0x1184] ss:$16 sps:$4 sm:$0xff]   ;;  %v12175_v54 = vld [vmem:[#allocation2 + $0x118c] ss:$16 sps:$4 sm:$0xff]  }
 0x230   :  { %6987 = vmatpush1.bf16.msra.mxu0 %v12086_v55  ;;  %7835 = vmatpush1.bf16.msra.mxu1 %v12089_v56  ;;  %v12170_v55 = vld [vmem:[#allocation2 + $0x1180] ss:$16 sps:$4 sm:$0xff]   ;;  %v12173_v56 = vld [vmem:[#allocation2 + $0x1188] ss:$16 sps:$4 sm:$0xff]  }
 0x231   :  { %6988 = vmatprep.subr.bf16.mxu0 %v12094_v57  ;;  %7836 = vmatprep.subr.bf16.mxu1 %v12097_v58  ;;  %v12178_v57 = vld [vmem:[#allocation2 + $0x11a4] ss:$16 sps:$4 sm:$0xff]   ;;  %v12181_v58 = vld [vmem:[#allocation2 + $0x11ac] ss:$16 sps:$4 sm:$0xff]  }
 0x234   :  { %6989 = vmatpush1.bf16.msra.mxu0 %v12092_v59  ;;  %7837 = vmatpush1.bf16.msra.mxu1 %v12095_v60  ;;  %v12176_v59 = vld [vmem:[#allocation2 + $0x11a0] ss:$16 sps:$4 sm:$0xff]   ;;  %v12179_v60 = vld [vmem:[#allocation2 + $0x11a8] ss:$16 sps:$4 sm:$0xff]  }
 0x235   :  { %7011 = vmatprep.subr.bf16.mxu0 %v12100_v61  ;;  %7859 = vmatprep.subr.bf16.mxu1 %v12103_v62  ;;  %v12184_v61 = vld [vmem:[#allocation2 + $0x11c4] ss:$16 sps:$4 sm:$0xff]   ;;  %v12187_v62 = vld [vmem:[#allocation2 + $0x11cc] ss:$16 sps:$4 sm:$0xff]  }
 0x237   :  { %6991 = vmatmul.mubr.bf16.vlgmr.msra.gmra.mrb[0].mxu0 %v9777_v1  ;;  %7839 = vmatmul.mubr.bf16.vlgmr.msra.gmra.mrb[0].mxu1 %v9777_v1  ;;  %v12190_v1 = vld [vmem:[#allocation2 + $0x11e4] ss:$16 sps:$4 sm:$0xff]  }
 0x238   :  { %7012 = vmatpush1.bf16.msra.mxu0 %v12098_v2  ;;  %7860 = vmatpush1.bf16.msra.mxu1 %v12101_v3  ;;  %v12193_v2 = vld [vmem:[#allocation2 + $0x11ec] ss:$16 sps:$4 sm:$0xff]   ;;  %v12188_v3 = vld [vmem:[#allocation2 + $0x11e0] ss:$16 sps:$4 sm:$0xff]  }
 0x239   :  { %7013 = vmatprep.subr.bf16.mxu0 %v12106_v4  ;;  %7861 = vmatprep.subr.bf16.mxu1 %v12109_v5  ;;  %v12191_v4 = vld [vmem:[#allocation2 + $0x11e8] ss:$16 sps:$4 sm:$0xff]   ;;  %v12196_v5 = vld [vmem:[#allocation2 + $0x1204] ss:$16 sps:$4 sm:$0xff]  }
 0x23a   :  { %7000 = vmatprep.mubr.bf16.mxu0 %v9810_v8  ;;  %7848 = vmatprep.mubr.bf16.mxu1 %v9810_v8  ;;  %v115_v8 = vld [vmem:[%s13597_s0 + $0x1c0] sm:$0xff] }
 0x23c   :  { %7014 = vmatpush1.bf16.msra.mxu0 %v12104_v6  ;;  %7862 = vmatpush1.bf16.msra.mxu1 %v12107_v7  ;;  %v12199_v6 = vld [vmem:[#allocation2 + $0x120c] ss:$16 sps:$4 sm:$0xff]   ;;  %v99_v7 = vld [vmem:[%s13597_s0 + $0x140] sm:$0xff] }
 0x23d   :  { %7015 = vmatprep.subr.bf16.mxu0 %v12112_v9  ;;  %7863 = vmatprep.subr.bf16.mxu1 %v12115_v10  ;;  %v9779_v9 = vcombine.low %v13406_v41, %v13411_v43  ;;  %v12194_v10 = vld [vmem:[#allocation2 + $0x1200] ss:$16 sps:$4 sm:$0xff]   ;;  %v13426_v41 = vld [vmem:[%s13597_s0 + $0x48] sm:$0xff] }
 0x23e   :  { %v13431_v43 = vld [vmem:[%s13597_s0 + $0xc8] sm:$0xff] }
 0x23f   :  { %7001 = vmatmul.mubr.bf16.gmra.mrb[4].mxu0 %v9809_v11  ;;  %7849 = vmatmul.mubr.bf16.gmra.mrb[4].mxu1 %v9809_v11  ;;  %v12197_v11 = vld [vmem:[#allocation2 + $0x1208] ss:$16 sps:$4 sm:$0xff]  }
 0x240   :  { %7016 = vmatpush1.bf16.msra.mxu0 %v12110_v12  ;;  %7864 = vmatpush1.bf16.msra.mxu1 %v12113_v13  ;;  %v12202_v12 = vld [vmem:[#allocation2 + $0x1224] ss:$16 sps:$4 sm:$0xff]   ;;  %v12205_v13 = vld [vmem:[#allocation2 + $0x122c] ss:$16 sps:$4 sm:$0xff]  }
 0x241   :  { %7017 = vmatprep.subr.bf16.mxu0 %v12118_v14  ;;  %7865 = vmatprep.subr.bf16.mxu1 %v12121_v15  ;;  %v12200_v14 = vld [vmem:[#allocation2 + $0x1220] ss:$16 sps:$4 sm:$0xff]   ;;  %v12203_v15 = vld [vmem:[#allocation2 + $0x1228] ss:$16 sps:$4 sm:$0xff]  }
 0x242   :  { %7043 = vmatprep.mubr.bf16.mxu0 %v9780_v16  ;;  %7891 = vmatprep.mubr.bf16.mxu1 %v9780_v16  ;;  %v9812_v16 = vcombine.high %v99_v7, %v115_v8 }
 0x244   :  { %7018 = vmatpush1.bf16.msra.mxu0 %v12116_v17  ;;  %7866 = vmatpush1.bf16.msra.mxu1 %v12119_v18  ;;  %v12208_v17 = vld [vmem:[#allocation2 + $0x1244] ss:$16 sps:$4 sm:$0xff]   ;;  %v12211_v18 = vld [vmem:[#allocation2 + $0x124c] ss:$16 sps:$4 sm:$0xff]  }
 0x245   :  { %7019 = vmatprep.subr.bf16.mxu0 %v12124_v19  ;;  %7867 = vmatprep.subr.bf16.mxu1 %v12127_v20  ;;  %v9811_v19 = vcombine.low %v99_v7, %v115_v8  ;;  %v12206_v20 = vld [vmem:[#allocation2 + $0x1240] ss:$16 sps:$4 sm:$0xff]   ;;  %v12281_v8 = vld [vmem:[#allocation2 + $0x13c8] ss:$16 sps:$4 sm:$0xff]  }
 0x246   :  { %v12278_v7 = vld [vmem:[#allocation2 + $0x13c0] ss:$16 sps:$4 sm:$0xff]  }
 0x248   :  { %7020 = vmatpush1.bf16.msra.mxu0 %v12122_v21  ;;  %7868 = vmatpush1.bf16.msra.mxu1 %v12125_v22  ;;  %v12209_v21 = vld [vmem:[#allocation2 + $0x1248] ss:$16 sps:$4 sm:$0xff]   ;;  %v12214_v22 = vld [vmem:[#allocation2 + $0x1264] ss:$16 sps:$4 sm:$0xff]  }
 0x249   :  { %7021 = vmatprep.subr.bf16.mxu0 %v12130_v23  ;;  %7869 = vmatprep.subr.bf16.mxu1 %v12133_v24  ;;  %v12217_v23 = vld [vmem:[#allocation2 + $0x126c] ss:$16 sps:$4 sm:$0xff]   ;;  %v9782_v24 = vcombine.high %v13426_v41, %v13431_v43 }
 0x24c   :  { %7022 = vmatpush1.bf16.msra.mxu0 %v12128_v26  ;;  %7870 = vmatpush1.bf16.msra.mxu1 %v12131_v28  ;;  %v12212_v26 = vld [vmem:[#allocation2 + $0x1260] ss:$16 sps:$4 sm:$0xff]   ;;  %v12215_v28 = vld [vmem:[#allocation2 + $0x1268] ss:$16 sps:$4 sm:$0xff]  }
 0x24d   :  { %7023 = vmatprep.subr.bf16.mxu0 %v12136_v29  ;;  %7871 = vmatprep.subr.bf16.mxu1 %v12139_v30  ;;  %v12220_v29 = vld [vmem:[#allocation2 + $0x1284] ss:$16 sps:$4 sm:$0xff]   ;;  %v12223_v30 = vld [vmem:[#allocation2 + $0x128c] ss:$16 sps:$4 sm:$0xff]  }
 0x250   :  { %7024 = vmatpush1.bf16.msra.mxu0 %v12134_v31  ;;  %7872 = vmatpush1.bf16.msra.mxu1 %v12137_v32  ;;  %v12218_v31 = vld [vmem:[#allocation2 + $0x1280] ss:$16 sps:$4 sm:$0xff]   ;;  %v12221_v32 = vld [vmem:[#allocation2 + $0x1288] ss:$16 sps:$4 sm:$0xff]  }
 0x251   :  { %7025 = vmatprep.subr.bf16.mxu0 %v12142_v25  ;;  %7873 = vmatprep.subr.bf16.mxu1 %v12145_v27  ;;  %v12226_v25 = vld [vmem:[#allocation2 + $0x12a4] ss:$16 sps:$4 sm:$0xff]   ;;  %v12229_v27 = vld [vmem:[#allocation2 + $0x12ac] ss:$16 sps:$4 sm:$0xff]  }
 0x254   :  { %7026 = vmatpush1.bf16.msra.mxu0 %v12140_v34  ;;  %7874 = vmatpush1.bf16.msra.mxu1 %v12143_v36  ;;  %v12224_v34 = vld [vmem:[#allocation2 + $0x12a0] ss:$16 sps:$4 sm:$0xff]   ;;  %v12227_v36 = vld [vmem:[#allocation2 + $0x12a8] ss:$16 sps:$4 sm:$0xff]  }
 0x255   :  { %7027 = vmatprep.subr.bf16.mxu0 %v12148_v37  ;;  %7875 = vmatprep.subr.bf16.mxu1 %v12151_v38  ;;  %v12232_v37 = vld [vmem:[#allocation2 + $0x12c4] ss:$16 sps:$4 sm:$0xff]   ;;  %v12235_v38 = vld [vmem:[#allocation2 + $0x12cc] ss:$16 sps:$4 sm:$0xff]  }
 0x258   :  { %7028 = vmatpush1.bf16.msra.mxu0 %v12146_v39  ;;  %7876 = vmatpush1.bf16.msra.mxu1 %v12149_v40  ;;  %v12230_v39 = vld [vmem:[#allocation2 + $0x12c0] ss:$16 sps:$4 sm:$0xff]   ;;  %v12233_v40 = vld [vmem:[#allocation2 + $0x12c8] ss:$16 sps:$4 sm:$0xff]  }
 0x259   :  { %7029 = vmatprep.subr.bf16.mxu0 %v12154_v33  ;;  %7877 = vmatprep.subr.bf16.mxu1 %v12157_v35  ;;  %v12238_v33 = vld [vmem:[#allocation2 + $0x12e4] ss:$16 sps:$4 sm:$0xff]   ;;  %v12241_v35 = vld [vmem:[#allocation2 + $0x12ec] ss:$16 sps:$4 sm:$0xff]  }
 0x25c   :  { %7030 = vmatpush1.bf16.msra.mxu0 %v12152_v42  ;;  %7878 = vmatpush1.bf16.msra.mxu1 %v12155_v44  ;;  %v12236_v42 = vld [vmem:[#allocation2 + $0x12e0] ss:$16 sps:$4 sm:$0xff]   ;;  %v12239_v44 = vld [vmem:[#allocation2 + $0x12e8] ss:$16 sps:$4 sm:$0xff]  }
 0x25d   :  { %7031 = vmatprep.subr.bf16.mxu0 %v12160_v45  ;;  %7879 = vmatprep.subr.bf16.mxu1 %v12163_v46  ;;  %v12244_v45 = vld [vmem:[#allocation2 + $0x1304] ss:$16 sps:$4 sm:$0xff]   ;;  %v12247_v46 = vld [vmem:[#allocation2 + $0x130c] ss:$16 sps:$4 sm:$0xff]  }
 0x260   :  { %7032 = vmatpush1.bf16.msra.mxu0 %v12158_v47  ;;  %7880 = vmatpush1.bf16.msra.mxu1 %v12161_v48  ;;  %v12242_v47 = vld [vmem:[#allocation2 + $0x1300] ss:$16 sps:$4 sm:$0xff]   ;;  %v12245_v48 = vld [vmem:[#allocation2 + $0x1308] ss:$16 sps:$4 sm:$0xff]  }
 0x261   :  { %7033 = vmatprep.subr.bf16.mxu0 %v12166_v49  ;;  %7881 = vmatprep.subr.bf16.mxu1 %v12169_v50  ;;  %v12250_v49 = vld [vmem:[#allocation2 + $0x1324] ss:$16 sps:$4 sm:$0xff]   ;;  %v12253_v50 = vld [vmem:[#allocation2 + $0x132c] ss:$16 sps:$4 sm:$0xff]  }
 0x264   :  { %7034 = vmatpush1.bf16.msra.mxu0 %v12164_v51  ;;  %7882 = vmatpush1.bf16.msra.mxu1 %v12167_v52  ;;  %v12248_v51 = vld [vmem:[#allocation2 + $0x1320] ss:$16 sps:$4 sm:$0xff]   ;;  %v12251_v52 = vld [vmem:[#allocation2 + $0x1328] ss:$16 sps:$4 sm:$0xff]  }
 0x265   :  { %7035 = vmatprep.subr.bf16.mxu0 %v12172_v53  ;;  %7883 = vmatprep.subr.bf16.mxu1 %v12175_v54  ;;  %v12256_v53 = vld [vmem:[#allocation2 + $0x1344] ss:$16 sps:$4 sm:$0xff]   ;;  %v12259_v54 = vld [vmem:[#allocation2 + $0x134c] ss:$16 sps:$4 sm:$0xff]  }
 0x268   :  { %7036 = vmatpush1.bf16.msra.mxu0 %v12170_v55  ;;  %7884 = vmatpush1.bf16.msra.mxu1 %v12173_v56  ;;  %v12254_v55 = vld [vmem:[#allocation2 + $0x1340] ss:$16 sps:$4 sm:$0xff]   ;;  %v12257_v56 = vld [vmem:[#allocation2 + $0x1348] ss:$16 sps:$4 sm:$0xff]  }
 0x269   :  { %7037 = vmatprep.subr.bf16.mxu0 %v12178_v57  ;;  %7885 = vmatprep.subr.bf16.mxu1 %v12181_v58  ;;  %v12262_v57 = vld [vmem:[#allocation2 + $0x1364] ss:$16 sps:$4 sm:$0xff]   ;;  %v12265_v58 = vld [vmem:[#allocation2 + $0x136c] ss:$16 sps:$4 sm:$0xff]  }
 0x26c   :  { %7038 = vmatpush1.bf16.msra.mxu0 %v12176_v59  ;;  %7886 = vmatpush1.bf16.msra.mxu1 %v12179_v60  ;;  %v12260_v59 = vld [vmem:[#allocation2 + $0x1360] ss:$16 sps:$4 sm:$0xff]   ;;  %v12263_v60 = vld [vmem:[#allocation2 + $0x1368] ss:$16 sps:$4 sm:$0xff]  }
 0x26d   :  { %7039 = vmatprep.subr.bf16.mxu0 %v12184_v61  ;;  %7887 = vmatprep.subr.bf16.mxu1 %v12187_v62  ;;  %v12268_v61 = vld [vmem:[#allocation2 + $0x1384] ss:$16 sps:$4 sm:$0xff]   ;;  %v12271_v62 = vld [vmem:[#allocation2 + $0x138c] ss:$16 sps:$4 sm:$0xff]  }
 0x270   :  { %7040 = vmatpush1.bf16.msra.mxu0 %v12182_v63  ;;  %7888 = vmatpush1.bf16.msra.mxu1 %v12185_v0  ;;  %v12266_v63 = vld [vmem:[#allocation2 + $0x1380] ss:$16 sps:$4 sm:$0xff]   ;;  %v12269_v0 = vld [vmem:[#allocation2 + $0x1388] ss:$16 sps:$4 sm:$0xff]  }
 0x271   :  { %7041 = vmatprep.subr.bf16.mxu0 %v12190_v1  ;;  %7889 = vmatprep.subr.bf16.mxu1 %v12193_v2  ;;  %v12274_v1 = vld [vmem:[#allocation2 + $0x13a4] ss:$16 sps:$4 sm:$0xff]   ;;  %v12277_v2 = vld [vmem:[#allocation2 + $0x13ac] ss:$16 sps:$4 sm:$0xff]  }
 0x274   :  { %7042 = vmatpush1.bf16.msra.mxu0 %v12188_v3  ;;  %7890 = vmatpush1.bf16.msra.mxu1 %v12191_v4  ;;  %v12272_v3 = vld [vmem:[#allocation2 + $0x13a0] ss:$16 sps:$4 sm:$0xff]   ;;  %v12275_v4 = vld [vmem:[#allocation2 + $0x13a8] ss:$16 sps:$4 sm:$0xff]  }
 0x275   :  { %7064 = vmatprep.subr.bf16.mxu0 %v12196_v5  ;;  %7912 = vmatprep.subr.bf16.mxu1 %v12199_v6  ;;  %v12280_v5 = vld [vmem:[#allocation2 + $0x13c4] ss:$16 sps:$4 sm:$0xff]   ;;  %v12283_v6 = vld [vmem:[#allocation2 + $0x13cc] ss:$16 sps:$4 sm:$0xff]  }
 0x277   :  { %7044 = vmatmul.mubr.bf16.vlgmr.msra.gmra.mrb[0].mxu0 %v9779_v9  ;;  %7892 = vmatmul.mubr.bf16.vlgmr.msra.gmra.mrb[0].mxu1 %v9779_v9  ;;  %v12286_v9 = vld [vmem:[#allocation2 + $0x13e4] ss:$16 sps:$4 sm:$0xff]  }
 0x278   :  { %7065 = vmatpush1.bf16.msra.mxu0 %v12194_v10  ;;  %7913 = vmatpush1.bf16.msra.mxu1 %v12197_v11  ;;  %v12289_v10 = vld [vmem:[#allocation2 + $0x13ec] ss:$16 sps:$4 sm:$0xff]   ;;  %v12284_v11 = vld [vmem:[#allocation2 + $0x13e0] ss:$16 sps:$4 sm:$0xff]  }
 0x279   :  { %7066 = vmatprep.subr.bf16.mxu0 %v12202_v12  ;;  %7914 = vmatprep.subr.bf16.mxu1 %v12205_v13  ;;  %v12287_v12 = vld [vmem:[#allocation2 + $0x13e8] ss:$16 sps:$4 sm:$0xff]   ;;  %v12292_v13 = vld [vmem:[#allocation2 + $0x1404] ss:$16 sps:$4 sm:$0xff]  }
 0x27a   :  { %7053 = vmatprep.mubr.bf16.mxu0 %v9812_v16  ;;  %7901 = vmatprep.mubr.bf16.mxu1 %v9812_v16  ;;  %v116_v16 = vld [vmem:[%s13597_s0 + $0x1c8] sm:$0xff] }
 0x27c   :  { %7067 = vmatpush1.bf16.msra.mxu0 %v12200_v14  ;;  %7915 = vmatpush1.bf16.msra.mxu1 %v12203_v15  ;;  %v12295_v14 = vld [vmem:[#allocation2 + $0x140c] ss:$16 sps:$4 sm:$0xff]  }
 0x27d   :  { %7068 = vmatprep.subr.bf16.mxu0 %v12208_v17  ;;  %7916 = vmatprep.subr.bf16.mxu1 %v12211_v18  ;;  %v100_v15 = vld [vmem:[%s13597_s0 + $0x148] sm:$0xff]  ;;  %v9781_v17 = vcombine.low %v13426_v41, %v13431_v43  ;;  %v12290_v18 = vld [vmem:[#allocation2 + $0x1400] ss:$16 sps:$4 sm:$0xff]  }
 0x27e   :  { %v13446_v41 = vld [vmem:[%s13597_s0 + $0x50] sm:$0xff] }
 0x27f   :  { %7054 = vmatmul.mubr.bf16.gmra.mrb[4].mxu0 %v9811_v19  ;;  %7902 = vmatmul.mubr.bf16.gmra.mrb[4].mxu1 %v9811_v19  ;;  %v12293_v19 = vld [vmem:[#allocation2 + $0x1408] ss:$16 sps:$4 sm:$0xff]   ;;  %v13451_v43 = vld [vmem:[%s13597_s0 + $0xd0] sm:$0xff] }
 0x280   :  { %7069 = vmatpush1.bf16.msra.mxu0 %v12206_v20  ;;  %7917 = vmatpush1.bf16.msra.mxu1 %v12209_v21  ;;  %v12298_v20 = vld [vmem:[#allocation2 + $0x1424] ss:$16 sps:$4 sm:$0xff]   ;;  %v12301_v21 = vld [vmem:[#allocation2 + $0x142c] ss:$16 sps:$4 sm:$0xff]  }
 0x281   :  { %7070 = vmatprep.subr.bf16.mxu0 %v12214_v22  ;;  %7918 = vmatprep.subr.bf16.mxu1 %v12217_v23  ;;  %v12296_v22 = vld [vmem:[#allocation2 + $0x1420] ss:$16 sps:$4 sm:$0xff]   ;;  %v12299_v23 = vld [vmem:[#allocation2 + $0x1428] ss:$16 sps:$4 sm:$0xff]  }
 0x282   :  { %7096 = vmatprep.mubr.bf16.mxu0 %v9782_v24  ;;  %7944 = vmatprep.mubr.bf16.mxu1 %v9782_v24  ;;  %v9814_v24 = vcombine.high %v100_v15, %v116_v16 }
 0x284   :  { %7071 = vmatpush1.bf16.msra.mxu0 %v12212_v26  ;;  %7919 = vmatpush1.bf16.msra.mxu1 %v12215_v28  ;;  %v12304_v26 = vld [vmem:[#allocation2 + $0x1444] ss:$16 sps:$4 sm:$0xff]   ;;  %v12307_v28 = vld [vmem:[#allocation2 + $0x144c] ss:$16 sps:$4 sm:$0xff]  }
 0x285   :  { %7072 = vmatprep.subr.bf16.mxu0 %v12220_v29  ;;  %7920 = vmatprep.subr.bf16.mxu1 %v12223_v30  ;;  %v9813_v29 = vcombine.low %v100_v15, %v116_v16  ;;  %v12302_v30 = vld [vmem:[#allocation2 + $0x1440] ss:$16 sps:$4 sm:$0xff]   ;;  %v12377_v16 = vld [vmem:[#allocation2 + $0x15c8] ss:$16 sps:$4 sm:$0xff]  }
 0x286   :  { %v12374_v15 = vld [vmem:[#allocation2 + $0x15c0] ss:$16 sps:$4 sm:$0xff]  }
 0x288   :  { %7073 = vmatpush1.bf16.msra.mxu0 %v12218_v31  ;;  %7921 = vmatpush1.bf16.msra.mxu1 %v12221_v32  ;;  %v12305_v31 = vld [vmem:[#allocation2 + $0x1448] ss:$16 sps:$4 sm:$0xff]   ;;  %v12310_v32 = vld [vmem:[#allocation2 + $0x1464] ss:$16 sps:$4 sm:$0xff]  }
 0x289   :  { %7074 = vmatprep.subr.bf16.mxu0 %v12226_v25  ;;  %7922 = vmatprep.subr.bf16.mxu1 %v12229_v27  ;;  %v12313_v25 = vld [vmem:[#allocation2 + $0x146c] ss:$16 sps:$4 sm:$0xff]   ;;  %v9784_v27 = vcombine.high %v13446_v41, %v13451_v43 }
 0x28c   :  { %7075 = vmatpush1.bf16.msra.mxu0 %v12224_v34  ;;  %7923 = vmatpush1.bf16.msra.mxu1 %v12227_v36  ;;  %v12308_v34 = vld [vmem:[#allocation2 + $0x1460] ss:$16 sps:$4 sm:$0xff]   ;;  %v12311_v36 = vld [vmem:[#allocation2 + $0x1468] ss:$16 sps:$4 sm:$0xff]  }
 0x28d   :  { %7076 = vmatprep.subr.bf16.mxu0 %v12232_v37  ;;  %7924 = vmatprep.subr.bf16.mxu1 %v12235_v38  ;;  %v12316_v37 = vld [vmem:[#allocation2 + $0x1484] ss:$16 sps:$4 sm:$0xff]   ;;  %v12319_v38 = vld [vmem:[#allocation2 + $0x148c] ss:$16 sps:$4 sm:$0xff]  }
 0x290   :  { %7077 = vmatpush1.bf16.msra.mxu0 %v12230_v39  ;;  %7925 = vmatpush1.bf16.msra.mxu1 %v12233_v40  ;;  %v12314_v39 = vld [vmem:[#allocation2 + $0x1480] ss:$16 sps:$4 sm:$0xff]   ;;  %v12317_v40 = vld [vmem:[#allocation2 + $0x1488] ss:$16 sps:$4 sm:$0xff]  }
 0x291   :  { %7078 = vmatprep.subr.bf16.mxu0 %v12238_v33  ;;  %7926 = vmatprep.subr.bf16.mxu1 %v12241_v35  ;;  %v12322_v33 = vld [vmem:[#allocation2 + $0x14a4] ss:$16 sps:$4 sm:$0xff]   ;;  %v12325_v35 = vld [vmem:[#allocation2 + $0x14ac] ss:$16 sps:$4 sm:$0xff]  }
 0x294   :  { %7079 = vmatpush1.bf16.msra.mxu0 %v12236_v42  ;;  %7927 = vmatpush1.bf16.msra.mxu1 %v12239_v44  ;;  %v12320_v42 = vld [vmem:[#allocation2 + $0x14a0] ss:$16 sps:$4 sm:$0xff]   ;;  %v12323_v44 = vld [vmem:[#allocation2 + $0x14a8] ss:$16 sps:$4 sm:$0xff]  }
 0x295   :  { %7080 = vmatprep.subr.bf16.mxu0 %v12244_v45  ;;  %7928 = vmatprep.subr.bf16.mxu1 %v12247_v46  ;;  %v12328_v45 = vld [vmem:[#allocation2 + $0x14c4] ss:$16 sps:$4 sm:$0xff]   ;;  %v12331_v46 = vld [vmem:[#allocation2 + $0x14cc] ss:$16 sps:$4 sm:$0xff]  }
 0x298   :  { %7081 = vmatpush1.bf16.msra.mxu0 %v12242_v47  ;;  %7929 = vmatpush1.bf16.msra.mxu1 %v12245_v48  ;;  %v12326_v47 = vld [vmem:[#allocation2 + $0x14c0] ss:$16 sps:$4 sm:$0xff]   ;;  %v12329_v48 = vld [vmem:[#allocation2 + $0x14c8] ss:$16 sps:$4 sm:$0xff]  }
 0x299   :  { %7082 = vmatprep.subr.bf16.mxu0 %v12250_v49  ;;  %7930 = vmatprep.subr.bf16.mxu1 %v12253_v50  ;;  %v12334_v49 = vld [vmem:[#allocation2 + $0x14e4] ss:$16 sps:$4 sm:$0xff]   ;;  %v12337_v50 = vld [vmem:[#allocation2 + $0x14ec] ss:$16 sps:$4 sm:$0xff]  }
 0x29c   :  { %7083 = vmatpush1.bf16.msra.mxu0 %v12248_v51  ;;  %7931 = vmatpush1.bf16.msra.mxu1 %v12251_v52  ;;  %v12332_v51 = vld [vmem:[#allocation2 + $0x14e0] ss:$16 sps:$4 sm:$0xff]   ;;  %v12335_v52 = vld [vmem:[#allocation2 + $0x14e8] ss:$16 sps:$4 sm:$0xff]  }
 0x29d   :  { %7084 = vmatprep.subr.bf16.mxu0 %v12256_v53  ;;  %7932 = vmatprep.subr.bf16.mxu1 %v12259_v54  ;;  %v12340_v53 = vld [vmem:[#allocation2 + $0x1504] ss:$16 sps:$4 sm:$0xff]   ;;  %v12343_v54 = vld [vmem:[#allocation2 + $0x150c] ss:$16 sps:$4 sm:$0xff]  }
 0x2a0   :  { %7085 = vmatpush1.bf16.msra.mxu0 %v12254_v55  ;;  %7933 = vmatpush1.bf16.msra.mxu1 %v12257_v56  ;;  %v12338_v55 = vld [vmem:[#allocation2 + $0x1500] ss:$16 sps:$4 sm:$0xff]   ;;  %v12341_v56 = vld [vmem:[#allocation2 + $0x1508] ss:$16 sps:$4 sm:$0xff]  }
 0x2a1   :  { %7086 = vmatprep.subr.bf16.mxu0 %v12262_v57  ;;  %7934 = vmatprep.subr.bf16.mxu1 %v12265_v58  ;;  %v12346_v57 = vld [vmem:[#allocation2 + $0x1524] ss:$16 sps:$4 sm:$0xff]   ;;  %v12349_v58 = vld [vmem:[#allocation2 + $0x152c] ss:$16 sps:$4 sm:$0xff]  }
 0x2a4   :  { %7087 = vmatpush1.bf16.msra.mxu0 %v12260_v59  ;;  %7935 = vmatpush1.bf16.msra.mxu1 %v12263_v60  ;;  %v12344_v59 = vld [vmem:[#allocation2 + $0x1520] ss:$16 sps:$4 sm:$0xff]   ;;  %v12347_v60 = vld [vmem:[#allocation2 + $0x1528] ss:$16 sps:$4 sm:$0xff]  }
 0x2a5   :  { %7088 = vmatprep.subr.bf16.mxu0 %v12268_v61  ;;  %7936 = vmatprep.subr.bf16.mxu1 %v12271_v62  ;;  %v12352_v61 = vld [vmem:[#allocation2 + $0x1544] ss:$16 sps:$4 sm:$0xff]   ;;  %v12355_v62 = vld [vmem:[#allocation2 + $0x154c] ss:$16 sps:$4 sm:$0xff]  }
 0x2a8   :  { %7089 = vmatpush1.bf16.msra.mxu0 %v12266_v63  ;;  %7937 = vmatpush1.bf16.msra.mxu1 %v12269_v0  ;;  %v12350_v63 = vld [vmem:[#allocation2 + $0x1540] ss:$16 sps:$4 sm:$0xff]   ;;  %v12353_v0 = vld [vmem:[#allocation2 + $0x1548] ss:$16 sps:$4 sm:$0xff]  }
 0x2a9   :  { %7090 = vmatprep.subr.bf16.mxu0 %v12274_v1  ;;  %7938 = vmatprep.subr.bf16.mxu1 %v12277_v2  ;;  %v12358_v1 = vld [vmem:[#allocation2 + $0x1564] ss:$16 sps:$4 sm:$0xff]   ;;  %v12361_v2 = vld [vmem:[#allocation2 + $0x156c] ss:$16 sps:$4 sm:$0xff]  }
 0x2ac   :  { %7091 = vmatpush1.bf16.msra.mxu0 %v12272_v3  ;;  %7939 = vmatpush1.bf16.msra.mxu1 %v12275_v4  ;;  %v12356_v3 = vld [vmem:[#allocation2 + $0x1560] ss:$16 sps:$4 sm:$0xff]   ;;  %v12359_v4 = vld [vmem:[#allocation2 + $0x1568] ss:$16 sps:$4 sm:$0xff]  }
 0x2ad   :  { %7092 = vmatprep.subr.bf16.mxu0 %v12280_v5  ;;  %7940 = vmatprep.subr.bf16.mxu1 %v12283_v6  ;;  %v12364_v5 = vld [vmem:[#allocation2 + $0x1584] ss:$16 sps:$4 sm:$0xff]   ;;  %v12367_v6 = vld [vmem:[#allocation2 + $0x158c] ss:$16 sps:$4 sm:$0xff]  }
 0x2b0   :  { %7093 = vmatpush1.bf16.msra.mxu0 %v12278_v7  ;;  %7941 = vmatpush1.bf16.msra.mxu1 %v12281_v8  ;;  %v12362_v7 = vld [vmem:[#allocation2 + $0x1580] ss:$16 sps:$4 sm:$0xff]   ;;  %v12365_v8 = vld [vmem:[#allocation2 + $0x1588] ss:$16 sps:$4 sm:$0xff]  }
 0x2b1   :  { %7094 = vmatprep.subr.bf16.mxu0 %v12286_v9  ;;  %7942 = vmatprep.subr.bf16.mxu1 %v12289_v10  ;;  %v12370_v9 = vld [vmem:[#allocation2 + $0x15a4] ss:$16 sps:$4 sm:$0xff]   ;;  %v12373_v10 = vld [vmem:[#allocation2 + $0x15ac] ss:$16 sps:$4 sm:$0xff]  }
 0x2b4   :  { %7095 = vmatpush1.bf16.msra.mxu0 %v12284_v11  ;;  %7943 = vmatpush1.bf16.msra.mxu1 %v12287_v12  ;;  %v12368_v11 = vld [vmem:[#allocation2 + $0x15a0] ss:$16 sps:$4 sm:$0xff]   ;;  %v12371_v12 = vld [vmem:[#allocation2 + $0x15a8] ss:$16 sps:$4 sm:$0xff]  }
 0x2b5   :  { %7117 = vmatprep.subr.bf16.mxu0 %v12292_v13  ;;  %7965 = vmatprep.subr.bf16.mxu1 %v12295_v14  ;;  %v12376_v13 = vld [vmem:[#allocation2 + $0x15c4] ss:$16 sps:$4 sm:$0xff]   ;;  %v12379_v14 = vld [vmem:[#allocation2 + $0x15cc] ss:$16 sps:$4 sm:$0xff]  }
 0x2b7   :  { %7097 = vmatmul.mubr.bf16.vlgmr.msra.gmra.mrb[0].mxu0 %v9781_v17  ;;  %7945 = vmatmul.mubr.bf16.vlgmr.msra.gmra.mrb[0].mxu1 %v9781_v17  ;;  %v12382_v17 = vld [vmem:[#allocation2 + $0x15e4] ss:$16 sps:$4 sm:$0xff]  }
 0x2b8   :  { %7118 = vmatpush1.bf16.msra.mxu0 %v12290_v18  ;;  %7966 = vmatpush1.bf16.msra.mxu1 %v12293_v19  ;;  %v12385_v18 = vld [vmem:[#allocation2 + $0x15ec] ss:$16 sps:$4 sm:$0xff]   ;;  %v12380_v19 = vld [vmem:[#allocation2 + $0x15e0] ss:$16 sps:$4 sm:$0xff]  }
 0x2b9   :  { %7119 = vmatprep.subr.bf16.mxu0 %v12298_v20  ;;  %7967 = vmatprep.subr.bf16.mxu1 %v12301_v21  ;;  %v12383_v20 = vld [vmem:[#allocation2 + $0x15e8] ss:$16 sps:$4 sm:$0xff]   ;;  %v12388_v21 = vld [vmem:[#allocation2 + $0x1604] ss:$16 sps:$4 sm:$0xff]  }
 0x2ba   :  { %7106 = vmatprep.mubr.bf16.mxu0 %v9814_v24  ;;  %7954 = vmatprep.mubr.bf16.mxu1 %v9814_v24  ;;  %v101_v24 = vld [vmem:[%s13597_s0 + $0x150] sm:$0xff] }
 0x2bc   :  { %7120 = vmatpush1.bf16.msra.mxu0 %v12296_v22  ;;  %7968 = vmatpush1.bf16.msra.mxu1 %v12299_v23  ;;  %v12391_v22 = vld [vmem:[#allocation2 + $0x160c] ss:$16 sps:$4 sm:$0xff]   ;;  %v9783_v23 = vcombine.low %v13446_v41, %v13451_v43  ;;  %v12392_v41 = vld [vmem:[#allocation2 + $0x1620] ss:$16 sps:$4 sm:$0xff]   ;;  %v12395_v43 = vld [vmem:[#allocation2 + $0x1628] ss:$16 sps:$4 sm:$0xff]  }
 0x2bd   :  { %7121 = vmatprep.subr.bf16.mxu0 %v12304_v26  ;;  %7969 = vmatprep.subr.bf16.mxu1 %v12307_v28  ;;  %v117_v26 = vld [vmem:[%s13597_s0 + $0x1d0] sm:$0xff] }
 0x2be   :  { %v12386_v28 = vld [vmem:[#allocation2 + $0x1600] ss:$16 sps:$4 sm:$0xff]  }
 0x2bf   :  { %7107 = vmatmul.mubr.bf16.gmra.mrb[4].mxu0 %v9813_v29  ;;  %7955 = vmatmul.mubr.bf16.gmra.mrb[4].mxu1 %v9813_v29  ;;  %v12389_v29 = vld [vmem:[#allocation2 + $0x1608] ss:$16 sps:$4 sm:$0xff]  }
 0x2c0   :  { %7122 = vmatpush1.bf16.msra.mxu0 %v12302_v30  ;;  %7970 = vmatpush1.bf16.msra.mxu1 %v12305_v31  ;;  %v12394_v30 = vld [vmem:[#allocation2 + $0x1624] ss:$16 sps:$4 sm:$0xff]   ;;  %v12397_v31 = vld [vmem:[#allocation2 + $0x162c] ss:$16 sps:$4 sm:$0xff]  }
 0x2c1   :  { %7123 = vmatprep.subr.bf16.mxu0 %v12310_v32  ;;  %7971 = vmatprep.subr.bf16.mxu1 %v12313_v25  ;;  %v9816_v32 = vcombine.high %v101_v24, %v117_v26  ;;  %v12400_v25 = vld [vmem:[#allocation2 + $0x1644] ss:$16 sps:$4 sm:$0xff]  }
 0x2c2   :  { %7149 = vmatprep.mubr.bf16.mxu0 %v9784_v27  ;;  %7997 = vmatprep.mubr.bf16.mxu1 %v9784_v27  ;;  %v12403_v27 = vld [vmem:[#allocation2 + $0x164c] ss:$16 sps:$4 sm:$0xff]  }
 0x2c4   :  { %7124 = vmatpush1.bf16.msra.mxu0 %v12308_v34  ;;  %7972 = vmatpush1.bf16.msra.mxu1 %v12311_v36  ;;  %v9815_v34 = vcombine.low %v101_v24, %v117_v26  ;;  %v13466_v36 = vld [vmem:[%s13597_s0 + $0x58] sm:$0xff]  ;;  %v12478_v26 = vld [vmem:[#allocation2 + $0x17e4] ss:$16 sps:$4 sm:$0xff]  }
 0x2c5   :  { %7125 = vmatprep.subr.bf16.mxu0 %v12316_v37  ;;  %7973 = vmatprep.subr.bf16.mxu1 %v12319_v38  ;;  %v13471_v37 = vld [vmem:[%s13597_s0 + $0xd8] sm:$0xff]  ;;  %v12398_v38 = vld [vmem:[#allocation2 + $0x1640] ss:$16 sps:$4 sm:$0xff]  }
 0x2c6   :  { %v12473_v24 = vld [vmem:[#allocation2 + $0x17c8] ss:$16 sps:$4 sm:$0xff]  }
 0x2c8   :  { %7126 = vmatpush1.bf16.msra.mxu0 %v12314_v39  ;;  %7974 = vmatpush1.bf16.msra.mxu1 %v12317_v40  ;;  %v12401_v39 = vld [vmem:[#allocation2 + $0x1648] ss:$16 sps:$4 sm:$0xff]   ;;  %v12406_v40 = vld [vmem:[#allocation2 + $0x1664] ss:$16 sps:$4 sm:$0xff]  }
 0x2c9   :  { %7127 = vmatprep.subr.bf16.mxu0 %v12322_v33  ;;  %7975 = vmatprep.subr.bf16.mxu1 %v12325_v35  ;;  %v12409_v33 = vld [vmem:[#allocation2 + $0x166c] ss:$16 sps:$4 sm:$0xff]   ;;  %v9786_v35 = vcombine.high %v13466_v36, %v13471_v37 }
 0x2cc   :  { %7128 = vmatpush1.bf16.msra.mxu0 %v12320_v42  ;;  %7976 = vmatpush1.bf16.msra.mxu1 %v12323_v44  ;;  %v12404_v42 = vld [vmem:[#allocation2 + $0x1660] ss:$16 sps:$4 sm:$0xff]   ;;  %v12407_v44 = vld [vmem:[#allocation2 + $0x1668] ss:$16 sps:$4 sm:$0xff]  }
 0x2cd   :  { %7129 = vmatprep.subr.bf16.mxu0 %v12328_v45  ;;  %7977 = vmatprep.subr.bf16.mxu1 %v12331_v46  ;;  %v12412_v45 = vld [vmem:[#allocation2 + $0x1684] ss:$16 sps:$4 sm:$0xff]   ;;  %v12415_v46 = vld [vmem:[#allocation2 + $0x168c] ss:$16 sps:$4 sm:$0xff]  }
 0x2d0   :  { %7130 = vmatpush1.bf16.msra.mxu0 %v12326_v47  ;;  %7978 = vmatpush1.bf16.msra.mxu1 %v12329_v48  ;;  %v12410_v47 = vld [vmem:[#allocation2 + $0x1680] ss:$16 sps:$4 sm:$0xff]   ;;  %v12413_v48 = vld [vmem:[#allocation2 + $0x1688] ss:$16 sps:$4 sm:$0xff]  }
 0x2d1   :  { %7131 = vmatprep.subr.bf16.mxu0 %v12334_v49  ;;  %7979 = vmatprep.subr.bf16.mxu1 %v12337_v50  ;;  %v12418_v49 = vld [vmem:[#allocation2 + $0x16a4] ss:$16 sps:$4 sm:$0xff]   ;;  %v12421_v50 = vld [vmem:[#allocation2 + $0x16ac] ss:$16 sps:$4 sm:$0xff]  }
 0x2d4   :  { %7132 = vmatpush1.bf16.msra.mxu0 %v12332_v51  ;;  %7980 = vmatpush1.bf16.msra.mxu1 %v12335_v52  ;;  %v12416_v51 = vld [vmem:[#allocation2 + $0x16a0] ss:$16 sps:$4 sm:$0xff]   ;;  %v12419_v52 = vld [vmem:[#allocation2 + $0x16a8] ss:$16 sps:$4 sm:$0xff]  }
 0x2d5   :  { %7133 = vmatprep.subr.bf16.mxu0 %v12340_v53  ;;  %7981 = vmatprep.subr.bf16.mxu1 %v12343_v54  ;;  %v12424_v53 = vld [vmem:[#allocation2 + $0x16c4] ss:$16 sps:$4 sm:$0xff]   ;;  %v12427_v54 = vld [vmem:[#allocation2 + $0x16cc] ss:$16 sps:$4 sm:$0xff]  }
 0x2d8   :  { %7134 = vmatpush1.bf16.msra.mxu0 %v12338_v55  ;;  %7982 = vmatpush1.bf16.msra.mxu1 %v12341_v56  ;;  %v12422_v55 = vld [vmem:[#allocation2 + $0x16c0] ss:$16 sps:$4 sm:$0xff]   ;;  %v12425_v56 = vld [vmem:[#allocation2 + $0x16c8] ss:$16 sps:$4 sm:$0xff]  }
 0x2d9   :  { %7135 = vmatprep.subr.bf16.mxu0 %v12346_v57  ;;  %7983 = vmatprep.subr.bf16.mxu1 %v12349_v58  ;;  %v12430_v57 = vld [vmem:[#allocation2 + $0x16e4] ss:$16 sps:$4 sm:$0xff]   ;;  %v12433_v58 = vld [vmem:[#allocation2 + $0x16ec] ss:$16 sps:$4 sm:$0xff]  }
 0x2dc   :  { %7136 = vmatpush1.bf16.msra.mxu0 %v12344_v59  ;;  %7984 = vmatpush1.bf16.msra.mxu1 %v12347_v60  ;;  %v12428_v59 = vld [vmem:[#allocation2 + $0x16e0] ss:$16 sps:$4 sm:$0xff]   ;;  %v12431_v60 = vld [vmem:[#allocation2 + $0x16e8] ss:$16 sps:$4 sm:$0xff]  }
 0x2dd   :  { %7137 = vmatprep.subr.bf16.mxu0 %v12352_v61  ;;  %7985 = vmatprep.subr.bf16.mxu1 %v12355_v62  ;;  %v12436_v61 = vld [vmem:[#allocation2 + $0x1704] ss:$16 sps:$4 sm:$0xff]   ;;  %v12439_v62 = vld [vmem:[#allocation2 + $0x170c] ss:$16 sps:$4 sm:$0xff]  }
 0x2e0   :  { %7138 = vmatpush1.bf16.msra.mxu0 %v12350_v63  ;;  %7986 = vmatpush1.bf16.msra.mxu1 %v12353_v0  ;;  %v12434_v63 = vld [vmem:[#allocation2 + $0x1700] ss:$16 sps:$4 sm:$0xff]   ;;  %v12437_v0 = vld [vmem:[#allocation2 + $0x1708] ss:$16 sps:$4 sm:$0xff]  }
 0x2e1   :  { %7139 = vmatprep.subr.bf16.mxu0 %v12358_v1  ;;  %7987 = vmatprep.subr.bf16.mxu1 %v12361_v2  ;;  %v12442_v1 = vld [vmem:[#allocation2 + $0x1724] ss:$16 sps:$4 sm:$0xff]   ;;  %v12445_v2 = vld [vmem:[#allocation2 + $0x172c] ss:$16 sps:$4 sm:$0xff]  }
 0x2e4   :  { %7140 = vmatpush1.bf16.msra.mxu0 %v12356_v3  ;;  %7988 = vmatpush1.bf16.msra.mxu1 %v12359_v4  ;;  %v12440_v3 = vld [vmem:[#allocation2 + $0x1720] ss:$16 sps:$4 sm:$0xff]   ;;  %v12443_v4 = vld [vmem:[#allocation2 + $0x1728] ss:$16 sps:$4 sm:$0xff]  }
 0x2e5   :  { %7141 = vmatprep.subr.bf16.mxu0 %v12364_v5  ;;  %7989 = vmatprep.subr.bf16.mxu1 %v12367_v6  ;;  %v12448_v5 = vld [vmem:[#allocation2 + $0x1744] ss:$16 sps:$4 sm:$0xff]   ;;  %v12451_v6 = vld [vmem:[#allocation2 + $0x174c] ss:$16 sps:$4 sm:$0xff]  }
 0x2e8   :  { %7142 = vmatpush1.bf16.msra.mxu0 %v12362_v7  ;;  %7990 = vmatpush1.bf16.msra.mxu1 %v12365_v8  ;;  %v12446_v7 = vld [vmem:[#allocation2 + $0x1740] ss:$16 sps:$4 sm:$0xff]   ;;  %v12449_v8 = vld [vmem:[#allocation2 + $0x1748] ss:$16 sps:$4 sm:$0xff]  }
 0x2e9   :  { %7143 = vmatprep.subr.bf16.mxu0 %v12370_v9  ;;  %7991 = vmatprep.subr.bf16.mxu1 %v12373_v10  ;;  %v12454_v9 = vld [vmem:[#allocation2 + $0x1764] ss:$16 sps:$4 sm:$0xff]   ;;  %v12457_v10 = vld [vmem:[#allocation2 + $0x176c] ss:$16 sps:$4 sm:$0xff]  }
 0x2ec   :  { %7144 = vmatpush1.bf16.msra.mxu0 %v12368_v11  ;;  %7992 = vmatpush1.bf16.msra.mxu1 %v12371_v12  ;;  %v12452_v11 = vld [vmem:[#allocation2 + $0x1760] ss:$16 sps:$4 sm:$0xff]   ;;  %v12455_v12 = vld [vmem:[#allocation2 + $0x1768] ss:$16 sps:$4 sm:$0xff]  }
 0x2ed   :  { %7145 = vmatprep.subr.bf16.mxu0 %v12376_v13  ;;  %7993 = vmatprep.subr.bf16.mxu1 %v12379_v14  ;;  %v12460_v13 = vld [vmem:[#allocation2 + $0x1784] ss:$16 sps:$4 sm:$0xff]   ;;  %v12463_v14 = vld [vmem:[#allocation2 + $0x178c] ss:$16 sps:$4 sm:$0xff]  }
 0x2f0   :  { %7146 = vmatpush1.bf16.msra.mxu0 %v12374_v15  ;;  %7994 = vmatpush1.bf16.msra.mxu1 %v12377_v16  ;;  %v12458_v15 = vld [vmem:[#allocation2 + $0x1780] ss:$16 sps:$4 sm:$0xff]   ;;  %v12461_v16 = vld [vmem:[#allocation2 + $0x1788] ss:$16 sps:$4 sm:$0xff]  }
 0x2f1   :  { %7147 = vmatprep.subr.bf16.mxu0 %v12382_v17  ;;  %7995 = vmatprep.subr.bf16.mxu1 %v12385_v18  ;;  %v12466_v17 = vld [vmem:[#allocation2 + $0x17a4] ss:$16 sps:$4 sm:$0xff]   ;;  %v12469_v18 = vld [vmem:[#allocation2 + $0x17ac] ss:$16 sps:$4 sm:$0xff]  }
 0x2f4   :  { %7148 = vmatpush1.bf16.msra.mxu0 %v12380_v19  ;;  %7996 = vmatpush1.bf16.msra.mxu1 %v12383_v20  ;;  %v12464_v19 = vld [vmem:[#allocation2 + $0x17a0] ss:$16 sps:$4 sm:$0xff]   ;;  %v12467_v20 = vld [vmem:[#allocation2 + $0x17a8] ss:$16 sps:$4 sm:$0xff]  }
 0x2f5   :  { %7170 = vmatprep.subr.bf16.mxu0 %v12388_v21  ;;  %8018 = vmatprep.subr.bf16.mxu1 %v12391_v22  ;;  %v12472_v21 = vld [vmem:[#allocation2 + $0x17c4] ss:$16 sps:$4 sm:$0xff]   ;;  %v12475_v22 = vld [vmem:[#allocation2 + $0x17cc] ss:$16 sps:$4 sm:$0xff]  }
 0x2f7   :  { %7150 = vmatmul.mubr.bf16.vlgmr.msra.gmra.mrb[0].mxu0 %v9783_v23  ;;  %7998 = vmatmul.mubr.bf16.vlgmr.msra.gmra.mrb[0].mxu1 %v9783_v23  ;;  %v12470_v23 = vld [vmem:[#allocation2 + $0x17c0] ss:$16 sps:$4 sm:$0xff]  }
 0x2f8   :  { %7171 = vmatpush1.bf16.msra.mxu0 %v12386_v28  ;;  %8019 = vmatpush1.bf16.msra.mxu1 %v12389_v29  ;;  %v12481_v28 = vld [vmem:[#allocation2 + $0x17ec] ss:$16 sps:$4 sm:$0xff]   ;;  %v12476_v29 = vld [vmem:[#allocation2 + $0x17e0] ss:$16 sps:$4 sm:$0xff]  }
 0x2f9   :  { %7172 = vmatprep.subr.bf16.mxu0 %v12394_v30  ;;  %8020 = vmatprep.subr.bf16.mxu1 %v12397_v31  ;;  %v12479_v30 = vld [vmem:[#allocation2 + $0x17e8] ss:$16 sps:$4 sm:$0xff]   ;;  %v12484_v31 = vld [vmem:[#allocation2 + $0x1804] ss:$16 sps:$4 sm:$0xff]  }
 0x2fa   :  { %7159 = vmatprep.mubr.bf16.mxu0 %v9816_v32  ;;  %8007 = vmatprep.mubr.bf16.mxu1 %v9816_v32  ;;  %v12487_v32 = vld [vmem:[#allocation2 + $0x180c] ss:$16 sps:$4 sm:$0xff]  }
 0x2fc   :  { %7173 = vmatpush1.bf16.msra.mxu0 %v12392_v41  ;;  %8021 = vmatpush1.bf16.msra.mxu1 %v12395_v43  ;;  %v9785_v41 = vcombine.low %v13466_v36, %v13471_v37  ;;  %v102_v43 = vld [vmem:[%s13597_s0 + $0x158] sm:$0xff]  ;;  %v12488_v36 = vld [vmem:[#allocation2 + $0x1820] ss:$16 sps:$4 sm:$0xff]  }
 0x2fd   :  { %7174 = vmatprep.subr.bf16.mxu0 %v12400_v25  ;;  %8022 = vmatprep.subr.bf16.mxu1 %v12403_v27  ;;  %v118_v25 = vld [vmem:[%s13597_s0 + $0x1d8] sm:$0xff]  ;;  %v12482_v27 = vld [vmem:[#allocation2 + $0x1800] ss:$16 sps:$4 sm:$0xff]  }
 0x2fe   :  { %v12491_v37 = vld [vmem:[#allocation2 + $0x1828] ss:$16 sps:$4 sm:$0xff]  }
 0x2ff   :  { %7160 = vmatmul.mubr.bf16.gmra.mrb[4].mxu0 %v9815_v34  ;;  %8008 = vmatmul.mubr.bf16.gmra.mrb[4].mxu1 %v9815_v34  ;;  %v12485_v34 = vld [vmem:[#allocation2 + $0x1808] ss:$16 sps:$4 sm:$0xff]  }
 0x300   :  { %7175 = vmatpush1.bf16.msra.mxu0 %v12398_v38  ;;  %8023 = vmatpush1.bf16.msra.mxu1 %v12401_v39  ;;  %v12490_v38 = vld [vmem:[#allocation2 + $0x1824] ss:$16 sps:$4 sm:$0xff]   ;;  %v12493_v39 = vld [vmem:[#allocation2 + $0x182c] ss:$16 sps:$4 sm:$0xff]  }
 0x301   :  { %7176 = vmatprep.subr.bf16.mxu0 %v12406_v40  ;;  %8024 = vmatprep.subr.bf16.mxu1 %v12409_v33  ;;  %v9818_v40 = vcombine.high %v102_v43, %v118_v25  ;;  %v12496_v33 = vld [vmem:[#allocation2 + $0x1844] ss:$16 sps:$4 sm:$0xff]  }
 0x302   :  { %7202 = vmatprep.mubr.bf16.mxu0 %v9786_v35  ;;  %8050 = vmatprep.mubr.bf16.mxu1 %v9786_v35  ;;  %v12499_v35 = vld [vmem:[#allocation2 + $0x184c] ss:$16 sps:$4 sm:$0xff]  }
 0x304   :  { %7177 = vmatpush1.bf16.msra.mxu0 %v12404_v42  ;;  %8025 = vmatpush1.bf16.msra.mxu1 %v12407_v44  ;;  %v9817_v42 = vcombine.low %v102_v43, %v118_v25  ;;  %v13486_v44 = vld [vmem:[%s13597_s0 + $0x60] sm:$0xff]  ;;  %v12569_v43 = vld [vmem:[#allocation2 + $0x19c8] ss:$16 sps:$4 sm:$0xff]  }
 0x305   :  { %7178 = vmatprep.subr.bf16.mxu0 %v12412_v45  ;;  %8026 = vmatprep.subr.bf16.mxu1 %v12415_v46  ;;  %v13491_v45 = vld [vmem:[%s13597_s0 + $0xe0] sm:$0xff] }
 0x306   :  { %v12494_v46 = vld [vmem:[#allocation2 + $0x1840] ss:$16 sps:$4 sm:$0xff]   ;;  %v12574_v25 = vld [vmem:[#allocation2 + $0x19e4] ss:$16 sps:$4 sm:$0xff]  }
 0x308   :  { %7179 = vmatpush1.bf16.msra.mxu0 %v12410_v47  ;;  %8027 = vmatpush1.bf16.msra.mxu1 %v12413_v48  ;;  %v12497_v47 = vld [vmem:[#allocation2 + $0x1848] ss:$16 sps:$4 sm:$0xff]   ;;  %v12502_v48 = vld [vmem:[#allocation2 + $0x1864] ss:$16 sps:$4 sm:$0xff]  }
 0x309   :  { %7180 = vmatprep.subr.bf16.mxu0 %v12418_v49  ;;  %8028 = vmatprep.subr.bf16.mxu1 %v12421_v50  ;;  %v12505_v49 = vld [vmem:[#allocation2 + $0x186c] ss:$16 sps:$4 sm:$0xff]   ;;  %v9788_v50 = vcombine.high %v13486_v44, %v13491_v45 }
 0x30c   :  { %7181 = vmatpush1.bf16.msra.mxu0 %v12416_v51  ;;  %8029 = vmatpush1.bf16.msra.mxu1 %v12419_v52  ;;  %v12500_v51 = vld [vmem:[#allocation2 + $0x1860] ss:$16 sps:$4 sm:$0xff]   ;;  %v12503_v52 = vld [vmem:[#allocation2 + $0x1868] ss:$16 sps:$4 sm:$0xff]  }
 0x30d   :  { %7182 = vmatprep.subr.bf16.mxu0 %v12424_v53  ;;  %8030 = vmatprep.subr.bf16.mxu1 %v12427_v54  ;;  %v12508_v53 = vld [vmem:[#allocation2 + $0x1884] ss:$16 sps:$4 sm:$0xff]   ;;  %v12511_v54 = vld [vmem:[#allocation2 + $0x188c] ss:$16 sps:$4 sm:$0xff]  }
 0x310   :  { %7183 = vmatpush1.bf16.msra.mxu0 %v12422_v55  ;;  %8031 = vmatpush1.bf16.msra.mxu1 %v12425_v56  ;;  %v12506_v55 = vld [vmem:[#allocation2 + $0x1880] ss:$16 sps:$4 sm:$0xff]   ;;  %v12509_v56 = vld [vmem:[#allocation2 + $0x1888] ss:$16 sps:$4 sm:$0xff]  }
 0x311   :  { %7184 = vmatprep.subr.bf16.mxu0 %v12430_v57  ;;  %8032 = vmatprep.subr.bf16.mxu1 %v12433_v58  ;;  %v12514_v57 = vld [vmem:[#allocation2 + $0x18a4] ss:$16 sps:$4 sm:$0xff]   ;;  %v12517_v58 = vld [vmem:[#allocation2 + $0x18ac] ss:$16 sps:$4 sm:$0xff]  }
 0x314   :  { %7185 = vmatpush1.bf16.msra.mxu0 %v12428_v59  ;;  %8033 = vmatpush1.bf16.msra.mxu1 %v12431_v60  ;;  %v12512_v59 = vld [vmem:[#allocation2 + $0x18a0] ss:$16 sps:$4 sm:$0xff]   ;;  %v12515_v60 = vld [vmem:[#allocation2 + $0x18a8] ss:$16 sps:$4 sm:$0xff]  }
 0x315   :  { %7186 = vmatprep.subr.bf16.mxu0 %v12436_v61  ;;  %8034 = vmatprep.subr.bf16.mxu1 %v12439_v62  ;;  %v12520_v61 = vld [vmem:[#allocation2 + $0x18c4] ss:$16 sps:$4 sm:$0xff]   ;;  %v12523_v62 = vld [vmem:[#allocation2 + $0x18cc] ss:$16 sps:$4 sm:$0xff]  }
 0x318   :  { %7187 = vmatpush1.bf16.msra.mxu0 %v12434_v63  ;;  %8035 = vmatpush1.bf16.msra.mxu1 %v12437_v0  ;;  %v12518_v63 = vld [vmem:[#allocation2 + $0x18c0] ss:$16 sps:$4 sm:$0xff]   ;;  %v12521_v0 = vld [vmem:[#allocation2 + $0x18c8] ss:$16 sps:$4 sm:$0xff]  }
 0x319   :  { %7188 = vmatprep.subr.bf16.mxu0 %v12442_v1  ;;  %8036 = vmatprep.subr.bf16.mxu1 %v12445_v2  ;;  %v12526_v1 = vld [vmem:[#allocation2 + $0x18e4] ss:$16 sps:$4 sm:$0xff]   ;;  %v12529_v2 = vld [vmem:[#allocation2 + $0x18ec] ss:$16 sps:$4 sm:$0xff]  }
 0x31c   :  { %7189 = vmatpush1.bf16.msra.mxu0 %v12440_v3  ;;  %8037 = vmatpush1.bf16.msra.mxu1 %v12443_v4  ;;  %v12524_v3 = vld [vmem:[#allocation2 + $0x18e0] ss:$16 sps:$4 sm:$0xff]   ;;  %v12527_v4 = vld [vmem:[#allocation2 + $0x18e8] ss:$16 sps:$4 sm:$0xff]  }
 0x31d   :  { %7190 = vmatprep.subr.bf16.mxu0 %v12448_v5  ;;  %8038 = vmatprep.subr.bf16.mxu1 %v12451_v6  ;;  %v12532_v5 = vld [vmem:[#allocation2 + $0x1904] ss:$16 sps:$4 sm:$0xff]   ;;  %v12535_v6 = vld [vmem:[#allocation2 + $0x190c] ss:$16 sps:$4 sm:$0xff]  }
 0x320   :  { %7191 = vmatpush1.bf16.msra.mxu0 %v12446_v7  ;;  %8039 = vmatpush1.bf16.msra.mxu1 %v12449_v8  ;;  %v12530_v7 = vld [vmem:[#allocation2 + $0x1900] ss:$16 sps:$4 sm:$0xff]   ;;  %v12533_v8 = vld [vmem:[#allocation2 + $0x1908] ss:$16 sps:$4 sm:$0xff]  }
 0x321   :  { %7192 = vmatprep.subr.bf16.mxu0 %v12454_v9  ;;  %8040 = vmatprep.subr.bf16.mxu1 %v12457_v10  ;;  %v12538_v9 = vld [vmem:[#allocation2 + $0x1924] ss:$16 sps:$4 sm:$0xff]   ;;  %v12541_v10 = vld [vmem:[#allocation2 + $0x192c] ss:$16 sps:$4 sm:$0xff]  }
 0x324   :  { %7193 = vmatpush1.bf16.msra.mxu0 %v12452_v11  ;;  %8041 = vmatpush1.bf16.msra.mxu1 %v12455_v12  ;;  %v12536_v11 = vld [vmem:[#allocation2 + $0x1920] ss:$16 sps:$4 sm:$0xff]   ;;  %v12539_v12 = vld [vmem:[#allocation2 + $0x1928] ss:$16 sps:$4 sm:$0xff]  }
 0x325   :  { %7194 = vmatprep.subr.bf16.mxu0 %v12460_v13  ;;  %8042 = vmatprep.subr.bf16.mxu1 %v12463_v14  ;;  %v12544_v13 = vld [vmem:[#allocation2 + $0x1944] ss:$16 sps:$4 sm:$0xff]   ;;  %v12547_v14 = vld [vmem:[#allocation2 + $0x194c] ss:$16 sps:$4 sm:$0xff]  }
 0x328   :  { %7195 = vmatpush1.bf16.msra.mxu0 %v12458_v15  ;;  %8043 = vmatpush1.bf16.msra.mxu1 %v12461_v16  ;;  %v12542_v15 = vld [vmem:[#allocation2 + $0x1940] ss:$16 sps:$4 sm:$0xff]   ;;  %v12545_v16 = vld [vmem:[#allocation2 + $0x1948] ss:$16 sps:$4 sm:$0xff]  }
 0x329   :  { %7196 = vmatprep.subr.bf16.mxu0 %v12466_v17  ;;  %8044 = vmatprep.subr.bf16.mxu1 %v12469_v18  ;;  %v12550_v17 = vld [vmem:[#allocation2 + $0x1964] ss:$16 sps:$4 sm:$0xff]   ;;  %v12553_v18 = vld [vmem:[#allocation2 + $0x196c] ss:$16 sps:$4 sm:$0xff]  }
 0x32c   :  { %7197 = vmatpush1.bf16.msra.mxu0 %v12464_v19  ;;  %8045 = vmatpush1.bf16.msra.mxu1 %v12467_v20  ;;  %v12548_v19 = vld [vmem:[#allocation2 + $0x1960] ss:$16 sps:$4 sm:$0xff]   ;;  %v12551_v20 = vld [vmem:[#allocation2 + $0x1968] ss:$16 sps:$4 sm:$0xff]  }
 0x32d   :  { %7198 = vmatprep.subr.bf16.mxu0 %v12472_v21  ;;  %8046 = vmatprep.subr.bf16.mxu1 %v12475_v22  ;;  %v12556_v21 = vld [vmem:[#allocation2 + $0x1984] ss:$16 sps:$4 sm:$0xff]   ;;  %v12559_v22 = vld [vmem:[#allocation2 + $0x198c] ss:$16 sps:$4 sm:$0xff]  }
 0x330   :  { %7199 = vmatpush1.bf16.msra.mxu0 %v12470_v23  ;;  %8047 = vmatpush1.bf16.msra.mxu1 %v12473_v24  ;;  %v12554_v23 = vld [vmem:[#allocation2 + $0x1980] ss:$16 sps:$4 sm:$0xff]   ;;  %v12557_v24 = vld [vmem:[#allocation2 + $0x1988] ss:$16 sps:$4 sm:$0xff]  }
 0x331   :  { %7200 = vmatprep.subr.bf16.mxu0 %v12478_v26  ;;  %8048 = vmatprep.subr.bf16.mxu1 %v12481_v28  ;;  %v12562_v26 = vld [vmem:[#allocation2 + $0x19a4] ss:$16 sps:$4 sm:$0xff]   ;;  %v12565_v28 = vld [vmem:[#allocation2 + $0x19ac] ss:$16 sps:$4 sm:$0xff]  }
 0x334   :  { %7201 = vmatpush1.bf16.msra.mxu0 %v12476_v29  ;;  %8049 = vmatpush1.bf16.msra.mxu1 %v12479_v30  ;;  %v12560_v29 = vld [vmem:[#allocation2 + $0x19a0] ss:$16 sps:$4 sm:$0xff]   ;;  %v12563_v30 = vld [vmem:[#allocation2 + $0x19a8] ss:$16 sps:$4 sm:$0xff]  }
 0x335   :  { %7223 = vmatprep.subr.bf16.mxu0 %v12484_v31  ;;  %8071 = vmatprep.subr.bf16.mxu1 %v12487_v32  ;;  %v12568_v31 = vld [vmem:[#allocation2 + $0x19c4] ss:$16 sps:$4 sm:$0xff]   ;;  %v12571_v32 = vld [vmem:[#allocation2 + $0x19cc] ss:$16 sps:$4 sm:$0xff]  }
 0x337   :  { %7203 = vmatmul.mubr.bf16.vlgmr.msra.gmra.mrb[0].mxu0 %v9785_v41  ;;  %8051 = vmatmul.mubr.bf16.vlgmr.msra.gmra.mrb[0].mxu1 %v9785_v41  ;;  %v12566_v41 = vld [vmem:[#allocation2 + $0x19c0] ss:$16 sps:$4 sm:$0xff]  }
 0x338   :  { %7224 = vmatpush1.bf16.msra.mxu0 %v12482_v27  ;;  %8072 = vmatpush1.bf16.msra.mxu1 %v12485_v34  ;;  %v12577_v27 = vld [vmem:[#allocation2 + $0x19ec] ss:$16 sps:$4 sm:$0xff]   ;;  %v12572_v34 = vld [vmem:[#allocation2 + $0x19e0] ss:$16 sps:$4 sm:$0xff]  }
 0x339   :  { %7225 = vmatprep.subr.bf16.mxu0 %v12490_v38  ;;  %8073 = vmatprep.subr.bf16.mxu1 %v12493_v39  ;;  %v12575_v38 = vld [vmem:[#allocation2 + $0x19e8] ss:$16 sps:$4 sm:$0xff]   ;;  %v12580_v39 = vld [vmem:[#allocation2 + $0x1a04] ss:$16 sps:$4 sm:$0xff]  }
 0x33a   :  { %7212 = vmatprep.mubr.bf16.mxu0 %v9818_v40  ;;  %8060 = vmatprep.mubr.bf16.mxu1 %v9818_v40  ;;  %v12583_v40 = vld [vmem:[#allocation2 + $0x1a0c] ss:$16 sps:$4 sm:$0xff]  }
 0x33c   :  { %7226 = vmatpush1.bf16.msra.mxu0 %v12488_v36  ;;  %8074 = vmatpush1.bf16.msra.mxu1 %v12491_v37  ;;  %v9787_v36 = vcombine.low %v13486_v44, %v13491_v45  ;;  %v103_v37 = vld [vmem:[%s13597_s0 + $0x160] sm:$0xff]  ;;  %v12587_v45 = vld [vmem:[#allocation2 + $0x1a28] ss:$16 sps:$4 sm:$0xff]  }
 0x33d   :  { %7227 = vmatprep.subr.bf16.mxu0 %v12496_v33  ;;  %8075 = vmatprep.subr.bf16.mxu1 %v12499_v35  ;;  %v119_v33 = vld [vmem:[%s13597_s0 + $0x1e0] sm:$0xff] }
 0x33e   :  { %v12578_v35 = vld [vmem:[#allocation2 + $0x1a00] ss:$16 sps:$4 sm:$0xff]  }
 0x33f   :  { %7213 = vmatmul.mubr.bf16.gmra.mrb[4].mxu0 %v9817_v42  ;;  %8061 = vmatmul.mubr.bf16.gmra.mrb[4].mxu1 %v9817_v42  ;;  %v12581_v42 = vld [vmem:[#allocation2 + $0x1a08] ss:$16 sps:$4 sm:$0xff]   ;;  %v12584_v44 = vld [vmem:[#allocation2 + $0x1a20] ss:$16 sps:$4 sm:$0xff]  }
 0x340   :  { %7228 = vmatpush1.bf16.msra.mxu0 %v12494_v46  ;;  %8076 = vmatpush1.bf16.msra.mxu1 %v12497_v47  ;;  %v12586_v46 = vld [vmem:[#allocation2 + $0x1a24] ss:$16 sps:$4 sm:$0xff]   ;;  %v12589_v47 = vld [vmem:[#allocation2 + $0x1a2c] ss:$16 sps:$4 sm:$0xff]  }
 0x341   :  { %7229 = vmatprep.subr.bf16.mxu0 %v12502_v48  ;;  %8077 = vmatprep.subr.bf16.mxu1 %v12505_v49  ;;  %v9820_v48 = vcombine.high %v103_v37, %v119_v33  ;;  %v12592_v49 = vld [vmem:[#allocation2 + $0x1a44] ss:$16 sps:$4 sm:$0xff]  }
 0x342   :  { %7255 = vmatprep.mubr.bf16.mxu0 %v9788_v50  ;;  %8103 = vmatprep.mubr.bf16.mxu1 %v9788_v50  ;;  %v12595_v50 = vld [vmem:[#allocation2 + $0x1a4c] ss:$16 sps:$4 sm:$0xff]  }
 0x344   :  { %7230 = vmatpush1.bf16.msra.mxu0 %v12500_v51  ;;  %8078 = vmatpush1.bf16.msra.mxu1 %v12503_v52  ;;  %v9819_v51 = vcombine.low %v103_v37, %v119_v33  ;;  %v13506_v52 = vld [vmem:[%s13597_s0 + $0x68] sm:$0xff]  ;;  %v12670_v33 = vld [vmem:[#allocation2 + $0x1be4] ss:$16 sps:$4 sm:$0xff]  }
 0x345   :  { %7231 = vmatprep.subr.bf16.mxu0 %v12508_v53  ;;  %8079 = vmatprep.subr.bf16.mxu1 %v12511_v54  ;;  %v13511_v53 = vld [vmem:[%s13597_s0 + $0xe8] sm:$0xff]  ;;  %v12590_v54 = vld [vmem:[#allocation2 + $0x1a40] ss:$16 sps:$4 sm:$0xff]  }
 0x346   :  { %v12665_v37 = vld [vmem:[#allocation2 + $0x1bc8] ss:$16 sps:$4 sm:$0xff]  }
 0x348   :  { %7232 = vmatpush1.bf16.msra.mxu0 %v12506_v55  ;;  %8080 = vmatpush1.bf16.msra.mxu1 %v12509_v56  ;;  %v12593_v55 = vld [vmem:[#allocation2 + $0x1a48] ss:$16 sps:$4 sm:$0xff]   ;;  %v12598_v56 = vld [vmem:[#allocation2 + $0x1a64] ss:$16 sps:$4 sm:$0xff]  }
 0x349   :  { %7233 = vmatprep.subr.bf16.mxu0 %v12514_v57  ;;  %8081 = vmatprep.subr.bf16.mxu1 %v12517_v58  ;;  %v12601_v57 = vld [vmem:[#allocation2 + $0x1a6c] ss:$16 sps:$4 sm:$0xff]   ;;  %v9790_v58 = vcombine.high %v13506_v52, %v13511_v53 }
 0x34c   :  { %7234 = vmatpush1.bf16.msra.mxu0 %v12512_v59  ;;  %8082 = vmatpush1.bf16.msra.mxu1 %v12515_v60  ;;  %v12596_v59 = vld [vmem:[#allocation2 + $0x1a60] ss:$16 sps:$4 sm:$0xff]   ;;  %v12599_v60 = vld [vmem:[#allocation2 + $0x1a68] ss:$16 sps:$4 sm:$0xff]  }
 0x34d   :  { %7235 = vmatprep.subr.bf16.mxu0 %v12520_v61  ;;  %8083 = vmatprep.subr.bf16.mxu1 %v12523_v62  ;;  %v12604_v61 = vld [vmem:[#allocation2 + $0x1a84] ss:$16 sps:$4 sm:$0xff]   ;;  %v12607_v62 = vld [vmem:[#allocation2 + $0x1a8c] ss:$16 sps:$4 sm:$0xff]  }
 0x350   :  { %7236 = vmatpush1.bf16.msra.mxu0 %v12518_v63  ;;  %8084 = vmatpush1.bf16.msra.mxu1 %v12521_v0  ;;  %v12602_v63 = vld [vmem:[#allocation2 + $0x1a80] ss:$16 sps:$4 sm:$0xff]   ;;  %v12605_v0 = vld [vmem:[#allocation2 + $0x1a88] ss:$16 sps:$4 sm:$0xff]  }
 0x351   :  { %7237 = vmatprep.subr.bf16.mxu0 %v12526_v1  ;;  %8085 = vmatprep.subr.bf16.mxu1 %v12529_v2  ;;  %v12610_v1 = vld [vmem:[#allocation2 + $0x1aa4] ss:$16 sps:$4 sm:$0xff]   ;;  %v12613_v2 = vld [vmem:[#allocation2 + $0x1aac] ss:$16 sps:$4 sm:$0xff]  }
 0x354   :  { %7238 = vmatpush1.bf16.msra.mxu0 %v12524_v3  ;;  %8086 = vmatpush1.bf16.msra.mxu1 %v12527_v4  ;;  %v12608_v3 = vld [vmem:[#allocation2 + $0x1aa0] ss:$16 sps:$4 sm:$0xff]   ;;  %v12611_v4 = vld [vmem:[#allocation2 + $0x1aa8] ss:$16 sps:$4 sm:$0xff]  }
 0x355   :  { %7239 = vmatprep.subr.bf16.mxu0 %v12532_v5  ;;  %8087 = vmatprep.subr.bf16.mxu1 %v12535_v6  ;;  %v12616_v5 = vld [vmem:[#allocation2 + $0x1ac4] ss:$16 sps:$4 sm:$0xff]   ;;  %v12619_v6 = vld [vmem:[#allocation2 + $0x1acc] ss:$16 sps:$4 sm:$0xff]  }
 0x358   :  { %7240 = vmatpush1.bf16.msra.mxu0 %v12530_v7  ;;  %8088 = vmatpush1.bf16.msra.mxu1 %v12533_v8  ;;  %v12614_v7 = vld [vmem:[#allocation2 + $0x1ac0] ss:$16 sps:$4 sm:$0xff]   ;;  %v12617_v8 = vld [vmem:[#allocation2 + $0x1ac8] ss:$16 sps:$4 sm:$0xff]  }
 0x359   :  { %7241 = vmatprep.subr.bf16.mxu0 %v12538_v9  ;;  %8089 = vmatprep.subr.bf16.mxu1 %v12541_v10  ;;  %v12622_v9 = vld [vmem:[#allocation2 + $0x1ae4] ss:$16 sps:$4 sm:$0xff]   ;;  %v12625_v10 = vld [vmem:[#allocation2 + $0x1aec] ss:$16 sps:$4 sm:$0xff]  }
 0x35c   :  { %7242 = vmatpush1.bf16.msra.mxu0 %v12536_v11  ;;  %8090 = vmatpush1.bf16.msra.mxu1 %v12539_v12  ;;  %v12620_v11 = vld [vmem:[#allocation2 + $0x1ae0] ss:$16 sps:$4 sm:$0xff]   ;;  %v12623_v12 = vld [vmem:[#allocation2 + $0x1ae8] ss:$16 sps:$4 sm:$0xff]  }
 0x35d   :  { %7243 = vmatprep.subr.bf16.mxu0 %v12544_v13  ;;  %8091 = vmatprep.subr.bf16.mxu1 %v12547_v14  ;;  %v12628_v13 = vld [vmem:[#allocation2 + $0x1b04] ss:$16 sps:$4 sm:$0xff]   ;;  %v12631_v14 = vld [vmem:[#allocation2 + $0x1b0c] ss:$16 sps:$4 sm:$0xff]  }
 0x360   :  { %7244 = vmatpush1.bf16.msra.mxu0 %v12542_v15  ;;  %8092 = vmatpush1.bf16.msra.mxu1 %v12545_v16  ;;  %v12626_v15 = vld [vmem:[#allocation2 + $0x1b00] ss:$16 sps:$4 sm:$0xff]   ;;  %v12629_v16 = vld [vmem:[#allocation2 + $0x1b08] ss:$16 sps:$4 sm:$0xff]  }
 0x361   :  { %7245 = vmatprep.subr.bf16.mxu0 %v12550_v17  ;;  %8093 = vmatprep.subr.bf16.mxu1 %v12553_v18  ;;  %v12634_v17 = vld [vmem:[#allocation2 + $0x1b24] ss:$16 sps:$4 sm:$0xff]   ;;  %v12637_v18 = vld [vmem:[#allocation2 + $0x1b2c] ss:$16 sps:$4 sm:$0xff]  }
 0x364   :  { %7246 = vmatpush1.bf16.msra.mxu0 %v12548_v19  ;;  %8094 = vmatpush1.bf16.msra.mxu1 %v12551_v20  ;;  %v12632_v19 = vld [vmem:[#allocation2 + $0x1b20] ss:$16 sps:$4 sm:$0xff]   ;;  %v12635_v20 = vld [vmem:[#allocation2 + $0x1b28] ss:$16 sps:$4 sm:$0xff]  }
 0x365   :  { %7247 = vmatprep.subr.bf16.mxu0 %v12556_v21  ;;  %8095 = vmatprep.subr.bf16.mxu1 %v12559_v22  ;;  %v12640_v21 = vld [vmem:[#allocation2 + $0x1b44] ss:$16 sps:$4 sm:$0xff]   ;;  %v12643_v22 = vld [vmem:[#allocation2 + $0x1b4c] ss:$16 sps:$4 sm:$0xff]  }
 0x368   :  { %7248 = vmatpush1.bf16.msra.mxu0 %v12554_v23  ;;  %8096 = vmatpush1.bf16.msra.mxu1 %v12557_v24  ;;  %v12638_v23 = vld [vmem:[#allocation2 + $0x1b40] ss:$16 sps:$4 sm:$0xff]   ;;  %v12641_v24 = vld [vmem:[#allocation2 + $0x1b48] ss:$16 sps:$4 sm:$0xff]  }
 0x369   :  { %7249 = vmatprep.subr.bf16.mxu0 %v12562_v26  ;;  %8097 = vmatprep.subr.bf16.mxu1 %v12565_v28  ;;  %v12646_v26 = vld [vmem:[#allocation2 + $0x1b64] ss:$16 sps:$4 sm:$0xff]   ;;  %v12649_v28 = vld [vmem:[#allocation2 + $0x1b6c] ss:$16 sps:$4 sm:$0xff]  }
 0x36c   :  { %7250 = vmatpush1.bf16.msra.mxu0 %v12560_v29  ;;  %8098 = vmatpush1.bf16.msra.mxu1 %v12563_v30  ;;  %v12644_v29 = vld [vmem:[#allocation2 + $0x1b60] ss:$16 sps:$4 sm:$0xff]   ;;  %v12647_v30 = vld [vmem:[#allocation2 + $0x1b68] ss:$16 sps:$4 sm:$0xff]  }
 0x36d   :  { %7251 = vmatprep.subr.bf16.mxu0 %v12568_v31  ;;  %8099 = vmatprep.subr.bf16.mxu1 %v12571_v32  ;;  %v12652_v31 = vld [vmem:[#allocation2 + $0x1b84] ss:$16 sps:$4 sm:$0xff]   ;;  %v12655_v32 = vld [vmem:[#allocation2 + $0x1b8c] ss:$16 sps:$4 sm:$0xff]  }
 0x370   :  { %7252 = vmatpush1.bf16.msra.mxu0 %v12566_v41  ;;  %8100 = vmatpush1.bf16.msra.mxu1 %v12569_v43  ;;  %v12650_v41 = vld [vmem:[#allocation2 + $0x1b80] ss:$16 sps:$4 sm:$0xff]   ;;  %v12653_v43 = vld [vmem:[#allocation2 + $0x1b88] ss:$16 sps:$4 sm:$0xff]  }
 0x371   :  { %7253 = vmatprep.subr.bf16.mxu0 %v12574_v25  ;;  %8101 = vmatprep.subr.bf16.mxu1 %v12577_v27  ;;  %v12658_v25 = vld [vmem:[#allocation2 + $0x1ba4] ss:$16 sps:$4 sm:$0xff]   ;;  %v12661_v27 = vld [vmem:[#allocation2 + $0x1bac] ss:$16 sps:$4 sm:$0xff]  }
 0x374   :  { %7254 = vmatpush1.bf16.msra.mxu0 %v12572_v34  ;;  %8102 = vmatpush1.bf16.msra.mxu1 %v12575_v38  ;;  %v12656_v34 = vld [vmem:[#allocation2 + $0x1ba0] ss:$16 sps:$4 sm:$0xff]   ;;  %v12659_v38 = vld [vmem:[#allocation2 + $0x1ba8] ss:$16 sps:$4 sm:$0xff]  }
 0x375   :  { %7276 = vmatprep.subr.bf16.mxu0 %v12580_v39  ;;  %8124 = vmatprep.subr.bf16.mxu1 %v12583_v40  ;;  %v12664_v39 = vld [vmem:[#allocation2 + $0x1bc4] ss:$16 sps:$4 sm:$0xff]   ;;  %v12667_v40 = vld [vmem:[#allocation2 + $0x1bcc] ss:$16 sps:$4 sm:$0xff]  }
 0x377   :  { %7256 = vmatmul.mubr.bf16.vlgmr.msra.gmra.mrb[0].mxu0 %v9787_v36  ;;  %8104 = vmatmul.mubr.bf16.vlgmr.msra.gmra.mrb[0].mxu1 %v9787_v36  ;;  %v12662_v36 = vld [vmem:[#allocation2 + $0x1bc0] ss:$16 sps:$4 sm:$0xff]  }
 0x378   :  { %7277 = vmatpush1.bf16.msra.mxu0 %v12578_v35  ;;  %8125 = vmatpush1.bf16.msra.mxu1 %v12581_v42  ;;  %v12673_v35 = vld [vmem:[#allocation2 + $0x1bec] ss:$16 sps:$4 sm:$0xff]   ;;  %v12668_v42 = vld [vmem:[#allocation2 + $0x1be0] ss:$16 sps:$4 sm:$0xff]  }
 0x379   :  { %7278 = vmatprep.subr.bf16.mxu0 %v12586_v46  ;;  %8126 = vmatprep.subr.bf16.mxu1 %v12589_v47  ;;  %v12671_v46 = vld [vmem:[#allocation2 + $0x1be8] ss:$16 sps:$4 sm:$0xff]   ;;  %v12676_v47 = vld [vmem:[#allocation2 + $0x1c04] ss:$16 sps:$4 sm:$0xff]  }
 0x37a   :  { %7265 = vmatprep.mubr.bf16.mxu0 %v9820_v48  ;;  %8113 = vmatprep.mubr.bf16.mxu1 %v9820_v48  ;;  %v12679_v48 = vld [vmem:[#allocation2 + $0x1c0c] ss:$16 sps:$4 sm:$0xff]  }
 0x37c   :  { %7279 = vmatpush1.bf16.msra.mxu0 %v12584_v44  ;;  %8127 = vmatpush1.bf16.msra.mxu1 %v12587_v45  ;;  %v9789_v44 = vcombine.low %v13506_v52, %v13511_v53  ;;  %v104_v45 = vld [vmem:[%s13597_s0 + $0x168] sm:$0xff]  ;;  %v12680_v52 = vld [vmem:[#allocation2 + $0x1c20] ss:$16 sps:$4 sm:$0xff]  }
 0x37d   :  { %7280 = vmatprep.subr.bf16.mxu0 %v12592_v49  ;;  %8128 = vmatprep.subr.bf16.mxu1 %v12595_v50  ;;  %v120_v49 = vld [vmem:[%s13597_s0 + $0x1e8] sm:$0xff]  ;;  %v12674_v50 = vld [vmem:[#allocation2 + $0x1c00] ss:$16 sps:$4 sm:$0xff]  }
 0x37e   :  { %v12683_v53 = vld [vmem:[#allocation2 + $0x1c28] ss:$16 sps:$4 sm:$0xff]  }
 0x37f   :  { %7266 = vmatmul.mubr.bf16.gmra.mrb[4].mxu0 %v9819_v51  ;;  %8114 = vmatmul.mubr.bf16.gmra.mrb[4].mxu1 %v9819_v51  ;;  %v12677_v51 = vld [vmem:[#allocation2 + $0x1c08] ss:$16 sps:$4 sm:$0xff]  }
 0x380   :  { %7281 = vmatpush1.bf16.msra.mxu0 %v12590_v54  ;;  %8129 = vmatpush1.bf16.msra.mxu1 %v12593_v55  ;;  %v12682_v54 = vld [vmem:[#allocation2 + $0x1c24] ss:$16 sps:$4 sm:$0xff]   ;;  %v12685_v55 = vld [vmem:[#allocation2 + $0x1c2c] ss:$16 sps:$4 sm:$0xff]  }
 0x381   :  { %7282 = vmatprep.subr.bf16.mxu0 %v12598_v56  ;;  %8130 = vmatprep.subr.bf16.mxu1 %v12601_v57  ;;  %v9822_v56 = vcombine.high %v104_v45, %v120_v49  ;;  %v12688_v57 = vld [vmem:[#allocation2 + $0x1c44] ss:$16 sps:$4 sm:$0xff]  }
 0x382   :  { %7308 = vmatprep.mubr.bf16.mxu0 %v9790_v58  ;;  %8156 = vmatprep.mubr.bf16.mxu1 %v9790_v58  ;;  %v12691_v58 = vld [vmem:[#allocation2 + $0x1c4c] ss:$16 sps:$4 sm:$0xff]  }
 0x384   :  { %7283 = vmatpush1.bf16.msra.mxu0 %v12596_v59  ;;  %8131 = vmatpush1.bf16.msra.mxu1 %v12599_v60  ;;  %v9821_v59 = vcombine.low %v104_v45, %v120_v49  ;;  %v13526_v60 = vld [vmem:[%s13597_s0 + $0x70] sm:$0xff]  ;;  %v12761_v45 = vld [vmem:[#allocation2 + $0x1dc8] ss:$16 sps:$4 sm:$0xff]  }
 0x385   :  { %7284 = vmatprep.subr.bf16.mxu0 %v12604_v61  ;;  %8132 = vmatprep.subr.bf16.mxu1 %v12607_v62  ;;  %v13531_v61 = vld [vmem:[%s13597_s0 + $0xf0] sm:$0xff] }
 0x386   :  { %v12686_v62 = vld [vmem:[#allocation2 + $0x1c40] ss:$16 sps:$4 sm:$0xff]   ;;  %v12766_v49 = vld [vmem:[#allocation2 + $0x1de4] ss:$16 sps:$4 sm:$0xff]  }
 0x388   :  { %7285 = vmatpush1.bf16.msra.mxu0 %v12602_v63  ;;  %8133 = vmatpush1.bf16.msra.mxu1 %v12605_v0  ;;  %v12689_v63 = vld [vmem:[#allocation2 + $0x1c48] ss:$16 sps:$4 sm:$0xff]   ;;  %v12694_v0 = vld [vmem:[#allocation2 + $0x1c64] ss:$16 sps:$4 sm:$0xff]  }
 0x389   :  { %7286 = vmatprep.subr.bf16.mxu0 %v12610_v1  ;;  %8134 = vmatprep.subr.bf16.mxu1 %v12613_v2  ;;  %v12697_v1 = vld [vmem:[#allocation2 + $0x1c6c] ss:$16 sps:$4 sm:$0xff]   ;;  %v9792_v2 = vcombine.high %v13526_v60, %v13531_v61 }
 0x38c   :  { %7287 = vmatpush1.bf16.msra.mxu0 %v12608_v3  ;;  %8135 = vmatpush1.bf16.msra.mxu1 %v12611_v4  ;;  %v12692_v3 = vld [vmem:[#allocation2 + $0x1c60] ss:$16 sps:$4 sm:$0xff]   ;;  %v12695_v4 = vld [vmem:[#allocation2 + $0x1c68] ss:$16 sps:$4 sm:$0xff]  }
 0x38d   :  { %7288 = vmatprep.subr.bf16.mxu0 %v12616_v5  ;;  %8136 = vmatprep.subr.bf16.mxu1 %v12619_v6  ;;  %v12700_v5 = vld [vmem:[#allocation2 + $0x1c84] ss:$16 sps:$4 sm:$0xff]   ;;  %v12703_v6 = vld [vmem:[#allocation2 + $0x1c8c] ss:$16 sps:$4 sm:$0xff]  }
 0x390   :  { %7289 = vmatpush1.bf16.msra.mxu0 %v12614_v7  ;;  %8137 = vmatpush1.bf16.msra.mxu1 %v12617_v8  ;;  %v12698_v7 = vld [vmem:[#allocation2 + $0x1c80] ss:$16 sps:$4 sm:$0xff]   ;;  %v12701_v8 = vld [vmem:[#allocation2 + $0x1c88] ss:$16 sps:$4 sm:$0xff]  }
 0x391   :  { %7290 = vmatprep.subr.bf16.mxu0 %v12622_v9  ;;  %8138 = vmatprep.subr.bf16.mxu1 %v12625_v10  ;;  %v12706_v9 = vld [vmem:[#allocation2 + $0x1ca4] ss:$16 sps:$4 sm:$0xff]   ;;  %v12709_v10 = vld [vmem:[#allocation2 + $0x1cac] ss:$16 sps:$4 sm:$0xff]  }
 0x394   :  { %7291 = vmatpush1.bf16.msra.mxu0 %v12620_v11  ;;  %8139 = vmatpush1.bf16.msra.mxu1 %v12623_v12  ;;  %v12704_v11 = vld [vmem:[#allocation2 + $0x1ca0] ss:$16 sps:$4 sm:$0xff]   ;;  %v12707_v12 = vld [vmem:[#allocation2 + $0x1ca8] ss:$16 sps:$4 sm:$0xff]  }
 0x395   :  { %7292 = vmatprep.subr.bf16.mxu0 %v12628_v13  ;;  %8140 = vmatprep.subr.bf16.mxu1 %v12631_v14  ;;  %v12712_v13 = vld [vmem:[#allocation2 + $0x1cc4] ss:$16 sps:$4 sm:$0xff]   ;;  %v12715_v14 = vld [vmem:[#allocation2 + $0x1ccc] ss:$16 sps:$4 sm:$0xff]  }
 0x398   :  { %7293 = vmatpush1.bf16.msra.mxu0 %v12626_v15  ;;  %8141 = vmatpush1.bf16.msra.mxu1 %v12629_v16  ;;  %v12710_v15 = vld [vmem:[#allocation2 + $0x1cc0] ss:$16 sps:$4 sm:$0xff]   ;;  %v12713_v16 = vld [vmem:[#allocation2 + $0x1cc8] ss:$16 sps:$4 sm:$0xff]  }
 0x399   :  { %7294 = vmatprep.subr.bf16.mxu0 %v12634_v17  ;;  %8142 = vmatprep.subr.bf16.mxu1 %v12637_v18  ;;  %v12718_v17 = vld [vmem:[#allocation2 + $0x1ce4] ss:$16 sps:$4 sm:$0xff]   ;;  %v12721_v18 = vld [vmem:[#allocation2 + $0x1cec] ss:$16 sps:$4 sm:$0xff]  }
 0x39c   :  { %7295 = vmatpush1.bf16.msra.mxu0 %v12632_v19  ;;  %8143 = vmatpush1.bf16.msra.mxu1 %v12635_v20  ;;  %v12716_v19 = vld [vmem:[#allocation2 + $0x1ce0] ss:$16 sps:$4 sm:$0xff]   ;;  %v12719_v20 = vld [vmem:[#allocation2 + $0x1ce8] ss:$16 sps:$4 sm:$0xff]  }
 0x39d   :  { %7296 = vmatprep.subr.bf16.mxu0 %v12640_v21  ;;  %8144 = vmatprep.subr.bf16.mxu1 %v12643_v22  ;;  %v12724_v21 = vld [vmem:[#allocation2 + $0x1d04] ss:$16 sps:$4 sm:$0xff]   ;;  %v12727_v22 = vld [vmem:[#allocation2 + $0x1d0c] ss:$16 sps:$4 sm:$0xff]  }
 0x3a0   :  { %7297 = vmatpush1.bf16.msra.mxu0 %v12638_v23  ;;  %8145 = vmatpush1.bf16.msra.mxu1 %v12641_v24  ;;  %v12722_v23 = vld [vmem:[#allocation2 + $0x1d00] ss:$16 sps:$4 sm:$0xff]   ;;  %v12725_v24 = vld [vmem:[#allocation2 + $0x1d08] ss:$16 sps:$4 sm:$0xff]  }
 0x3a1   :  { %7298 = vmatprep.subr.bf16.mxu0 %v12646_v26  ;;  %8146 = vmatprep.subr.bf16.mxu1 %v12649_v28  ;;  %v12730_v26 = vld [vmem:[#allocation2 + $0x1d24] ss:$16 sps:$4 sm:$0xff]   ;;  %v12733_v28 = vld [vmem:[#allocation2 + $0x1d2c] ss:$16 sps:$4 sm:$0xff]  }
 0x3a4   :  { %7299 = vmatpush1.bf16.msra.mxu0 %v12644_v29  ;;  %8147 = vmatpush1.bf16.msra.mxu1 %v12647_v30  ;;  %v12728_v29 = vld [vmem:[#allocation2 + $0x1d20] ss:$16 sps:$4 sm:$0xff]   ;;  %v12731_v30 = vld [vmem:[#allocation2 + $0x1d28] ss:$16 sps:$4 sm:$0xff]  }
 0x3a5   :  { %7300 = vmatprep.subr.bf16.mxu0 %v12652_v31  ;;  %8148 = vmatprep.subr.bf16.mxu1 %v12655_v32  ;;  %v12736_v31 = vld [vmem:[#allocation2 + $0x1d44] ss:$16 sps:$4 sm:$0xff]   ;;  %v12739_v32 = vld [vmem:[#allocation2 + $0x1d4c] ss:$16 sps:$4 sm:$0xff]  }
 0x3a8   :  { %7301 = vmatpush1.bf16.msra.mxu0 %v12650_v41  ;;  %8149 = vmatpush1.bf16.msra.mxu1 %v12653_v43  ;;  %v12734_v41 = vld [vmem:[#allocation2 + $0x1d40] ss:$16 sps:$4 sm:$0xff]   ;;  %v12737_v43 = vld [vmem:[#allocation2 + $0x1d48] ss:$16 sps:$4 sm:$0xff]  }
 0x3a9   :  { %7302 = vmatprep.subr.bf16.mxu0 %v12658_v25  ;;  %8150 = vmatprep.subr.bf16.mxu1 %v12661_v27  ;;  %v12742_v25 = vld [vmem:[#allocation2 + $0x1d64] ss:$16 sps:$4 sm:$0xff]   ;;  %v12745_v27 = vld [vmem:[#allocation2 + $0x1d6c] ss:$16 sps:$4 sm:$0xff]  }
 0x3ac   :  { %7303 = vmatpush1.bf16.msra.mxu0 %v12656_v34  ;;  %8151 = vmatpush1.bf16.msra.mxu1 %v12659_v38  ;;  %v12740_v34 = vld [vmem:[#allocation2 + $0x1d60] ss:$16 sps:$4 sm:$0xff]   ;;  %v12743_v38 = vld [vmem:[#allocation2 + $0x1d68] ss:$16 sps:$4 sm:$0xff]  }
 0x3ad   :  { %7304 = vmatprep.subr.bf16.mxu0 %v12664_v39  ;;  %8152 = vmatprep.subr.bf16.mxu1 %v12667_v40  ;;  %v12748_v39 = vld [vmem:[#allocation2 + $0x1d84] ss:$16 sps:$4 sm:$0xff]   ;;  %v12751_v40 = vld [vmem:[#allocation2 + $0x1d8c] ss:$16 sps:$4 sm:$0xff]  }
 0x3b0   :  { %7305 = vmatpush1.bf16.msra.mxu0 %v12662_v36  ;;  %8153 = vmatpush1.bf16.msra.mxu1 %v12665_v37  ;;  %v12746_v36 = vld [vmem:[#allocation2 + $0x1d80] ss:$16 sps:$4 sm:$0xff]   ;;  %v12749_v37 = vld [vmem:[#allocation2 + $0x1d88] ss:$16 sps:$4 sm:$0xff]  }
 0x3b1   :  { %7306 = vmatprep.subr.bf16.mxu0 %v12670_v33  ;;  %8154 = vmatprep.subr.bf16.mxu1 %v12673_v35  ;;  %v12754_v33 = vld [vmem:[#allocation2 + $0x1da4] ss:$16 sps:$4 sm:$0xff]   ;;  %v12757_v35 = vld [vmem:[#allocation2 + $0x1dac] ss:$16 sps:$4 sm:$0xff]  }
 0x3b4   :  { %7307 = vmatpush1.bf16.msra.mxu0 %v12668_v42  ;;  %8155 = vmatpush1.bf16.msra.mxu1 %v12671_v46  ;;  %v12752_v42 = vld [vmem:[#allocation2 + $0x1da0] ss:$16 sps:$4 sm:$0xff]   ;;  %v12755_v46 = vld [vmem:[#allocation2 + $0x1da8] ss:$16 sps:$4 sm:$0xff]  }
 0x3b5   :  { %7329 = vmatprep.subr.bf16.mxu0 %v12676_v47  ;;  %8177 = vmatprep.subr.bf16.mxu1 %v12679_v48  ;;  %v12760_v47 = vld [vmem:[#allocation2 + $0x1dc4] ss:$16 sps:$4 sm:$0xff]   ;;  %v12763_v48 = vld [vmem:[#allocation2 + $0x1dcc] ss:$16 sps:$4 sm:$0xff]  }
 0x3b7   :  { %7309 = vmatmul.mubr.bf16.vlgmr.msra.gmra.mrb[0].mxu0 %v9789_v44  ;;  %8157 = vmatmul.mubr.bf16.vlgmr.msra.gmra.mrb[0].mxu1 %v9789_v44  ;;  %v12758_v44 = vld [vmem:[#allocation2 + $0x1dc0] ss:$16 sps:$4 sm:$0xff]  }
 0x3b8   :  { %7330 = vmatpush1.bf16.msra.mxu0 %v12674_v50  ;;  %8178 = vmatpush1.bf16.msra.mxu1 %v12677_v51  ;;  %v12769_v50 = vld [vmem:[#allocation2 + $0x1dec] ss:$16 sps:$4 sm:$0xff]   ;;  %v12764_v51 = vld [vmem:[#allocation2 + $0x1de0] ss:$16 sps:$4 sm:$0xff]  }
 0x3b9   :  { %7331 = vmatprep.subr.bf16.mxu0 %v12682_v54  ;;  %8179 = vmatprep.subr.bf16.mxu1 %v12685_v55  ;;  %v12767_v54 = vld [vmem:[#allocation2 + $0x1de8] ss:$16 sps:$4 sm:$0xff]   ;;  %v12772_v55 = vld [vmem:[#allocation2 + $0x1e04] ss:$16 sps:$4 sm:$0xff]  }
 0x3ba   :  { %7318 = vmatprep.mubr.bf16.mxu0 %v9822_v56  ;;  %8166 = vmatprep.mubr.bf16.mxu1 %v9822_v56  ;;  %v12775_v56 = vld [vmem:[#allocation2 + $0x1e0c] ss:$16 sps:$4 sm:$0xff]  }
 0x3bc   :  { %7332 = vmatpush1.bf16.msra.mxu0 %v12680_v52  ;;  %8180 = vmatpush1.bf16.msra.mxu1 %v12683_v53  ;;  %v9791_v52 = vcombine.low %v13526_v60, %v13531_v61  ;;  %v105_v53 = vld [vmem:[%s13597_s0 + $0x170] sm:$0xff]  ;;  %v12779_v61 = vld [vmem:[#allocation2 + $0x1e28] ss:$16 sps:$4 sm:$0xff]  }
 0x3bd   :  { %7333 = vmatprep.subr.bf16.mxu0 %v12688_v57  ;;  %8181 = vmatprep.subr.bf16.mxu1 %v12691_v58  ;;  %v121_v57 = vld [vmem:[%s13597_s0 + $0x1f0] sm:$0xff] }
 0x3be   :  { %v12770_v58 = vld [vmem:[#allocation2 + $0x1e00] ss:$16 sps:$4 sm:$0xff]  }
 0x3bf   :  { %7319 = vmatmul.mubr.bf16.gmra.mrb[4].mxu0 %v9821_v59  ;;  %8167 = vmatmul.mubr.bf16.gmra.mrb[4].mxu1 %v9821_v59  ;;  %v12773_v59 = vld [vmem:[#allocation2 + $0x1e08] ss:$16 sps:$4 sm:$0xff]   ;;  %v12776_v60 = vld [vmem:[#allocation2 + $0x1e20] ss:$16 sps:$4 sm:$0xff]  }
 0x3c0   :  { %7334 = vmatpush1.bf16.msra.mxu0 %v12686_v62  ;;  %8182 = vmatpush1.bf16.msra.mxu1 %v12689_v63  ;;  %v12778_v62 = vld [vmem:[#allocation2 + $0x1e24] ss:$16 sps:$4 sm:$0xff]   ;;  %v12781_v63 = vld [vmem:[#allocation2 + $0x1e2c] ss:$16 sps:$4 sm:$0xff]  }
 0x3c1   :  { %7335 = vmatprep.subr.bf16.mxu0 %v12694_v0  ;;  %8183 = vmatprep.subr.bf16.mxu1 %v12697_v1  ;;  %v9824_v0 = vcombine.high %v105_v53, %v121_v57  ;;  %v12784_v1 = vld [vmem:[#allocation2 + $0x1e44] ss:$16 sps:$4 sm:$0xff]  }
 0x3c2   :  { %7361 = vmatprep.mubr.bf16.mxu0 %v9792_v2  ;;  %8209 = vmatprep.mubr.bf16.mxu1 %v9792_v2  ;;  %v12787_v2 = vld [vmem:[#allocation2 + $0x1e4c] ss:$16 sps:$4 sm:$0xff]  }
 0x3c4   :  { %7336 = vmatpush1.bf16.msra.mxu0 %v12692_v3  ;;  %8184 = vmatpush1.bf16.msra.mxu1 %v12695_v4  ;;  %v9823_v3 = vcombine.low %v105_v53, %v121_v57  ;;  %v13546_v4 = vld [vmem:[%s13597_s0 + $0x78] sm:$0xff]  ;;  %v12862_v57 = vld [vmem:[#allocation2 + $0x1fe4] ss:$16 sps:$4 sm:$0xff]  }
 0x3c5   :  { %7337 = vmatprep.subr.bf16.mxu0 %v12700_v5  ;;  %8185 = vmatprep.subr.bf16.mxu1 %v12703_v6  ;;  %v13551_v5 = vld [vmem:[%s13597_s0 + $0xf8] sm:$0xff]  ;;  %v12782_v6 = vld [vmem:[#allocation2 + $0x1e40] ss:$16 sps:$4 sm:$0xff]  }
 0x3c6   :  { %v12857_v53 = vld [vmem:[#allocation2 + $0x1fc8] ss:$16 sps:$4 sm:$0xff]  }
 0x3c8   :  { %7338 = vmatpush1.bf16.msra.mxu0 %v12698_v7  ;;  %8186 = vmatpush1.bf16.msra.mxu1 %v12701_v8  ;;  %v12785_v7 = vld [vmem:[#allocation2 + $0x1e48] ss:$16 sps:$4 sm:$0xff]   ;;  %v12790_v8 = vld [vmem:[#allocation2 + $0x1e64] ss:$16 sps:$4 sm:$0xff]  }
 0x3c9   :  { %7339 = vmatprep.subr.bf16.mxu0 %v12706_v9  ;;  %8187 = vmatprep.subr.bf16.mxu1 %v12709_v10  ;;  %v12793_v9 = vld [vmem:[#allocation2 + $0x1e6c] ss:$16 sps:$4 sm:$0xff]   ;;  %v9794_v10 = vcombine.high %v13546_v4, %v13551_v5 }
 0x3cc   :  { %7340 = vmatpush1.bf16.msra.mxu0 %v12704_v11  ;;  %8188 = vmatpush1.bf16.msra.mxu1 %v12707_v12  ;;  %v12788_v11 = vld [vmem:[#allocation2 + $0x1e60] ss:$16 sps:$4 sm:$0xff]   ;;  %v12791_v12 = vld [vmem:[#allocation2 + $0x1e68] ss:$16 sps:$4 sm:$0xff]  }
 0x3cd   :  { %7341 = vmatprep.subr.bf16.mxu0 %v12712_v13  ;;  %8189 = vmatprep.subr.bf16.mxu1 %v12715_v14  ;;  %v12796_v13 = vld [vmem:[#allocation2 + $0x1e84] ss:$16 sps:$4 sm:$0xff]   ;;  %v12799_v14 = vld [vmem:[#allocation2 + $0x1e8c] ss:$16 sps:$4 sm:$0xff]  }
 0x3d0   :  { %7342 = vmatpush1.bf16.msra.mxu0 %v12710_v15  ;;  %8190 = vmatpush1.bf16.msra.mxu1 %v12713_v16  ;;  %v12794_v15 = vld [vmem:[#allocation2 + $0x1e80] ss:$16 sps:$4 sm:$0xff]   ;;  %v12797_v16 = vld [vmem:[#allocation2 + $0x1e88] ss:$16 sps:$4 sm:$0xff]  }
 0x3d1   :  { %7343 = vmatprep.subr.bf16.mxu0 %v12718_v17  ;;  %8191 = vmatprep.subr.bf16.mxu1 %v12721_v18  ;;  %v12802_v17 = vld [vmem:[#allocation2 + $0x1ea4] ss:$16 sps:$4 sm:$0xff]   ;;  %v12805_v18 = vld [vmem:[#allocation2 + $0x1eac] ss:$16 sps:$4 sm:$0xff]  }
 0x3d4   :  { %7344 = vmatpush1.bf16.msra.mxu0 %v12716_v19  ;;  %8192 = vmatpush1.bf16.msra.mxu1 %v12719_v20  ;;  %v12800_v19 = vld [vmem:[#allocation2 + $0x1ea0] ss:$16 sps:$4 sm:$0xff]   ;;  %v12803_v20 = vld [vmem:[#allocation2 + $0x1ea8] ss:$16 sps:$4 sm:$0xff]  }
 0x3d5   :  { %7345 = vmatprep.subr.bf16.mxu0 %v12724_v21  ;;  %8193 = vmatprep.subr.bf16.mxu1 %v12727_v22  ;;  %v12808_v21 = vld [vmem:[#allocation2 + $0x1ec4] ss:$16 sps:$4 sm:$0xff]   ;;  %v12811_v22 = vld [vmem:[#allocation2 + $0x1ecc] ss:$16 sps:$4 sm:$0xff]  }
 0x3d8   :  { %7346 = vmatpush1.bf16.msra.mxu0 %v12722_v23  ;;  %8194 = vmatpush1.bf16.msra.mxu1 %v12725_v24  ;;  %v12806_v23 = vld [vmem:[#allocation2 + $0x1ec0] ss:$16 sps:$4 sm:$0xff]   ;;  %v12809_v24 = vld [vmem:[#allocation2 + $0x1ec8] ss:$16 sps:$4 sm:$0xff]  }
 0x3d9   :  { %7347 = vmatprep.subr.bf16.mxu0 %v12730_v26  ;;  %8195 = vmatprep.subr.bf16.mxu1 %v12733_v28  ;;  %v12814_v26 = vld [vmem:[#allocation2 + $0x1ee4] ss:$16 sps:$4 sm:$0xff]   ;;  %v12817_v28 = vld [vmem:[#allocation2 + $0x1eec] ss:$16 sps:$4 sm:$0xff]  }
 0x3dc   :  { %7348 = vmatpush1.bf16.msra.mxu0 %v12728_v29  ;;  %8196 = vmatpush1.bf16.msra.mxu1 %v12731_v30  ;;  %v12812_v29 = vld [vmem:[#allocation2 + $0x1ee0] ss:$16 sps:$4 sm:$0xff]   ;;  %v12815_v30 = vld [vmem:[#allocation2 + $0x1ee8] ss:$16 sps:$4 sm:$0xff]  }
 0x3dd   :  { %7349 = vmatprep.subr.bf16.mxu0 %v12736_v31  ;;  %8197 = vmatprep.subr.bf16.mxu1 %v12739_v32  ;;  %v12820_v31 = vld [vmem:[#allocation2 + $0x1f04] ss:$16 sps:$4 sm:$0xff]   ;;  %v12823_v32 = vld [vmem:[#allocation2 + $0x1f0c] ss:$16 sps:$4 sm:$0xff]  }
 0x3e0   :  { %7350 = vmatpush1.bf16.msra.mxu0 %v12734_v41  ;;  %8198 = vmatpush1.bf16.msra.mxu1 %v12737_v43  ;;  %v12818_v41 = vld [vmem:[#allocation2 + $0x1f00] ss:$16 sps:$4 sm:$0xff]   ;;  %v12821_v43 = vld [vmem:[#allocation2 + $0x1f08] ss:$16 sps:$4 sm:$0xff]  }
 0x3e1   :  { %7351 = vmatprep.subr.bf16.mxu0 %v12742_v25  ;;  %8199 = vmatprep.subr.bf16.mxu1 %v12745_v27  ;;  %v12826_v25 = vld [vmem:[#allocation2 + $0x1f24] ss:$16 sps:$4 sm:$0xff]   ;;  %v12829_v27 = vld [vmem:[#allocation2 + $0x1f2c] ss:$16 sps:$4 sm:$0xff]  }
 0x3e4   :  { %7352 = vmatpush1.bf16.msra.mxu0 %v12740_v34  ;;  %8200 = vmatpush1.bf16.msra.mxu1 %v12743_v38  ;;  %v12824_v34 = vld [vmem:[#allocation2 + $0x1f20] ss:$16 sps:$4 sm:$0xff]   ;;  %v12827_v38 = vld [vmem:[#allocation2 + $0x1f28] ss:$16 sps:$4 sm:$0xff]  }
 0x3e5   :  { %7353 = vmatprep.subr.bf16.mxu0 %v12748_v39  ;;  %8201 = vmatprep.subr.bf16.mxu1 %v12751_v40  ;;  %v12832_v39 = vld [vmem:[#allocation2 + $0x1f44] ss:$16 sps:$4 sm:$0xff]   ;;  %v12835_v40 = vld [vmem:[#allocation2 + $0x1f4c] ss:$16 sps:$4 sm:$0xff]  }
 0x3e8   :  { %7354 = vmatpush1.bf16.msra.mxu0 %v12746_v36  ;;  %8202 = vmatpush1.bf16.msra.mxu1 %v12749_v37  ;;  %v12830_v36 = vld [vmem:[#allocation2 + $0x1f40] ss:$16 sps:$4 sm:$0xff]   ;;  %v12833_v37 = vld [vmem:[#allocation2 + $0x1f48] ss:$16 sps:$4 sm:$0xff]  }
 0x3e9   :  { %7355 = vmatprep.subr.bf16.mxu0 %v12754_v33  ;;  %8203 = vmatprep.subr.bf16.mxu1 %v12757_v35  ;;  %v12838_v33 = vld [vmem:[#allocation2 + $0x1f64] ss:$16 sps:$4 sm:$0xff]   ;;  %v12841_v35 = vld [vmem:[#allocation2 + $0x1f6c] ss:$16 sps:$4 sm:$0xff]  }
 0x3ec   :  { %7356 = vmatpush1.bf16.msra.mxu0 %v12752_v42  ;;  %8204 = vmatpush1.bf16.msra.mxu1 %v12755_v46  ;;  %v12836_v42 = vld [vmem:[#allocation2 + $0x1f60] ss:$16 sps:$4 sm:$0xff]   ;;  %v12839_v46 = vld [vmem:[#allocation2 + $0x1f68] ss:$16 sps:$4 sm:$0xff]  }
 0x3ed   :  { %7357 = vmatprep.subr.bf16.mxu0 %v12760_v47  ;;  %8205 = vmatprep.subr.bf16.mxu1 %v12763_v48  ;;  %v12844_v47 = vld [vmem:[#allocation2 + $0x1f84] ss:$16 sps:$4 sm:$0xff]   ;;  %v12847_v48 = vld [vmem:[#allocation2 + $0x1f8c] ss:$16 sps:$4 sm:$0xff]  }
 0x3f0   :  { %7358 = vmatpush1.bf16.msra.mxu0 %v12758_v44  ;;  %8206 = vmatpush1.bf16.msra.mxu1 %v12761_v45  ;;  %v12842_v44 = vld [vmem:[#allocation2 + $0x1f80] ss:$16 sps:$4 sm:$0xff]   ;;  %v12845_v45 = vld [vmem:[#allocation2 + $0x1f88] ss:$16 sps:$4 sm:$0xff]  }
 0x3f1   :  { %7359 = vmatprep.subr.bf16.mxu0 %v12766_v49  ;;  %8207 = vmatprep.subr.bf16.mxu1 %v12769_v50  ;;  %v12850_v49 = vld [vmem:[#allocation2 + $0x1fa4] ss:$16 sps:$4 sm:$0xff]   ;;  %v12853_v50 = vld [vmem:[#allocation2 + $0x1fac] ss:$16 sps:$4 sm:$0xff]  }
 0x3f4   :  { %7360 = vmatpush1.bf16.msra.mxu0 %v12764_v51  ;;  %8208 = vmatpush1.bf16.msra.mxu1 %v12767_v54  ;;  %v12848_v51 = vld [vmem:[#allocation2 + $0x1fa0] ss:$16 sps:$4 sm:$0xff]   ;;  %v12851_v54 = vld [vmem:[#allocation2 + $0x1fa8] ss:$16 sps:$4 sm:$0xff]  }
 0x3f5   :  { %7382 = vmatprep.subr.bf16.mxu0 %v12772_v55  ;;  %8230 = vmatprep.subr.bf16.mxu1 %v12775_v56  ;;  %v12856_v55 = vld [vmem:[#allocation2 + $0x1fc4] ss:$16 sps:$4 sm:$0xff]   ;;  %v12859_v56 = vld [vmem:[#allocation2 + $0x1fcc] ss:$16 sps:$4 sm:$0xff]  }
 0x3f7   :  { %7362 = vmatmul.mubr.bf16.vlgmr.msra.gmra.mrb[0].mxu0 %v9791_v52  ;;  %8210 = vmatmul.mubr.bf16.vlgmr.msra.gmra.mrb[0].mxu1 %v9791_v52  ;;  %v12854_v52 = vld [vmem:[#allocation2 + $0x1fc0] ss:$16 sps:$4 sm:$0xff]  }
 0x3f8   :  { %7383 = vmatpush1.bf16.msra.mxu0 %v12770_v58  ;;  %8231 = vmatpush1.bf16.msra.mxu1 %v12773_v59  ;;  %v12865_v58 = vld [vmem:[#allocation2 + $0x1fec] ss:$16 sps:$4 sm:$0xff]   ;;  %v12860_v59 = vld [vmem:[#allocation2 + $0x1fe0] ss:$16 sps:$4 sm:$0xff]  }
 0x3f9   :  { %7384 = vmatprep.subr.bf16.mxu0 %v12778_v62  ;;  %8232 = vmatprep.subr.bf16.mxu1 %v12781_v63  ;;  %v12863_v62 = vld [vmem:[#allocation2 + $0x1fe8] ss:$16 sps:$4 sm:$0xff]  }
 0x3fa   :  { %7371 = vmatprep.mubr.bf16.mxu0 %v9824_v0  ;;  %8219 = vmatprep.mubr.bf16.mxu1 %v9824_v0  ;;  %v106_v63 = vld [vmem:[%s13597_s0 + $0x178] sm:$0xff] }
 0x3fb   :  { %v122_v0 = vld [vmem:[%s13597_s0 + $0x1f8] sm:$0xff] }
 0x3fc   :  { %7385 = vmatpush1.bf16.msra.mxu0 %v12776_v60  ;;  %8233 = vmatpush1.bf16.msra.mxu1 %v12779_v61  ;;  %v12868_v60 = vld [vmem:[#allocation4 + $0x4] ss:$16 sps:$4 sm:$0xff]   ;;  %v12871_v61 = vld [vmem:[#allocation4 + $0xc] ss:$16 sps:$4 sm:$0xff]  }
 0x3fd   :  { %7386 = vmatprep.subr.bf16.mxu0 %v12784_v1  ;;  %8234 = vmatprep.subr.bf16.mxu1 %v12787_v2  ;;  %v9793_v1 = vcombine.low %v13546_v4, %v13551_v5  ;;  %v9826_v2 = vcombine.high %v106_v63, %v122_v0  ;;  %v12880_v4 = vld [vmem:[#allocation4 + $0x44] ss:$16 sps:$4 sm:$0xff]   ;;  %v12883_v5 = vld [vmem:[#allocation4 + $0x4c] ss:$16 sps:$4 sm:$0xff]  }
 0x3ff   :  { %7372 = vmatmul.mubr.bf16.gmra.mrb[4].mxu0 %v9823_v3  ;;  %8220 = vmatmul.mubr.bf16.gmra.mrb[4].mxu1 %v9823_v3  ;;  %v12866_v3 = vld [vmem:[#allocation4] ss:$16 sps:$4 sm:$0xff]  }
 0x400   :  { %7387 = vmatpush1.bf16.msra.mxu0 %v12782_v6  ;;  %8235 = vmatpush1.bf16.msra.mxu1 %v12785_v7  ;;  %v12869_v6 = vld [vmem:[#allocation4 + $0x8] ss:$16 sps:$4 sm:$0xff]   ;;  %v12874_v7 = vld [vmem:[#allocation4 + $0x24] ss:$16 sps:$4 sm:$0xff]  }
 0x401   :  { %7388 = vmatprep.subr.bf16.mxu0 %v12790_v8  ;;  %8236 = vmatprep.subr.bf16.mxu1 %v12793_v9  ;;  %v12877_v8 = vld [vmem:[#allocation4 + $0x2c] ss:$16 sps:$4 sm:$0xff]   ;;  %v12872_v9 = vld [vmem:[#allocation4 + $0x20] ss:$16 sps:$4 sm:$0xff]  }
 0x402   :  { %7414 = vmatprep.mubr.bf16.mxu0 %v9794_v10  ;;  %8262 = vmatprep.mubr.bf16.mxu1 %v9794_v10  ;;  %v12875_v10 = vld [vmem:[#allocation4 + $0x28] ss:$16 sps:$4 sm:$0xff]  }
 0x404   :  { %7389 = vmatpush1.bf16.msra.mxu0 %v12788_v11  ;;  %8237 = vmatpush1.bf16.msra.mxu1 %v12791_v12  ;;  %v9825_v11 = vcombine.low %v106_v63, %v122_v0  ;;  %v12878_v12 = vld [vmem:[#allocation4 + $0x40] ss:$16 sps:$4 sm:$0xff]   ;;  %v12953_v63 = vld [vmem:[#allocation4 + $0x1c8] ss:$16 sps:$4 sm:$0xff]   ;;  %v12958_v0 = vld [vmem:[#allocation4 + $0x1e4] ss:$16 sps:$4 sm:$0xff]  }
 0x405   :  { %7390 = vmatprep.subr.bf16.mxu0 %v12796_v13  ;;  %8238 = vmatprep.subr.bf16.mxu1 %v12799_v14  ;;  %v12881_v13 = vld [vmem:[#allocation4 + $0x48] ss:$16 sps:$4 sm:$0xff]   ;;  %v12886_v14 = vld [vmem:[#allocation4 + $0x64] ss:$16 sps:$4 sm:$0xff]  }
 0x408   :  { %7391 = vmatpush1.bf16.msra.mxu0 %v12794_v15  ;;  %8239 = vmatpush1.bf16.msra.mxu1 %v12797_v16  ;;  %v12889_v15 = vld [vmem:[#allocation4 + $0x6c] ss:$16 sps:$4 sm:$0xff]   ;;  %v12884_v16 = vld [vmem:[#allocation4 + $0x60] ss:$16 sps:$4 sm:$0xff]  }
 0x409   :  { %7392 = vmatprep.subr.bf16.mxu0 %v12802_v17  ;;  %8240 = vmatprep.subr.bf16.mxu1 %v12805_v18  ;;  %v12887_v17 = vld [vmem:[#allocation4 + $0x68] ss:$16 sps:$4 sm:$0xff]   ;;  %v12892_v18 = vld [vmem:[#allocation4 + $0x84] ss:$16 sps:$4 sm:$0xff]  }
 0x40c   :  { %7393 = vmatpush1.bf16.msra.mxu0 %v12800_v19  ;;  %8241 = vmatpush1.bf16.msra.mxu1 %v12803_v20  ;;  %v12895_v19 = vld [vmem:[#allocation4 + $0x8c] ss:$16 sps:$4 sm:$0xff]   ;;  %v12890_v20 = vld [vmem:[#allocation4 + $0x80] ss:$16 sps:$4 sm:$0xff]  }
 0x40d   :  { %7394 = vmatprep.subr.bf16.mxu0 %v12808_v21  ;;  %8242 = vmatprep.subr.bf16.mxu1 %v12811_v22  ;;  %v12893_v21 = vld [vmem:[#allocation4 + $0x88] ss:$16 sps:$4 sm:$0xff]   ;;  %v12898_v22 = vld [vmem:[#allocation4 + $0xa4] ss:$16 sps:$4 sm:$0xff]  }
 0x410   :  { %7395 = vmatpush1.bf16.msra.mxu0 %v12806_v23  ;;  %8243 = vmatpush1.bf16.msra.mxu1 %v12809_v24  ;;  %v12901_v23 = vld [vmem:[#allocation4 + $0xac] ss:$16 sps:$4 sm:$0xff]   ;;  %v12896_v24 = vld [vmem:[#allocation4 + $0xa0] ss:$16 sps:$4 sm:$0xff]  }
 0x411   :  { %7396 = vmatprep.subr.bf16.mxu0 %v12814_v26  ;;  %8244 = vmatprep.subr.bf16.mxu1 %v12817_v28  ;;  %v12899_v26 = vld [vmem:[#allocation4 + $0xa8] ss:$16 sps:$4 sm:$0xff]   ;;  %v12904_v28 = vld [vmem:[#allocation4 + $0xc4] ss:$16 sps:$4 sm:$0xff]  }
 0x414   :  { %7397 = vmatpush1.bf16.msra.mxu0 %v12812_v29  ;;  %8245 = vmatpush1.bf16.msra.mxu1 %v12815_v30  ;;  %v12907_v29 = vld [vmem:[#allocation4 + $0xcc] ss:$16 sps:$4 sm:$0xff]   ;;  %v12902_v30 = vld [vmem:[#allocation4 + $0xc0] ss:$16 sps:$4 sm:$0xff]  }
 0x415   :  { %7398 = vmatprep.subr.bf16.mxu0 %v12820_v31  ;;  %8246 = vmatprep.subr.bf16.mxu1 %v12823_v32  ;;  %v12905_v31 = vld [vmem:[#allocation4 + $0xc8] ss:$16 sps:$4 sm:$0xff]   ;;  %v12910_v32 = vld [vmem:[#allocation4 + $0xe4] ss:$16 sps:$4 sm:$0xff]  }
 0x418   :  { %7399 = vmatpush1.bf16.msra.mxu0 %v12818_v41  ;;  %8247 = vmatpush1.bf16.msra.mxu1 %v12821_v43  ;;  %v12913_v41 = vld [vmem:[#allocation4 + $0xec] ss:$16 sps:$4 sm:$0xff]   ;;  %v12908_v43 = vld [vmem:[#allocation4 + $0xe0] ss:$16 sps:$4 sm:$0xff]  }
 0x419   :  { %7400 = vmatprep.subr.bf16.mxu0 %v12826_v25  ;;  %8248 = vmatprep.subr.bf16.mxu1 %v12829_v27  ;;  %v12911_v25 = vld [vmem:[#allocation4 + $0xe8] ss:$16 sps:$4 sm:$0xff]   ;;  %v12916_v27 = vld [vmem:[#allocation4 + $0x104] ss:$16 sps:$4 sm:$0xff]  }
 0x41c   :  { %7401 = vmatpush1.bf16.msra.mxu0 %v12824_v34  ;;  %8249 = vmatpush1.bf16.msra.mxu1 %v12827_v38  ;;  %v12919_v34 = vld [vmem:[#allocation4 + $0x10c] ss:$16 sps:$4 sm:$0xff]   ;;  %v12914_v38 = vld [vmem:[#allocation4 + $0x100] ss:$16 sps:$4 sm:$0xff]  }
 0x41d   :  { %7402 = vmatprep.subr.bf16.mxu0 %v12832_v39  ;;  %8250 = vmatprep.subr.bf16.mxu1 %v12835_v40  ;;  %v12917_v39 = vld [vmem:[#allocation4 + $0x108] ss:$16 sps:$4 sm:$0xff]   ;;  %v12922_v40 = vld [vmem:[#allocation4 + $0x124] ss:$16 sps:$4 sm:$0xff]  }
 0x420   :  { %7403 = vmatpush1.bf16.msra.mxu0 %v12830_v36  ;;  %8251 = vmatpush1.bf16.msra.mxu1 %v12833_v37  ;;  %v12925_v36 = vld [vmem:[#allocation4 + $0x12c] ss:$16 sps:$4 sm:$0xff]   ;;  %v12920_v37 = vld [vmem:[#allocation4 + $0x120] ss:$16 sps:$4 sm:$0xff]  }
 0x421   :  { %7404 = vmatprep.subr.bf16.mxu0 %v12838_v33  ;;  %8252 = vmatprep.subr.bf16.mxu1 %v12841_v35  ;;  %v12923_v33 = vld [vmem:[#allocation4 + $0x128] ss:$16 sps:$4 sm:$0xff]   ;;  %v12928_v35 = vld [vmem:[#allocation4 + $0x144] ss:$16 sps:$4 sm:$0xff]  }
 0x424   :  { %7405 = vmatpush1.bf16.msra.mxu0 %v12836_v42  ;;  %8253 = vmatpush1.bf16.msra.mxu1 %v12839_v46  ;;  %v12931_v42 = vld [vmem:[#allocation4 + $0x14c] ss:$16 sps:$4 sm:$0xff]   ;;  %v12926_v46 = vld [vmem:[#allocation4 + $0x140] ss:$16 sps:$4 sm:$0xff]  }
 0x425   :  { %7406 = vmatprep.subr.bf16.mxu0 %v12844_v47  ;;  %8254 = vmatprep.subr.bf16.mxu1 %v12847_v48  ;;  %v12929_v47 = vld [vmem:[#allocation4 + $0x148] ss:$16 sps:$4 sm:$0xff]   ;;  %v12934_v48 = vld [vmem:[#allocation4 + $0x164] ss:$16 sps:$4 sm:$0xff]  }
 0x428   :  { %7407 = vmatpush1.bf16.msra.mxu0 %v12842_v44  ;;  %8255 = vmatpush1.bf16.msra.mxu1 %v12845_v45  ;;  %v12937_v44 = vld [vmem:[#allocation4 + $0x16c] ss:$16 sps:$4 sm:$0xff]   ;;  %v12932_v45 = vld [vmem:[#allocation4 + $0x160] ss:$16 sps:$4 sm:$0xff]  }
 0x429   :  { %7408 = vmatprep.subr.bf16.mxu0 %v12850_v49  ;;  %8256 = vmatprep.subr.bf16.mxu1 %v12853_v50  ;;  %v12935_v49 = vld [vmem:[#allocation4 + $0x168] ss:$16 sps:$4 sm:$0xff]   ;;  %v12940_v50 = vld [vmem:[#allocation4 + $0x184] ss:$16 sps:$4 sm:$0xff]  }
 0x42c   :  { %7409 = vmatpush1.bf16.msra.mxu0 %v12848_v51  ;;  %8257 = vmatpush1.bf16.msra.mxu1 %v12851_v54  ;;  %v12943_v51 = vld [vmem:[#allocation4 + $0x18c] ss:$16 sps:$4 sm:$0xff]   ;;  %v12938_v54 = vld [vmem:[#allocation4 + $0x180] ss:$16 sps:$4 sm:$0xff]  }
 0x42d   :  { %7410 = vmatprep.subr.bf16.mxu0 %v12856_v55  ;;  %8258 = vmatprep.subr.bf16.mxu1 %v12859_v56  ;;  %v12941_v55 = vld [vmem:[#allocation4 + $0x188] ss:$16 sps:$4 sm:$0xff]   ;;  %v12946_v56 = vld [vmem:[#allocation4 + $0x1a4] ss:$16 sps:$4 sm:$0xff]  }
 0x430   :  { %7411 = vmatpush1.bf16.msra.mxu0 %v12854_v52  ;;  %8259 = vmatpush1.bf16.msra.mxu1 %v12857_v53  ;;  %v12949_v52 = vld [vmem:[#allocation4 + $0x1ac] ss:$16 sps:$4 sm:$0xff]   ;;  %v12944_v53 = vld [vmem:[#allocation4 + $0x1a0] ss:$16 sps:$4 sm:$0xff]  }
 0x431   :  { %7412 = vmatprep.subr.bf16.mxu0 %v12862_v57  ;;  %8260 = vmatprep.subr.bf16.mxu1 %v12865_v58  ;;  %v12947_v57 = vld [vmem:[#allocation4 + $0x1a8] ss:$16 sps:$4 sm:$0xff]   ;;  %v12952_v58 = vld [vmem:[#allocation4 + $0x1c4] ss:$16 sps:$4 sm:$0xff]  }
 0x434   :  { %7413 = vmatpush1.bf16.msra.mxu0 %v12860_v59  ;;  %8261 = vmatpush1.bf16.msra.mxu1 %v12863_v62  ;;  %v12955_v59 = vld [vmem:[#allocation4 + $0x1cc] ss:$16 sps:$4 sm:$0xff]   ;;  %v12950_v62 = vld [vmem:[#allocation4 + $0x1c0] ss:$16 sps:$4 sm:$0xff]  }
 0x435   :  { %9107 = vmatprep.subr.bf16.mxu0 %v12868_v60  ;;  %9213 = vmatprep.subr.bf16.mxu1 %v12871_v61  ;;  %v12961_v60 = vld [vmem:[#allocation4 + $0x1ec] ss:$16 sps:$4 sm:$0xff]   ;;  %v12956_v61 = vld [vmem:[#allocation4 + $0x1e0] ss:$16 sps:$4 sm:$0xff]  }
 0x437   :  { %7415 = vmatmul.mubr.bf16.vlgmr.msra.gmra.mrb[0].mxu0 %v9793_v1  ;;  %8263 = vmatmul.mubr.bf16.vlgmr.msra.gmra.mrb[0].mxu1 %v9793_v1  ;;  %v12959_v1 = vld [vmem:[#allocation4 + $0x1e8] ss:$16 sps:$4 sm:$0xff]  }
 0x438   :  { %7424 = vmatprep.mubr.bf16.mxu0 %v9826_v2  ;;  %8272 = vmatprep.mubr.bf16.mxu1 %v9826_v2  ;;  %v12964_v2 = vld [vmem:[#allocation4 + $0x204] ss:$16 sps:$4 sm:$0xff]  }
 0x439   :  { %9108 = vmatpush1.bf16.msra.mxu0 %v12866_v3  ;;  %9214 = vmatpush1.bf16.msra.mxu1 %v12869_v6  ;;  %v12967_v3 = vld [vmem:[#allocation4 + $0x20c] ss:$16 sps:$4 sm:$0xff]  }
 0x43a   :  { %9109 = vmatprep.subr.bf16.mxu0 %v12874_v7  ;;  %9215 = vmatprep.subr.bf16.mxu1 %v12877_v8 }
 0x43d   :  { %9110 = vmatpush1.bf16.msra.mxu0 %v12872_v9  ;;  %9216 = vmatpush1.bf16.msra.mxu1 %v12875_v10 }
 0x43e   :  { %9111 = vmatprep.subr.bf16.mxu0 %v12880_v4  ;;  %9217 = vmatprep.subr.bf16.mxu1 %v12883_v5 }
 0x43f   :  { %7425 = vmatmul.mubr.bf16.gmra.mrb[4].mxu0 %v9825_v11  ;;  %8273 = vmatmul.mubr.bf16.gmra.mrb[4].mxu1 %v9825_v11 }
 0x441   :  { %9112 = vmatpush1.bf16.msra.mxu0 %v12878_v12  ;;  %9218 = vmatpush1.bf16.msra.mxu1 %v12881_v13 }
 0x442   :  { %9113 = vmatprep.subr.bf16.mxu0 %v12886_v14  ;;  %9219 = vmatprep.subr.bf16.mxu1 %v12889_v15 }
 0x445   :  { %9114 = vmatpush1.bf16.msra.mxu0 %v12884_v16  ;;  %9220 = vmatpush1.bf16.msra.mxu1 %v12887_v17 }
 0x446   :  { %9115 = vmatprep.subr.bf16.mxu0 %v12892_v18  ;;  %9221 = vmatprep.subr.bf16.mxu1 %v12895_v19 }
 0x449   :  { %9116 = vmatpush1.bf16.msra.mxu0 %v12890_v20  ;;  %9222 = vmatpush1.bf16.msra.mxu1 %v12893_v21 }
 0x44a   :  { %9117 = vmatprep.subr.bf16.mxu0 %v12898_v22  ;;  %9223 = vmatprep.subr.bf16.mxu1 %v12901_v23 }
 0x44d   :  { %9118 = vmatpush1.bf16.msra.mxu0 %v12896_v24  ;;  %9224 = vmatpush1.bf16.msra.mxu1 %v12899_v26 }
 0x44e   :  { %9119 = vmatprep.subr.bf16.mxu0 %v12904_v28  ;;  %9225 = vmatprep.subr.bf16.mxu1 %v12907_v29 }
 0x451   :  { %9120 = vmatpush1.bf16.msra.mxu0 %v12902_v30  ;;  %9226 = vmatpush1.bf16.msra.mxu1 %v12905_v31 }
 0x452   :  { %9121 = vmatprep.subr.bf16.mxu0 %v12910_v32  ;;  %9227 = vmatprep.subr.bf16.mxu1 %v12913_v41 }
 0x455   :  { %9122 = vmatpush1.bf16.msra.mxu0 %v12908_v43  ;;  %9228 = vmatpush1.bf16.msra.mxu1 %v12911_v25 }
 0x456   :  { %9123 = vmatprep.subr.bf16.mxu0 %v12916_v27  ;;  %9229 = vmatprep.subr.bf16.mxu1 %v12919_v34  ;;  %v12962_v27 = vld [vmem:[#allocation4 + $0x200] ss:$16 sps:$4 sm:$0xff]   ;;  %v12965_v34 = vld [vmem:[#allocation4 + $0x208] ss:$16 sps:$4 sm:$0xff]  }
 0x459   :  { %9124 = vmatpush1.bf16.msra.mxu0 %v12914_v38  ;;  %9230 = vmatpush1.bf16.msra.mxu1 %v12917_v39 }
 0x45a   :  { %9125 = vmatprep.subr.bf16.mxu0 %v12922_v40  ;;  %9231 = vmatprep.subr.bf16.mxu1 %v12925_v36  ;;  %v12970_v36 = vld [vmem:[#allocation4 + $0x224] ss:$16 sps:$4 sm:$0xff]  }
 0x45d   :  { %9126 = vmatpush1.bf16.msra.mxu0 %v12920_v37  ;;  %9232 = vmatpush1.bf16.msra.mxu1 %v12923_v33  ;;  %v12973_v37 = vld [vmem:[#allocation4 + $0x22c] ss:$16 sps:$4 sm:$0xff]  }
 0x45e   :  { %9127 = vmatprep.subr.bf16.mxu0 %v12928_v35  ;;  %9233 = vmatprep.subr.bf16.mxu1 %v12931_v42 }
 0x461   :  { %9128 = vmatpush1.bf16.msra.mxu0 %v12926_v46  ;;  %9234 = vmatpush1.bf16.msra.mxu1 %v12929_v47 }
 0x462   :  { %9129 = vmatprep.subr.bf16.mxu0 %v12934_v48  ;;  %9235 = vmatprep.subr.bf16.mxu1 %v12937_v44 }
 0x465   :  { %9130 = vmatpush1.bf16.msra.mxu0 %v12932_v45  ;;  %9236 = vmatpush1.bf16.msra.mxu1 %v12935_v49 }
 0x466   :  { %9131 = vmatprep.subr.bf16.mxu0 %v12940_v50  ;;  %9237 = vmatprep.subr.bf16.mxu1 %v12943_v51 }
 0x469   :  { %9132 = vmatpush1.bf16.msra.mxu0 %v12938_v54  ;;  %9238 = vmatpush1.bf16.msra.mxu1 %v12941_v55 }
 0x46a   :  { %9133 = vmatprep.subr.bf16.mxu0 %v12946_v56  ;;  %9239 = vmatprep.subr.bf16.mxu1 %v12949_v52 }
 0x46d   :  { %9134 = vmatpush1.bf16.msra.mxu0 %v12944_v53  ;;  %9240 = vmatpush1.bf16.msra.mxu1 %v12947_v57 }
 0x46e   :  { %9135 = vmatprep.subr.bf16.mxu0 %v12952_v58  ;;  %9241 = vmatprep.subr.bf16.mxu1 %v12955_v59  ;;  %v12968_v58 = vld [vmem:[#allocation4 + $0x220] ss:$16 sps:$4 sm:$0xff]   ;;  %v12971_v59 = vld [vmem:[#allocation4 + $0x228] ss:$16 sps:$4 sm:$0xff]  }
 0x471   :  { %9136 = vmatpush1.bf16.msra.mxu0 %v12950_v62  ;;  %9242 = vmatpush1.bf16.msra.mxu1 %v12953_v63 }
 0x472   :  { %9137 = vmatprep.subr.bf16.mxu0 %v12958_v0  ;;  %9243 = vmatprep.subr.bf16.mxu1 %v12961_v60  ;;  %v12976_v60 = vld [vmem:[#allocation4 + $0x244] ss:$16 sps:$4 sm:$0xff]  }
 0x475   :  { %9138 = vmatpush1.bf16.msra.mxu0 %v12956_v61  ;;  %9244 = vmatpush1.bf16.msra.mxu1 %v12959_v1 }
 0x476   :  { %9160 = vmatprep.subr.bf16.mxu0 %v12964_v2  ;;  %9266 = vmatprep.subr.bf16.mxu1 %v12967_v3  ;;  %v12979_v2 = vld [vmem:[#allocation4 + $0x24c] ss:$16 sps:$4 sm:$0xff]  }
 0x50a   :  { %v7416_v6 = vpop.f32.mrb[0].mxu0  ;;  %v8264_v7 = vpop.f32.mrb[0].mxu1 }
 0x50b   :  { %vm8283_vm0 = vcmp.ge.f32.partialorder %v7416_v6, 0.0  ;;  %v8299_v8 = vmul.f32 0.1, %v7416_v6  ;;  %v8301_v9 = vmul.f32 0.1, %v8264_v7  ;;  %vm8285_vm1 = vcmp.ge.f32.partialorder %v8264_v7, 0.0 }
 0x50c   :  { %v7418_v10 = vpop.f32.mrb[1].mxu0  ;;  %v8266_v4 = vpop.f32.mrb[1].mxu1 }
 0x50d   :  { %v8315_v5 = vsel %vm8283_vm0, %v7416_v6, %v8299_v8  ;;  %v7420_v11 = vpop.f32.mrb[2].mxu0  ;;  %v8268_v12 = vpop.f32.mrb[2].mxu1  ;;  %vm8284_vm2 = vcmp.ge.f32.partialorder %v7418_v10, 0.0  ;;  %v8300_v13 = vmul.f32 0.1, %v7418_v10  ;;  %v8317_v15 = vsel %vm8285_vm1, %v8264_v7, %v8301_v9 }
 0x50e   :  { %vm8287_vm3 = vcmp.ge.f32.partialorder %v7420_v11, 0.0  ;;  %v8303_v14 = vmul.f32 0.1, %v7420_v11  ;;  %vm8286_vm4 = vcmp.ge.f32.partialorder %v8266_v4, 0.0  ;;  %vm8289_vm5 = vcmp.ge.f32.partialorder %v8268_v12, 0.0  ;;  %v7422_v17 = vpop.f32.mrb[3].mxu0 }
 0x50f   :  { %v8305_v16 = vmul.f32 0.1, %v8268_v12  ;;  %v8270_v18 = vpop.f32.mrb[3].mxu1  ;;  %v8302_v19 = vmul.f32 0.1, %v8266_v4  ;;  %vm8288_vm6 = vcmp.ge.f32.partialorder %v7422_v17, 0.0  ;;  %v8316_v26 = vsel %vm8284_vm2, %v7418_v10, %v8300_v13 }
 0x510   :  { %v8319_v20 = vsel %vm8287_vm3, %v7420_v11, %v8303_v14  ;;  %v8304_v21 = vmul.f32 0.1, %v7422_v17  ;;  %vm8290_vm7 = vcmp.ge.f32.partialorder %v8270_v18, 0.0  ;;  %v8306_v24 = vmul.f32 0.1, %v8270_v18 }
 0x511   :  { %v8331_v22 = vpack.c.bf16 %v8319_v20, %v8315_v5  ;;  %v8321_v23 = vsel %vm8289_vm5, %v8268_v12, %v8305_v16  ;;  %v8318_v38 = vsel %vm8286_vm4, %v8266_v4, %v8302_v19  ;;  %v12974_v6 = vld [vmem:[#allocation4 + $0x240] ss:$16 sps:$4 sm:$0xff]   ;;  %v12977_v7 = vld [vmem:[#allocation4 + $0x248] ss:$16 sps:$4 sm:$0xff]   ;;  %v12982_v8 = vld [vmem:[#allocation4 + $0x264] ss:$16 sps:$4 sm:$0xff]  }
 0x512   :  { %v13564_v28 = vpack.c.bf16 %v8321_v23, %v8317_v15  ;;  %v8320_v29 = vsel %vm8288_vm6, %v7422_v17, %v8304_v21  ;;  %v7426_v30 = vpop.f32.mrb[4].mxu0  ;;  %v8274_v31 = vpop.f32.mrb[4].mxu1  ;;  %v8322_v32 = vsel %vm8290_vm7, %v8270_v18, %v8306_v24  ;;  %v12985_v9 = vld [vmem:[#allocation4 + $0x26c] ss:$16 sps:$4 sm:$0xff]   ;;  %v12980_v10 = vld [vmem:[#allocation4 + $0x260] ss:$16 sps:$4 sm:$0xff]  }
 0x513   :  { %vm8291_vm8 = vcmp.ge.f32.partialorder %v7426_v30, 0.0  ;;  %v8307_v41 = vmul.f32 0.1, %v7426_v30  ;;  %vm8293_vm9 = vcmp.ge.f32.partialorder %v8274_v31, 0.0  ;;  %v7428_v43 = vpop.f32.mrb[5].mxu0  ;;  %v8276_v25 = vpop.f32.mrb[5].mxu1  ;;  %v8332_v35 = vpack.c.bf16 %v8320_v29, %v8316_v26 }
 0x514   :  { %v8309_v39 = vmul.f32 0.1, %v8274_v31  ;;  %vm8292_vm10 = vcmp.ge.f32.partialorder %v7428_v43, 0.0  ;;  %v8308_v40 = vmul.f32 0.1, %v7428_v43  ;;  %vm8294_vm11 = vcmp.ge.f32.partialorder %v8276_v25, 0.0 }
 0x515   :  { %v8310_v33 = vmul.f32 0.1, %v8276_v25  ;;  %v7430_v42 = vpop.f32.mrb[6].mxu0  ;;  %v8278_v46 = vpop.f32.mrb[6].mxu1  ;;  %v8334_v47 = vpack.c.bf16 %v8322_v32, %v8318_v38  ;;  %v8323_v48 = vsel %vm8291_vm8, %v7426_v30, %v8307_v41  ;;  %9139 = vmatprep.mubr.bf16.mxu0 %v8332_v35  ;;  %9245 = vmatprep.mubr.bf16.mxu1 %v8332_v35  ;;  %v12983_v4 = vld [vmem:[#allocation4 + $0x268] ss:$16 sps:$4 sm:$0xff]  }
 0x516   :  { %v8325_v44 = vsel %vm8293_vm9, %v8274_v31, %v8309_v39  ;;  %vm8295_vm12 = vcmp.ge.f32.partialorder %v7430_v42, 0.0  ;;  %v8311_v45 = vmul.f32 0.1, %v7430_v42  ;;  %v7432_v49 = vpop.f32.mrb[7].mxu0  ;;  %v8280_v50 = vpop.f32.mrb[7].mxu1  ;;  %v8324_v51 = vsel %vm8292_vm10, %v7428_v43, %v8308_v40  ;;  %9140 = vmatmul.mubr.bf16.vlgmr.msra.gmra.mrb[8].mxu0 %v8331_v22  ;;  %9246 = vmatmul.mubr.bf16.vlgmr.msra.gmra.mrb[8].mxu1 %v8331_v22 }
 0x517   :  { %vm8297_vm13 = vcmp.ge.f32.partialorder %v8278_v46, 0.0  ;;  %v8313_v54 = vmul.f32 0.1, %v8278_v46  ;;  %vm8296_vm14 = vcmp.ge.f32.partialorder %v7432_v49, 0.0  ;;  %v8312_v56 = vmul.f32 0.1, %v7432_v49  ;;  %9161 = vmatpush1.bf16.msra.mxu0 %v12962_v27  ;;  %9267 = vmatpush1.bf16.msra.mxu1 %v12965_v34 }
 0x518   :  { %v8327_v55 = vsel %vm8295_vm12, %v7430_v42, %v8311_v45  ;;  %vm8298_vm15 = vcmp.ge.f32.partialorder %v8280_v50, 0.0  ;;  %v8314_v52 = vmul.f32 0.1, %v8280_v50  ;;  %v8326_v53 = vsel %vm8294_vm11, %v8276_v25, %v8310_v33  ;;  %9162 = vmatprep.subr.bf16.mxu0 %v12970_v36  ;;  %9268 = vmatprep.subr.bf16.mxu1 %v12973_v37  ;;  %v12988_v5 = vld [vmem:[#allocation4 + $0x284] ss:$16 sps:$4 sm:$0xff]  }
 0x519   :  { %v8329_v57 = vsel %vm8297_vm13, %v8278_v46, %v8313_v54  ;;  %v8335_v62 = vpack.c.bf16 %v8327_v55, %v8323_v48  ;;  %v8328_v63 = vsel %vm8296_vm14, %v7432_v49, %v8312_v56  ;;  %v12991_v11 = vld [vmem:[#allocation4 + $0x28c] ss:$16 sps:$4 sm:$0xff]   ;;  %v12986_v12 = vld [vmem:[#allocation4 + $0x280] ss:$16 sps:$4 sm:$0xff]   ;;  %v12989_v13 = vld [vmem:[#allocation4 + $0x288] ss:$16 sps:$4 sm:$0xff]  }
 0x51a   :  { %v8330_v0 = vsel %vm8298_vm15, %v8280_v50, %v8314_v52  ;;  %v13571_v61 = vpack.c.bf16 %v8329_v57, %v8325_v44  ;;  %v8336_v1 = vpack.c.bf16 %v8328_v63, %v8324_v51  ;;  %v12994_v14 = vld [vmem:[#allocation4 + $0x2a4] ss:$16 sps:$4 sm:$0xff]   ;;  %v12997_v15 = vld [vmem:[#allocation4 + $0x2ac] ss:$16 sps:$4 sm:$0xff]   ;;  %v12992_v16 = vld [vmem:[#allocation4 + $0x2a0] ss:$16 sps:$4 sm:$0xff]  }
 0x51b   :  { %v13573_v3 = vpack.c.bf16 %v8330_v0, %v8326_v53  ;;  %9163 = vmatpush1.bf16.msra.mxu0 %v12968_v58  ;;  %9269 = vmatpush1.bf16.msra.mxu1 %v12971_v59  ;;  %v12995_v17 = vld [vmem:[#allocation4 + $0x2a8] ss:$16 sps:$4 sm:$0xff]   ;;  %v13000_v18 = vld [vmem:[#allocation4 + $0x2c4] ss:$16 sps:$4 sm:$0xff]   ;;  %v13003_v19 = vld [vmem:[#allocation4 + $0x2cc] ss:$16 sps:$4 sm:$0xff]  }
 0x51c   :  { %9149 = vmatprep.mubr.bf16.mxu0 %v8336_v1  ;;  %9164 = vmatprep.subr.bf16.mxu0 %v12976_v60  ;;  %v12998_v20 = vld [vmem:[#allocation4 + $0x2c0] ss:$16 sps:$4 sm:$0xff]   ;;  %v13001_v21 = vld [vmem:[#allocation4 + $0x2c8] ss:$16 sps:$4 sm:$0xff]   ;;  %v13006_v22 = vld [vmem:[#allocation4 + $0x2e4] ss:$16 sps:$4 sm:$0xff]  }
 0x51d   :  { %9255 = vmatprep.mubr.bf16.mxu1 %v8336_v1  ;;  %9270 = vmatprep.subr.bf16.mxu1 %v12979_v2  ;;  %v13009_v23 = vld [vmem:[#allocation4 + $0x2ec] ss:$16 sps:$4 sm:$0xff]   ;;  %v13004_v24 = vld [vmem:[#allocation4 + $0x2e0] ss:$16 sps:$4 sm:$0xff]   ;;  %v13007_v26 = vld [vmem:[#allocation4 + $0x2e8] ss:$16 sps:$4 sm:$0xff]  }
 0x51e   :  { %9150 = vmatmul.mubr.bf16.gmra.mrb[12].mxu0 %v8335_v62  ;;  %9256 = vmatmul.mubr.bf16.gmra.mrb[12].mxu1 %v8335_v62  ;;  %v13012_v29 = vld [vmem:[#allocation4 + $0x304] ss:$16 sps:$4 sm:$0xff]   ;;  %v13015_v30 = vld [vmem:[#allocation4 + $0x30c] ss:$16 sps:$4 sm:$0xff]   ;;  %v13010_v31 = vld [vmem:[#allocation4 + $0x300] ss:$16 sps:$4 sm:$0xff]  }
 0x51f   :  { %9165 = vmatpush1.bf16.msra.mxu0 %v12974_v6  ;;  %9271 = vmatpush1.bf16.msra.mxu1 %v12977_v7  ;;  %v13013_v32 = vld [vmem:[#allocation4 + $0x308] ss:$16 sps:$4 sm:$0xff]   ;;  %v13018_v41 = vld [vmem:[#allocation4 + $0x324] ss:$16 sps:$4 sm:$0xff]   ;;  %v13021_v43 = vld [vmem:[#allocation4 + $0x32c] ss:$16 sps:$4 sm:$0xff]  }
 0x520   :  { %9192 = vmatprep.mubr.bf16.mxu0 %v8334_v47  ;;  %9298 = vmatprep.mubr.bf16.mxu1 %v8334_v47  ;;  %v13016_v25 = vld [vmem:[#allocation4 + $0x320] ss:$16 sps:$4 sm:$0xff]   ;;  %v13019_v27 = vld [vmem:[#allocation4 + $0x328] ss:$16 sps:$4 sm:$0xff]   ;;  %v13024_v34 = vld [vmem:[#allocation4 + $0x344] ss:$16 sps:$4 sm:$0xff]  }
 0x521   :  { %9166 = vmatprep.subr.bf16.mxu0 %v12982_v8  ;;  %9272 = vmatprep.subr.bf16.mxu1 %v12985_v9  ;;  %v13027_v38 = vld [vmem:[#allocation4 + $0x34c] ss:$16 sps:$4 sm:$0xff]   ;;  %v13022_v39 = vld [vmem:[#allocation4 + $0x340] ss:$16 sps:$4 sm:$0xff]   ;;  %v13025_v40 = vld [vmem:[#allocation4 + $0x348] ss:$16 sps:$4 sm:$0xff]  }
 0x522   :  { %v13030_v36 = vld [vmem:[#allocation4 + $0x364] ss:$16 sps:$4 sm:$0xff]   ;;  %v13033_v37 = vld [vmem:[#allocation4 + $0x36c] ss:$16 sps:$4 sm:$0xff]   ;;  %v13028_v33 = vld [vmem:[#allocation4 + $0x360] ss:$16 sps:$4 sm:$0xff]  }
 0x523   :  { %9167 = vmatpush1.bf16.msra.mxu0 %v12980_v10  ;;  %9273 = vmatpush1.bf16.msra.mxu1 %v12983_v4  ;;  %v13031_v35 = vld [vmem:[#allocation4 + $0x368] ss:$16 sps:$4 sm:$0xff]   ;;  %v13036_v42 = vld [vmem:[#allocation4 + $0x384] ss:$16 sps:$4 sm:$0xff]   ;;  %v13039_v46 = vld [vmem:[#allocation4 + $0x38c] ss:$16 sps:$4 sm:$0xff]  }
 0x524   :  { %9168 = vmatprep.subr.bf16.mxu0 %v12988_v5  ;;  %9274 = vmatprep.subr.bf16.mxu1 %v12991_v11  ;;  %v13034_v47 = vld [vmem:[#allocation4 + $0x380] ss:$16 sps:$4 sm:$0xff]   ;;  %v13037_v48 = vld [vmem:[#allocation4 + $0x388] ss:$16 sps:$4 sm:$0xff]   ;;  %v13042_v44 = vld [vmem:[#allocation4 + $0x3a4] ss:$16 sps:$4 sm:$0xff]  }
 0x525   :  { %v13045_v45 = vld [vmem:[#allocation4 + $0x3ac] ss:$16 sps:$4 sm:$0xff]   ;;  %v13040_v49 = vld [vmem:[#allocation4 + $0x3a0] ss:$16 sps:$4 sm:$0xff]   ;;  %v13043_v50 = vld [vmem:[#allocation4 + $0x3a8] ss:$16 sps:$4 sm:$0xff]  }
 0x526   :  { %v13048_v51 = vld [vmem:[#allocation4 + $0x3c4] ss:$16 sps:$4 sm:$0xff]   ;;  %v13051_v54 = vld [vmem:[#allocation4 + $0x3cc] ss:$16 sps:$4 sm:$0xff]   ;;  %v13046_v55 = vld [vmem:[#allocation4 + $0x3c0] ss:$16 sps:$4 sm:$0xff]  }
 0x527   :  { %9169 = vmatpush1.bf16.msra.mxu0 %v12986_v12  ;;  %9275 = vmatpush1.bf16.msra.mxu1 %v12989_v13  ;;  %v13049_v56 = vld [vmem:[#allocation4 + $0x3c8] ss:$16 sps:$4 sm:$0xff]   ;;  %v13054_v52 = vld [vmem:[#allocation4 + $0x3e4] ss:$16 sps:$4 sm:$0xff]   ;;  %v13057_v53 = vld [vmem:[#allocation4 + $0x3ec] ss:$16 sps:$4 sm:$0xff]  }
 0x528   :  { %9170 = vmatprep.subr.bf16.mxu0 %v12994_v14  ;;  %9276 = vmatprep.subr.bf16.mxu1 %v12997_v15  ;;  %v13052_v57 = vld [vmem:[#allocation4 + $0x3e0] ss:$16 sps:$4 sm:$0xff]   ;;  %v13055_v58 = vld [vmem:[#allocation4 + $0x3e8] ss:$16 sps:$4 sm:$0xff]  }
 0x529   :  { %v13058_v59 = vld [vmem:[#allocation6 + $0x40] sm:$0xff]   ;;  %v13062_v60 = vld [vmem:[#allocation6 + $0x48] sm:$0xff]   ;;  %v13066_v7 = vld [vmem:[#allocation6 + $0x50] sm:$0xff]  }
 0x52a   :  { %v13059_v62 = vld [vmem:[#allocation6 + $0xc0] sm:$0xff]   ;;  %v13063_v1 = vld [vmem:[#allocation6 + $0xc8] sm:$0xff]   ;;  %v13067_v8 = vld [vmem:[#allocation6 + $0xd0] sm:$0xff]  }
 0x52b   :  { %9171 = vmatpush1.bf16.msra.mxu0 %v12992_v16  ;;  %9277 = vmatpush1.bf16.msra.mxu1 %v12995_v17  ;;  %v13060_v63 = vld [vmem:[#allocation6] sm:$0xff]   ;;  %v13064_v2 = vld [vmem:[#allocation6 + $0x8] sm:$0xff]   ;;  %v13068_v9 = vld [vmem:[#allocation6 + $0x10] sm:$0xff]  }
 0x52c   :  { %9172 = vmatprep.subr.bf16.mxu0 %v13000_v18  ;;  %9278 = vmatprep.subr.bf16.mxu1 %v13003_v19  ;;  %v13061_v0 = vld [vmem:[#allocation6 + $0x80] sm:$0xff]   ;;  %v13065_v6 = vld [vmem:[#allocation6 + $0x88] sm:$0xff]   ;;  %v13069_v10 = vld [vmem:[#allocation6 + $0x90] sm:$0xff]  }
 0x52d   :  { %v13070_v4 = vld [vmem:[#allocation6 + $0x58] sm:$0xff]   ;;  %v13074_v11 = vld [vmem:[#allocation6 + $0x60] sm:$0xff]   ;;  %v13078_v15 = vld [vmem:[#allocation6 + $0x68] sm:$0xff]  }
 0x52e   :  { %v13073_v5 = vld [vmem:[#allocation6 + $0x98] sm:$0xff]   ;;  %v13075_v12 = vld [vmem:[#allocation6 + $0xe0] sm:$0xff]   ;;  %v13079_v16 = vld [vmem:[#allocation6 + $0xe8] sm:$0xff]  }
 0x52f   :  { %9173 = vmatpush1.bf16.msra.mxu0 %v12998_v20  ;;  %9279 = vmatpush1.bf16.msra.mxu1 %v13001_v21  ;;  %v13076_v13 = vld [vmem:[#allocation6 + $0x20] sm:$0xff]   ;;  %v13080_v17 = vld [vmem:[#allocation6 + $0x28] sm:$0xff]   ;;  %v13082_v18 = vld [vmem:[#allocation6 + $0x70] sm:$0xff]  }
 0x530   :  { %9174 = vmatprep.subr.bf16.mxu0 %v13006_v22  ;;  %9280 = vmatprep.subr.bf16.mxu1 %v13009_v23  ;;  %v13077_v14 = vld [vmem:[#allocation6 + $0xa0] sm:$0xff]   ;;  %v13083_v19 = vld [vmem:[#allocation6 + $0xf0] sm:$0xff]   ;;  %v13086_v22 = vld [vmem:[#allocation6 + $0x78] sm:$0xff]  }
 0x531   :  { %v13084_v20 = vld [vmem:[#allocation6 + $0x30] sm:$0xff]   ;;  %v13087_v23 = vld [vmem:[#allocation6 + $0xf8] sm:$0xff]  }
 0x532   :  { %v13085_v21 = vld [vmem:[#allocation6 + $0xb0] sm:$0xff]  }
 0x533   :  { %9175 = vmatpush1.bf16.msra.mxu0 %v13004_v24  ;;  %9281 = vmatpush1.bf16.msra.mxu1 %v13007_v26  ;;  %v13088_v24 = vld [vmem:[#allocation6 + $0x38] sm:$0xff]  }
 0x534   :  { %9176 = vmatprep.subr.bf16.mxu0 %v13012_v29  ;;  %9282 = vmatprep.subr.bf16.mxu1 %v13015_v30  ;;  %v13089_v26 = vld [vmem:[#allocation6 + $0xb8] sm:$0xff]  }
 0x537   :  { %9177 = vmatpush1.bf16.msra.mxu0 %v13010_v31  ;;  %9283 = vmatpush1.bf16.msra.mxu1 %v13013_v32 }
 0x538   :  { %9178 = vmatprep.subr.bf16.mxu0 %v13018_v41  ;;  %9284 = vmatprep.subr.bf16.mxu1 %v13021_v43 }
 0x53b   :  { %9179 = vmatpush1.bf16.msra.mxu0 %v13016_v25  ;;  %9285 = vmatpush1.bf16.msra.mxu1 %v13019_v27 }
 0x53c   :  { %9180 = vmatprep.subr.bf16.mxu0 %v13024_v34  ;;  %9286 = vmatprep.subr.bf16.mxu1 %v13027_v38 }
 0x53f   :  { %9181 = vmatpush1.bf16.msra.mxu0 %v13022_v39  ;;  %9287 = vmatpush1.bf16.msra.mxu1 %v13025_v40 }
 0x540   :  { %9182 = vmatprep.subr.bf16.mxu0 %v13030_v36  ;;  %9288 = vmatprep.subr.bf16.mxu1 %v13033_v37 }
 0x543   :  { %9183 = vmatpush1.bf16.msra.mxu0 %v13028_v33  ;;  %9289 = vmatpush1.bf16.msra.mxu1 %v13031_v35 }
 0x544   :  { %9184 = vmatprep.subr.bf16.mxu0 %v13036_v42  ;;  %9290 = vmatprep.subr.bf16.mxu1 %v13039_v46 }
 0x547   :  { %9185 = vmatpush1.bf16.msra.mxu0 %v13034_v47  ;;  %9291 = vmatpush1.bf16.msra.mxu1 %v13037_v48 }
 0x548   :  { %9186 = vmatprep.subr.bf16.mxu0 %v13042_v44  ;;  %9292 = vmatprep.subr.bf16.mxu1 %v13045_v45 }
 0x54b   :  { %9187 = vmatpush1.bf16.msra.mxu0 %v13040_v49  ;;  %9293 = vmatpush1.bf16.msra.mxu1 %v13043_v50 }
 0x54c   :  { %9188 = vmatprep.subr.bf16.mxu0 %v13048_v51  ;;  %9294 = vmatprep.subr.bf16.mxu1 %v13051_v54 }
 0x54f   :  { %9189 = vmatpush1.bf16.msra.mxu0 %v13046_v55  ;;  %9295 = vmatpush1.bf16.msra.mxu1 %v13049_v56 }
 0x550   :  { %9190 = vmatprep.subr.bf16.mxu0 %v13054_v52  ;;  %9296 = vmatprep.subr.bf16.mxu1 %v13057_v53 }
 0x553   :  { %9191 = vmatpush1.bf16.msra.mxu0 %v13052_v57  ;;  %9297 = vmatpush1.bf16.msra.mxu1 %v13055_v58 }
 0x554   :  { %11011 = vmatprep.subr.bf16.mxu0 %v13058_v59  ;;  %11039 = vmatprep.subr.bf16.mxu1 %v13059_v62 }
 0x556   :  { %9193 = vmatmul.mubr.bf16.vlgmr.msra.gmra.mrb[8].mxu0 %v13564_v28  ;;  %9299 = vmatmul.mubr.bf16.vlgmr.msra.gmra.mrb[8].mxu1 %v13564_v28  ;;  %v13071_v28 = vld [vmem:[#allocation6 + $0xd8] sm:$0xff]  }
 0x557   :  { %9202 = vmatprep.mubr.bf16.mxu0 %v13573_v3  ;;  %9308 = vmatprep.mubr.bf16.mxu1 %v13573_v3  ;;  %v13072_v3 = vld [vmem:[#allocation6 + $0x18] sm:$0xff]  }
 0x558   :  { %11012 = vmatpush3.bf16.msra.mxu0 %v13060_v63  ;;  %11040 = vmatpush3.bf16.msra.mxu1 %v13061_v0 }
 0x559   :  { %11013 = vmatprep.subr.bf16.mxu0 %v13062_v60  ;;  %11041 = vmatprep.subr.bf16.mxu1 %v13063_v1 }
 0x55c   :  { %11014 = vmatpush3.bf16.msra.mxu0 %v13064_v2  ;;  %11042 = vmatpush3.bf16.msra.mxu1 %v13065_v6 }
 0x55d   :  { %11015 = vmatprep.subr.bf16.mxu0 %v13066_v7  ;;  %11043 = vmatprep.subr.bf16.mxu1 %v13067_v8 }
 0x55e   :  { %9203 = vmatmul.mubr.bf16.gmra.mrb[12].mxu0 %v13571_v61  ;;  %9309 = vmatmul.mubr.bf16.gmra.mrb[12].mxu1 %v13571_v61  ;;  %v13081_v61 = vld [vmem:[#allocation6 + $0xa8] sm:$0xff]  }
 0x560   :  { %11016 = vmatpush3.bf16.msra.mxu0 %v13068_v9  ;;  %11044 = vmatpush3.bf16.msra.mxu1 %v13069_v10 }
 0x561   :  { %11017 = vmatprep.subr.bf16.mxu0 %v13070_v4  ;;  %11045 = vmatprep.subr.bf16.mxu1 %v13071_v28 }
 0x564   :  { %11018 = vmatpush3.bf16.msra.mxu0 %v13072_v3  ;;  %11046 = vmatpush3.bf16.msra.mxu1 %v13073_v5 }
 0x565   :  { %11019 = vmatprep.subr.bf16.mxu0 %v13074_v11  ;;  %11047 = vmatprep.subr.bf16.mxu1 %v13075_v12 }
 0x568   :  { %11020 = vmatpush3.bf16.msra.mxu0 %v13076_v13  ;;  %11048 = vmatpush3.bf16.msra.mxu1 %v13077_v14 }
 0x569   :  { %11021 = vmatprep.subr.bf16.mxu0 %v13078_v15  ;;  %11049 = vmatprep.subr.bf16.mxu1 %v13079_v16 }
 0x56c   :  { %11022 = vmatpush3.bf16.msra.mxu0 %v13080_v17  ;;  %11050 = vmatpush3.bf16.msra.mxu1 %v13081_v61 }
 0x56d   :  { %11023 = vmatprep.subr.bf16.mxu0 %v13082_v18  ;;  %11051 = vmatprep.subr.bf16.mxu1 %v13083_v19 }
 0x570   :  { %11024 = vmatpush3.bf16.msra.mxu0 %v13084_v20  ;;  %11052 = vmatpush3.bf16.msra.mxu1 %v13085_v21 }
 0x571   :  { %11025 = vmatprep.subr.bf16.mxu0 %v13086_v22  ;;  %11053 = vmatprep.subr.bf16.mxu1 %v13087_v23 }
 0x574   :  { %11026 = vmatpush3.bf16.msra.mxu0 %v13088_v24  ;;  %11054 = vmatpush3.bf16.msra.mxu1 %v13089_v26 }
 0x629   :  { %v9194_v29 = vpop.f32.mrb[8].mxu0  ;;  %v9300_v30 = vpop.f32.mrb[8].mxu1 }
 0x62a   :  { %vm9319_vm0 = vcmp.ge.f32.partialorder %v9194_v29, 0.0  ;;  %v9335_v31 = vmul.f32 0.1, %v9194_v29  ;;  %v9337_v32 = vmul.f32 0.1, %v9300_v30  ;;  %vm9321_vm1 = vcmp.ge.f32.partialorder %v9300_v30, 0.0 }
 0x62b   :  { %v9196_v41 = vpop.f32.mrb[9].mxu0  ;;  %v9302_v43 = vpop.f32.mrb[9].mxu1 }
 0x62c   :  { %v9336_v25 = vmul.f32 0.1, %v9196_v41  ;;  %v9198_v27 = vpop.f32.mrb[10].mxu0  ;;  %v9304_v34 = vpop.f32.mrb[10].mxu1  ;;  %v9351_v38 = vsel %vm9319_vm0, %v9194_v29, %v9335_v31  ;;  %v9338_v39 = vmul.f32 0.1, %v9302_v43  ;;  %v9353_v36 = vsel %vm9321_vm1, %v9300_v30, %v9337_v32 }
 0x62d   :  { %vm9323_vm2 = vcmp.ge.f32.partialorder %v9198_v27, 0.0  ;;  %v9339_v40 = vmul.f32 0.1, %v9198_v27  ;;  %vm9320_vm3 = vcmp.ge.f32.partialorder %v9196_v41, 0.0  ;;  %vm9325_vm4 = vcmp.ge.f32.partialorder %v9304_v34, 0.0  ;;  %v9200_v33 = vpop.f32.mrb[11].mxu0 }
 0x62e   :  { %v9341_v37 = vmul.f32 0.1, %v9304_v34  ;;  %v9306_v35 = vpop.f32.mrb[11].mxu1  ;;  %vm9322_vm5 = vcmp.ge.f32.partialorder %v9302_v43, 0.0  ;;  %vm9324_vm6 = vcmp.ge.f32.partialorder %v9200_v33, 0.0  ;;  %v9352_v54 = vsel %vm9320_vm3, %v9196_v41, %v9336_v25 }
 0x62f   :  { %v9355_v42 = vsel %vm9323_vm2, %v9198_v27, %v9339_v40  ;;  %v9340_v46 = vmul.f32 0.1, %v9200_v33  ;;  %vm9326_vm7 = vcmp.ge.f32.partialorder %v9306_v35, 0.0  ;;  %v9342_v44 = vmul.f32 0.1, %v9306_v35 }
 0x630   :  { %v9367_v47 = vpack.c.bf16 %v9355_v42, %v9351_v38  ;;  %v9357_v48 = vsel %vm9325_vm4, %v9304_v34, %v9341_v37  ;;  %v9354_v55 = vsel %vm9322_vm5, %v9302_v43, %v9338_v39 }
 0x631   :  { %v9369_v45 = vpack.c.bf16 %v9357_v48, %v9353_v36  ;;  %v9356_v49 = vsel %vm9324_vm6, %v9200_v33, %v9340_v46  ;;  %v9204_v50 = vpop.f32.mrb[12].mxu0  ;;  %v9310_v51 = vpop.f32.mrb[12].mxu1  ;;  %v9358_v56 = vsel %vm9326_vm7, %v9306_v35, %v9342_v44 }
 0x632   :  { %v9343_v52 = vmul.f32 0.1, %v9204_v50  ;;  %v9206_v53 = vpop.f32.mrb[13].mxu0  ;;  %v9312_v57 = vpop.f32.mrb[13].mxu1  ;;  %vm9327_vm8 = vcmp.ge.f32.partialorder %v9204_v50, 0.0  ;;  %vm9329_vm9 = vcmp.ge.f32.partialorder %v9310_v51, 0.0  ;;  %v9368_v63 = vpack.c.bf16 %v9356_v49, %v9352_v54 }
 0x633   :  { %v9345_v58 = vmul.f32 0.1, %v9310_v51  ;;  %vm9328_vm10 = vcmp.ge.f32.partialorder %v9206_v53, 0.0  ;;  %v9344_v59 = vmul.f32 0.1, %v9206_v53  ;;  %v9370_v0 = vpack.c.bf16 %v9358_v56, %v9354_v55  ;;  %v9208_v60 = vpop.f32.mrb[14].mxu0 }
 0x634   :  { %v9346_v62 = vmul.f32 0.1, %v9312_v57  ;;  %v9314_v1 = vpop.f32.mrb[14].mxu1  ;;  %vm9330_vm11 = vcmp.ge.f32.partialorder %v9312_v57, 0.0  ;;  %vm9331_vm12 = vcmp.ge.f32.partialorder %v9208_v60, 0.0  ;;  %v9210_v6 = vpop.f32.mrb[15].mxu0  ;;  %v9359_v8 = vsel %vm9327_vm8, %v9204_v50, %v9343_v52  ;;  %9663 = vmatprep.mubr.bf16.mxu0 %v9368_v63 }
 0x635   :  { %v9347_v2 = vmul.f32 0.1, %v9208_v60  ;;  %v9316_v7 = vpop.f32.mrb[15].mxu1  ;;  %9712 = vmatprep.mubr.bf16.mxu1 %v9370_v0  ;;  %vm9333_vm13 = vcmp.ge.f32.partialorder %v9314_v1, 0.0  ;;  %v9349_v9 = vmul.f32 0.1, %v9314_v1  ;;  %9664 = vmatmul.mubr.bf16.vlgmr.msra.gmra.mrb[16].mxu0 %v9367_v47  ;;  %v9361_v3 = vsel %vm9329_vm9, %v9310_v51, %v9345_v58 }
 0x636   :  { %vm9332_vm14 = vcmp.ge.f32.partialorder %v9210_v6, 0.0  ;;  %9713 = vmatmul.mubr.bf16.vlgmr.msra.gmra.mrb[16].mxu1 %v9369_v45  ;;  %v9348_v4 = vmul.f32 0.1, %v9210_v6  ;;  %vm9334_vm15 = vcmp.ge.f32.partialorder %v9316_v7, 0.0  ;;  %v9350_v28 = vmul.f32 0.1, %v9316_v7 }
 0x637   :  { %v9363_v10 = vsel %vm9331_vm12, %v9208_v60, %v9347_v2  ;;  %v9360_v5 = vsel %vm9328_vm10, %v9206_v53, %v9344_v59  ;;  %v9365_v11 = vsel %vm9333_vm13, %v9314_v1, %v9349_v9  ;;  %v9362_v13 = vsel %vm9330_vm11, %v9312_v57, %v9346_v62 }
 0x638   :  { %v9371_v12 = vpack.c.bf16 %v9363_v10, %v9359_v8  ;;  %v9364_v14 = vsel %vm9332_vm14, %v9210_v6, %v9348_v4  ;;  %v9366_v15 = vsel %vm9334_vm15, %v9316_v7, %v9350_v28  ;;  %v9373_v16 = vpack.c.bf16 %v9365_v11, %v9361_v3 }
 0x639   :  { %v9372_v17 = vpack.c.bf16 %v9364_v14, %v9360_v5  ;;  %v9374_v61 = vpack.c.bf16 %v9366_v15, %v9362_v13 }
 0x63b   :  { %9671 = vmatprep.mubr.bf16.mxu0 %v9372_v17  ;;  %9720 = vmatprep.mubr.bf16.mxu1 %v9374_v61 }
 0x63d   :  { %9672 = vmatmul.mubr.bf16.gmra.mrb[20].mxu0 %v9371_v12 }
 0x63e   :  { %9721 = vmatmul.mubr.bf16.gmra.mrb[20].mxu1 %v9373_v16 }
 0x708   :  { %v11027_v18 = vpop.f32.mrb[16].mxu0 }
 0x709   :  { %v11055_v19 = vpop.f32.mrb[16].mxu1  ;;  %v11028_v20 = vpop.f32.mrb[17].mxu0 }
 0x70a   :  { %v11056_v21 = vpop.f32.mrb[17].mxu1  ;;  %v11029_v22 = vadd.f32 %v11028_v20, %v11027_v18  ;;  %v11030_v24 = vpop.f32.mrb[18].mxu0 }
 0x70b   :  { %v11057_v23 = vadd.f32 %v11056_v21, %v11055_v19  ;;  %v11058_v26 = vpop.f32.mrb[18].mxu1  ;;  %v11031_v29 = vpop.f32.mrb[19].mxu0 }
 0x70c   :  { %v11059_v30 = vpop.f32.mrb[19].mxu1  ;;  %v11032_v32 = vadd.f32 %v11031_v29, %v11030_v24 }
 0x70d   :  { %v9715_v31 = vadd.f32 %v11057_v23, %v11029_v22  ;;  %v11060_v41 = vadd.f32 %v11059_v30, %v11058_v26 }
 0x70f   :  { %v9729_v43 = vsub.f32 0.0, %v9715_v31  ;;  %v9718_v25 = vadd.f32 %v11060_v41, %v11032_v32 }
 0x710   :  { %v11033_v38 = vpop.f32.mrb[20].mxu0 }
 0x711   :  { %v9733_v27 = vmul.f32 1.442695, %v9729_v43  ;;  %v9730_v34 = vsub.f32 0.0, %v9718_v25  ;;  %v11061_v39 = vpop.f32.mrb[20].mxu1  ;;  %v11034_v40 = vpop.f32.mrb[21].mxu0 }
 0x712   :  { %v11062_v36 = vpop.f32.mrb[21].mxu1  ;;  %v11035_v33 = vadd.f32 %v11034_v40, %v11033_v38  ;;  %v11036_v42 = vpop.f32.mrb[22].mxu0 }
 0x713   :  { %13090 = vpow2.f32 %v9733_v27  ;;  %v9735_v37 = vmul.f32 1.442695, %v9730_v34  ;;  %v11063_v35 = vadd.f32 %v11062_v36, %v11061_v39  ;;  %v11064_v46 = vpop.f32.mrb[22].mxu1  ;;  %v11037_v47 = vpop.f32.mrb[23].mxu0 }
 0x714   :  { %v11065_v48 = vpop.f32.mrb[23].mxu1  ;;  %v11038_v45 = vadd.f32 %v11037_v47, %v11036_v42 }
 0x715   :  { %13092 = vpow2.f32 %v9735_v37  ;;  %v9723_v44 = vadd.f32 %v11063_v35, %v11035_v33  ;;  %v11066_v49 = vadd.f32 %v11065_v48, %v11064_v46 }
 0x717   :  { %v9731_v50 = vsub.f32 0.0, %v9723_v44  ;;  %v9726_v51 = vadd.f32 %v11066_v49, %v11038_v45 }
 0x719   :  { %v9737_v54 = vmul.f32 1.442695, %v9731_v50  ;;  %v9732_v55 = vsub.f32 0.0, %v9726_v51 }
 0x71b   :  { %13094 = vpow2.f32 %v9737_v54  ;;  %v9739_v56 = vmul.f32 1.442695, %v9732_v55 }
 0x71d   :  { %v13091_v52 = vpop.eup %13090  ;;  %13096 = vpow2.f32 %v9739_v56 }
 0x71e   :  { %v9741_v53 = vadd.f32 1.0, %v13091_v52 }
 0x71f   :  { %v13093_v57 = vpop.eup %13092 }
 0x720   :  { %13098 = vrcp.f32 %v9741_v53  ;;  %v9742_v58 = vadd.f32 1.0, %v13093_v57 }
 0x722   :  { %13100 = vrcp.f32 %v9742_v58 }
 0x725   :  { %v13095_v59 = vpop.eup %13094 }
 0x726   :  { %v9743_v62 = vadd.f32 1.0, %v13095_v59 }
 0x727   :  { %v13097_v63 = vpop.eup %13096 }
 0x728   :  { %13102 = vrcp.f32 %v9743_v62  ;;  %v9744_v0 = vadd.f32 1.0, %v13097_v63 }
 0x72a   :  { %v13099_v60 = vpop.eup %13098  ;;  %13104 = vrcp.f32 %v9744_v0 }
 0x72b   :  { %9753 = vst [vmem:[%s13601_s4] sm:$0xff] %v13099_v60 }
 0x72c   :  { %v13101_v1 = vpop.eup %13100 }
 0x72d   :  { %9754 = vst [vmem:[%s13601_s4 + $0x8] sm:$0xff] %v13101_v1 }
 0x732   :  { %v13103_v2 = vpop.eup %13102 }
 0x733   :  { %9755 = vst [vmem:[%s13601_s4 + $0x10] sm:$0xff] %v13103_v2 }
 0x734   :  { %v13105_v6 = vpop.eup %13104 }
 0x735   :  { %9756 = vst [vmem:[%s13601_s4 + $0x18] sm:$0xff] %v13105_v6 }
 0x736   :  { %9761 = vsyncpa [#allocation3], 1 }
 0x737   :  { %9762 = vsyncpa [#allocation5], 1 }

</bundles_post_ra>
